<compile_context>
chip_gen: v5e
topology: v5e:2x2
jax: 0.10.0
libtpu: 0.0.40
codegen_flags: <defaults>
</compile_context>

<pallas_src>
import functools

import jax
import jax.numpy as jnp
import numpy as np
from jax import lax
from jax.experimental import pallas as pl
from jax.experimental.pallas import tpu as pltpu

LN_EPS = 1e-5


# ----------------------------------------------------------------------------
# Fused Pallas kernel (all layers + skipcats in one launch)
# ----------------------------------------------------------------------------
def _layernorm_rows(x, w, b):
  mu = jnp.mean(x, axis=-1, keepdims=True)
  var = jnp.mean((x - mu) ** 2, axis=-1, keepdims=True)
  return (x - mu) * lax.rsqrt(var + LN_EPS) * w + b


def _fused_transformer_kernel(*refs, heads, dim_head, use_skipcat):
  """Runs the whole Transformer forward (depth blocks [+ skipcats]) in VMEM.

  refs = (x, vec, wqv, wk, wo, w1, w2, [scw, scb,] out)
    vec : (depth, 8, K)   rows = ln1w, ln1b, bo, ln2w, ln2b, b2, b1, pad
    wqv : (depth*2*heads, dim, dim_head)   per-head Q blocks then V blocks
    wk  : (depth, dim, inner)
    wo  : (depth*heads, dim_head, dim)     per-head row blocks of to_out
    w1  : (depth, dim, mlp);  w2 : (depth, mlp, dim)
    scw : (2*(depth-2), b*n, b*n)          kron(I_b, W[:,:,0]) / kron(I_b, W[:,:,1])
    scb : (depth-2, b*n, 1)
  """
  if use_skipcat:
    (x_ref, vec_ref, wqv_ref, wk_ref, wo_ref, w1_ref, w2_ref,
     scw_ref, scb_ref, out_ref) = refs
  else:
    (x_ref, vec_ref, wqv_ref, wk_ref, wo_ref, w1_ref, w2_ref, out_ref) = refs
    scw_ref = scb_ref = None

  bsz, n, dim = x_ref.shape
  depth = wk_ref.shape[0]
  mlp = w1_ref.shape[2]
  bn = bsz * n
  inner = heads * dim_head
  scale = dim_head ** -0.5
  f32 = jnp.float32

  # Activation stays resident for the whole fused depth; batch collapsed into
  # the matmul row dimension for every row-parallel op.
  x = x_ref[...].astype(f32).reshape(bn, dim)

  prev1 = prev2 = None                      # sliding window of residual history
  for l in range(depth):                    # depth is small & static: unroll
    cur_in = x

    vec = vec_ref[l]                        # (8, K) packed per-layer vectors
    ln1w, ln1b = vec[0:1, :dim], vec[1:2, :dim]
    bo = vec[2:3, :dim]
    ln2w, ln2b = vec[3:4, :dim], vec[4:5, :dim]
    b2 = vec[5:6, :dim]
    b1 = vec[6:7, :mlp]

    # ---- CAF skipcat: Conv2d(n, n, [1, 2]) over [x, last_output[l-2]] ------
    # out[b,o,d] = sum_i W0[o,i]*x[b,i,d] + W1[o,i]*prev[b,i,d] + bias[o]
    # Pre-packed host-side as block-diagonal (bn, bn) weights -> two plain
    # matmuls on the flat (bn, dim) activation; no concat/reshape/relayout.
    if use_skipcat and l > 1:
      w0bd = scw_ref[2 * (l - 2)]
      w1bd = scw_ref[2 * (l - 2) + 1]
      x = (jnp.dot(w0bd, x, preferred_element_type=f32)
           + jnp.dot(w1bd, prev2, preferred_element_type=f32)
           + scb_ref[l - 2])

    # ---- PreNorm + Attention + residual ------------------------------------
    xn = _layernorm_rows(x, ln1w, ln1b)
    # K slab once, transpose hoisted to one XLU push per layer.
    k_full = jnp.dot(xn, wk_ref[l], preferred_element_type=f32)   # (bn, inner)
    kT = jnp.swapaxes(k_full.reshape(bsz, n, inner), 1, 2)        # (b, inner, n)

    dots_list, v_list = [], []
    for h in range(heads):                  # tiny & static: unroll
      q_h = jnp.dot(xn, wqv_ref[(2 * l) * heads + h],
                    preferred_element_type=f32).reshape(bsz, n, dim_head)
      v_list.append(jnp.dot(xn, wqv_ref[(2 * l + 1) * heads + h],
                            preferred_element_type=f32).reshape(bsz, n, dim_head))
      kT_h = kT[:, h * dim_head:(h + 1) * dim_head, :]             # sublane slice
      dots_list.append(jnp.einsum('bid,bdj->bij', q_h, kT_h,
                                  preferred_element_type=f32) * scale)

    # One softmax over all heads & batches: single max/exp/sum/reciprocal.
    dots = jnp.concatenate(dots_list, axis=0)                      # (heads*b, n, n)
    dots = dots - jnp.max(dots, axis=-1, keepdims=True)
    p = jnp.exp(dots)
    p = p * pl.reciprocal(jnp.sum(p, axis=-1, keepdims=True), approx=True)

    x = x + bo                               # to_out bias added once
    for h in range(heads):
      o_h = jnp.einsum('bij,bjd->bid', p[h * bsz:(h + 1) * bsz], v_list[h],
                       preferred_element_type=f32).reshape(bn, dim_head)
      # Accumulate per-head through its Wo row block (no lane-axis concat).
      x = x + jnp.dot(o_h, wo_ref[l * heads + h], preferred_element_type=f32)

    # ---- PreNorm + FeedForward + residual ----------------------------------
    xn2 = _layernorm_rows(x, ln2w, ln2b)
    h1 = jnp.dot(xn2, w1_ref[l], preferred_element_type=f32) + b1
    h1 = jax.nn.gelu(h1, approximate=True)   # tanh approx (EUP); dev ~1e-3
    x = x + jnp.dot(h1, w2_ref[l], preferred_element_type=f32) + b2

    prev2, prev1 = prev1, cur_in

  out_ref[...] = x.reshape(bsz, n, dim).astype(out_ref.dtype)


# ----------------------------------------------------------------------------
# Host-side weight packing (consolidated, relayout-free layouts for the kernel)
# ----------------------------------------------------------------------------
def _pack_params(layer_params, skipcat_params, heads, dim_head, batch,
                 use_skipcat):
  dim = layer_params[0][2].shape[0]
  mlp = layer_params[0][7].shape[1]
  inner = heads * dim_head
  K = max(dim, mlp)

  def pad_row(v):
    v = jnp.asarray(v, jnp.float32).reshape(-1)
    return jnp.pad(v, (0, K - v.shape[0]))

  vec_rows, wqv_b, wk_b, wo_b, w1_b, w2_b = [], [], [], [], [], []
  for (ln1w, ln1b, wqkv, wo, bo, ln2w, ln2b, w1, b1, w2, b2) in layer_params:
    vec_rows.append(jnp.stack([pad_row(ln1w), pad_row(ln1b), pad_row(bo),
                               pad_row(ln2w), pad_row(ln2b), pad_row(b2),
                               pad_row(b1), jnp.zeros((K,), jnp.float32)]))
    wq = wqkv[:, :inner]
    wk = wqkv[:, inner:2 * inner]
    wv = wqkv[:, 2 * inner:]
    for h in range(heads):                                   # Q heads first
      wqv_b.append(wq[:, h * dim_head:(h + 1) * dim_head])
    for h in range(heads):                                   # then V heads
      wqv_b.append(wv[:, h * dim_head:(h + 1) * dim_head])
    wk_b.append(wk)
    for h in range(heads):
      wo_b.append(wo[h * dim_head:(h + 1) * dim_head, :])
    w1_b.append(w1)
    w2_b.append(w2)

  args = [jnp.stack(vec_rows), jnp.stack(wqv_b), jnp.stack(wk_b),
          jnp.stack(wo_b), jnp.stack(w1_b), jnp.stack(w2_b)]

  if use_skipcat:
    eye_b = jnp.eye(batch, dtype=jnp.float32)
    scw_b, scb_b = [], []
    for (w0, w1c, bias) in skipcat_params:
      scw_b.append(jnp.kron(eye_b, w0))        # (b*n, b*n) block-diagonal
      scw_b.append(jnp.kron(eye_b, w1c))
      scb_b.append(jnp.tile(bias, (batch, 1))) # (b*n, 1)
    args += [jnp.stack(scw_b), jnp.stack(scb_b)]
  return args


# ----------------------------------------------------------------------------
# Wrapper (single pallas_call for the whole forward)
# ----------------------------------------------------------------------------
def transformer_forward(x, layer_params, skipcat_params, heads, dim_head,
                        mode="CAF", mask=None):
  """Mirrors Transformer.forward (mask must be None) as ONE fused kernel."""
  assert mask is None  # TODO(synk): masked attention path not implemented.
  b, n, dim = x.shape
  depth = len(layer_params)
  use_skipcat = (mode == "CAF") and depth > 2

  args = [x] + _pack_params(layer_params, skipcat_params, heads, dim_head, b,
                            use_skipcat)

  kernel = functools.partial(_fused_transformer_kernel, heads=heads,
                             dim_head=dim_head, use_skipcat=use_skipcat)

  def full_spec(a):
    nd = a.ndim
    return pl.BlockSpec(a.shape, lambda i, _nd=nd: (0,) * _nd)

  # NOTE: on v7x a batch grid=(b,) marked "parallel" could use the 2nd
  # TensorCore; at this size the single fused step is the portable win.
  return pl.pallas_call(
      kernel,
      out_shape=jax.ShapeDtypeStruct(x.shape, x.dtype),
      grid=(1,),
      in_specs=[full_spec(a) for a in args],
      out_specs=pl.BlockSpec((b, n, dim), lambda i: (0, 0, 0)),
      compiler_params=pltpu.CompilerParams(
          dimension_semantics=("arbitrary",)),
  )(*args)


# ----------------------------------------------------------------------------
# Pure-JAX reference (for correctness check)
# ----------------------------------------------------------------------------
def _ref_layernorm(x, w, b):
  mu = jnp.mean(x, -1, keepdims=True)
  var = jnp.mean((x - mu) ** 2, -1, keepdims=True)
  return (x - mu) * lax.rsqrt(var + LN_EPS) * w + b


def _ref_block(x, p, heads, dim_head):
  ln1_w, ln1_b, wqkv, wo, bo, ln2_w, ln2_b, w1, b1, w2, b2 = p
  b, n, dim = x.shape
  inner = heads * dim_head
  hp = lax.Precision.HIGHEST
  xn = _ref_layernorm(x, ln1_w, ln1_b)
  qkv = jnp.einsum('bnd,de->bne', xn, wqkv, precision=hp)
  q, k, v = jnp.split(qkv, 3, axis=-1)
  sh = lambda t: t.reshape(b, n, heads, dim_head).transpose(0, 2, 1, 3)
  q, k, v = map(sh, (q, k, v))
  dots = jnp.einsum('bhid,bhjd->bhij', q, k, precision=hp) * dim_head ** -0.5
  attn = jax.nn.softmax(dots, axis=-1)
  o = jnp.einsum('bhij,bhjd->bhid', attn, v, precision=hp)
  o = o.transpose(0, 2, 1, 3).reshape(b, n, inner)
  x = x + jnp.einsum('bni,id->bnd', o, wo, precision=hp) + bo
  xn2 = _ref_layernorm(x, ln2_w, ln2_b)
  h1 = jax.nn.gelu(jnp.einsum('bnd,dh->bnh', xn2, w1, precision=hp) + b1,
                   approximate=False)
  return x + jnp.einsum('bnh,hd->bnd', h1, w2, precision=hp) + b2


def _ref_forward(x, layer_params, skipcat_params, heads, dim_head, mode="CAF"):
  hp = lax.Precision.HIGHEST
  if mode == "ViT":
    for p in layer_params:
      x = _ref_block(x, p, heads, dim_head)
    return x
  last_output = []
  for nl, p in enumerate(layer_params):
    last_output.append(x)
    if nl > 1:
      w0, w1, bias = skipcat_params[nl - 2]
      x = (jnp.einsum('oi,bid->bod', w0, x, precision=hp)
           + jnp.einsum('oi,bid->bod', w1, last_output[nl - 2], precision=hp)
           + bias)
    x = _ref_block(x, p, heads, dim_head)
  return x


# ----------------------------------------------------------------------------
# Deterministic parameter init (shapes from the module __init__)
# ----------------------------------------------------------------------------
def init_params(key, dim, depth, heads, dim_head, mlp_head, num_channel):
  inner = heads * dim_head
  n = num_channel + 1
  keys = iter(jax.random.split(key, depth * 6 + max(depth - 2, 0) * 2 + 4))
  nxt = lambda: next(keys)
  nrm = lambda k, shape, s: jax.random.normal(k, shape, jnp.float32) * s

  layer_params = []
  for _ in range(depth):
    layer_params.append((
        jnp.ones((1, dim), jnp.float32),               # ln1 weight
        jnp.zeros((1, dim), jnp.float32),              # ln1 bias
        nrm(nxt(), (dim, 3 * inner), dim ** -0.5),     # to_qkv (no bias)
        nrm(nxt(), (inner, dim), inner ** -0.5),       # to_out weight
        nrm(nxt(), (1, dim), 0.02),                    # to_out bias
        jnp.ones((1, dim), jnp.float32),               # ln2 weight
        jnp.zeros((1, dim), jnp.float32),              # ln2 bias
        nrm(nxt(), (dim, mlp_head), dim ** -0.5),      # ff linear1 weight
        nrm(nxt(), (1, mlp_head), 0.02),               # ff linear1 bias
        nrm(nxt(), (mlp_head, dim), mlp_head ** -0.5), # ff linear2 weight
        nrm(nxt(), (1, dim), 0.02),                    # ff linear2 bias
    ))

  skipcat_params = []
  for _ in range(max(depth - 2, 0)):
    # Conv2d(n, n, [1, 2]) weight -> W[:,:,0,0] and W[:,:,0,1], plus bias.
    w = nrm(nxt(), (n, n, 2), (2 * n) ** -0.5)
    bias = nrm(nxt(), (n, 1), 0.02)
    skipcat_params.append((w[:, :, 0], w[:, :, 1], bias))
  return layer_params, skipcat_params


# ----------------------------------------------------------------------------
if __name__ == "__main__":
  key = jax.random.PRNGKey(0)
  k_param, k_x = jax.random.split(key)

  # Module hyper-parameters (small): Transformer(dim=32, depth=4, heads=2,
  # dim_head=16, mlp_head=64, dropout=0.0, num_channel=7, mode='CAF')
  dim, depth, heads, dim_head, mlp_head = 32, 4, 2, 16, 64
  num_channel = 7
  batch, n = 2, num_channel + 1

  layer_params, skipcat_params = init_params(
      k_param, dim, depth, heads, dim_head, mlp_head, num_channel)
  x = jax.random.normal(k_x, (batch, n, dim), jnp.float32)

  # --- CAF mode (skipcat path) ---
  out_caf = transformer_forward(x, layer_params, skipcat_params, heads,
                                dim_head, mode="CAF", mask=None)
  out_caf = jax.block_until_ready(out_caf)
  ref_caf = _ref_forward(x, layer_params, skipcat_params, heads, dim_head,
                         mode="CAF")
  assert out_caf.shape == x.shape
  assert np.all(np.isfinite(np.asarray(out_caf)))
  # 1e-2 tolerance absorbs approx-GELU / approx-reciprocal deviations.
  assert np.allclose(np.asarray(out_caf), np.asarray(ref_caf),
                     atol=1e-2, rtol=1e-2)

  # --- ViT mode (no skipcat) ---
  out_vit = transformer_forward(x, layer_params, skipcat_params, heads,
                                dim_head, mode="ViT", mask=None)
  out_vit = jax.block_until_ready(out_vit)
  ref_vit = _ref_forward(x, layer_params, skipcat_params, heads, dim_head,
                         mode="ViT")
  assert np.allclose(np.asarray(out_vit), np.asarray(ref_vit),
                     atol=1e-2, rtol=1e-2)

  print("KERNEL_OK")
</pallas_src>

<mosaic_0001>
module attributes {stable_mosaic.version = 11 : i64} {
  func.func @_fused_transformer_kernel(%arg0: i32, %arg1: memref<2x8x32xf32, #tpu.memory_space<vmem>>, %arg2: memref<4x8x64xf32, #tpu.memory_space<vmem>>, %arg3: memref<16x32x16xf32, #tpu.memory_space<vmem>>, %arg4: memref<4x32x32xf32, #tpu.memory_space<vmem>>, %arg5: memref<8x16x32xf32, #tpu.memory_space<vmem>>, %arg6: memref<4x32x64xf32, #tpu.memory_space<vmem>>, %arg7: memref<4x64x32xf32, #tpu.memory_space<vmem>>, %arg8: memref<4x16x16xf32, #tpu.memory_space<vmem>>, %arg9: memref<2x16x1xf32, #tpu.memory_space<vmem>>, %arg10: memref<2x8x32xf32, #tpu.memory_space<vmem>>) attributes {dimension_semantics = [#tpu.dimension_semantics<arbitrary>], iteration_bounds = array<i64: 1>, scalar_prefetch = 0 : i64, scratch_operands = 0 : i64, tpu.core_type = #tpu.core_type<tc>, window_params = [{pipeline_mode = #tpu.pipeline_mode<synchronous>, transform_indices = @transform_0, window_bounds = array<i64: 2, 8, 32>}, {pipeline_mode = #tpu.pipeline_mode<synchronous>, transform_indices = @transform_1, window_bounds = array<i64: 4, 8, 64>}, {pipeline_mode = #tpu.pipeline_mode<synchronous>, transform_indices = @transform_2, window_bounds = array<i64: 16, 32, 16>}, {pipeline_mode = #tpu.pipeline_mode<synchronous>, transform_indices = @transform_3, window_bounds = array<i64: 4, 32, 32>}, {pipeline_mode = #tpu.pipeline_mode<synchronous>, transform_indices = @transform_4, window_bounds = array<i64: 8, 16, 32>}, {pipeline_mode = #tpu.pipeline_mode<synchronous>, transform_indices = @transform_5, window_bounds = array<i64: 4, 32, 64>}, {pipeline_mode = #tpu.pipeline_mode<synchronous>, transform_indices = @transform_6, window_bounds = array<i64: 4, 64, 32>}, {pipeline_mode = #tpu.pipeline_mode<synchronous>, transform_indices = @transform_7, window_bounds = array<i64: 4, 16, 16>}, {pipeline_mode = #tpu.pipeline_mode<synchronous>, transform_indices = @transform_8, window_bounds = array<i64: 2, 16, 1>}, {pipeline_mode = #tpu.pipeline_mode<synchronous>, transform_indices = @transform_9, window_bounds = array<i64: 2, 8, 32>}]} {
    %c0 = arith.constant 0 : index
    %c0_0 = arith.constant 0 : index
    %c0_1 = arith.constant 0 : index
    %0 = vector.load %arg1[%c0, %c0_0, %c0_1] : memref<2x8x32xf32, #tpu.memory_space<vmem>>, vector<2x8x32xf32>
    %1 = vector.shape_cast %0 : vector<2x8x32xf32> to vector<16x32xf32>
    %c0_2 = arith.constant 0 : index
    %c0_3 = arith.constant 0 : index
    %c0_4 = arith.constant 0 : index
    %2 = vector.load %arg2[%c0_2, %c0_3, %c0_4] : memref<4x8x64xf32, #tpu.memory_space<vmem>>, vector<1x8x64xf32>
    %3 = vector.shape_cast %2 : vector<1x8x64xf32> to vector<8x64xf32>
    %4 = vector.extract_strided_slice %3 {offsets = [0, 0], sizes = [1, 32], strides = [1, 1]} : vector<8x64xf32> to vector<1x32xf32>
    %5 = vector.extract_strided_slice %3 {offsets = [1, 0], sizes = [1, 32], strides = [1, 1]} : vector<8x64xf32> to vector<1x32xf32>
    %6 = vector.extract_strided_slice %3 {offsets = [2, 0], sizes = [1, 32], strides = [1, 1]} : vector<8x64xf32> to vector<1x32xf32>
    %7 = vector.extract_strided_slice %3 {offsets = [3, 0], sizes = [1, 32], strides = [1, 1]} : vector<8x64xf32> to vector<1x32xf32>
    %8 = vector.extract_strided_slice %3 {offsets = [4, 0], sizes = [1, 32], strides = [1, 1]} : vector<8x64xf32> to vector<1x32xf32>
    %9 = vector.extract_strided_slice %3 {offsets = [5, 0], sizes = [1, 32], strides = [1, 1]} : vector<8x64xf32> to vector<1x32xf32>
    %10 = vector.extract_strided_slice %3 {offsets = [6, 0], sizes = [1, 64], strides = [1, 1]} : vector<8x64xf32> to vector<1x64xf32>
    %cst = arith.constant dense<0.000000e+00> : vector<16xf32>
    %11 = vector.multi_reduction <add>, %1, %cst [1] : vector<16x32xf32> to vector<16xf32>
    %12 = vector.shape_cast %11 : vector<16xf32> to vector<16x1xf32>
    %cst_5 = arith.constant 3.200000e+01 : f32
    %13 = vector.broadcast %cst_5 : f32 to vector<16x1xf32>
    %14 = arith.divf %12, %13 : vector<16x1xf32>
    %15 = vector.broadcast %14 : vector<16x1xf32> to vector<16x32xf32>
    %16 = arith.subf %1, %15 : vector<16x32xf32>
    %17 = arith.mulf %16, %16 : vector<16x32xf32>
    %cst_6 = arith.constant dense<0.000000e+00> : vector<16xf32>
    %18 = vector.multi_reduction <add>, %17, %cst_6 [1] : vector<16x32xf32> to vector<16xf32>
    %19 = vector.shape_cast %18 : vector<16xf32> to vector<16x1xf32>
    %cst_7 = arith.constant 3.200000e+01 : f32
    %20 = vector.broadcast %cst_7 : f32 to vector<16x1xf32>
    %21 = arith.divf %19, %20 : vector<16x1xf32>
    %22 = vector.broadcast %14 : vector<16x1xf32> to vector<16x32xf32>
    %23 = arith.subf %1, %22 : vector<16x32xf32>
    %cst_8 = arith.constant 9.99999974E-6 : f32
    %24 = vector.broadcast %cst_8 : f32 to vector<16x1xf32>
    %25 = arith.addf %21, %24 : vector<16x1xf32>
    %26 = math.rsqrt %25 : vector<16x1xf32>
    %27 = vector.broadcast %26 : vector<16x1xf32> to vector<16x32xf32>
    %28 = arith.mulf %23, %27 : vector<16x32xf32>
    %29 = vector.broadcast %4 : vector<1x32xf32> to vector<16x32xf32>
    %30 = arith.mulf %28, %29 : vector<16x32xf32>
    %31 = vector.broadcast %5 : vector<1x32xf32> to vector<16x32xf32>
    %32 = arith.addf %30, %31 : vector<16x32xf32>
    %c0_9 = arith.constant 0 : index
    %c0_10 = arith.constant 0 : index
    %c0_11 = arith.constant 0 : index
    %33 = vector.load %arg4[%c0_9, %c0_10, %c0_11] : memref<4x32x32xf32, #tpu.memory_space<vmem>>, vector<1x32x32xf32>
    %34 = vector.shape_cast %33 : vector<1x32x32xf32> to vector<32x32xf32>
    %cst_12 = arith.constant dense<0.000000e+00> : vector<16x32xf32>
    %35 = tpu.matmul %32, %34, %cst_12 {dimension_numbers = #tpu.dot_dimension_numbers<[1], [0], [0], [1], [0, 0, 1, 1], [], []>} : vector<16x32xf32>, vector<32x32xf32>, vector<16x32xf32> -> vector<16x32xf32>
    %36 = vector.shape_cast %35 : vector<16x32xf32> to vector<2x8x32xf32>
    %37 = tpu.transpose %36, [0, 2, 1] : vector<2x8x32xf32> -> vector<2x32x8xf32>
    %c0_13 = arith.constant 0 : index
    %c0_14 = arith.constant 0 : index
    %c0_15 = arith.constant 0 : index
    %38 = vector.load %arg3[%c0_13, %c0_14, %c0_15] : memref<16x32x16xf32, #tpu.memory_space<vmem>>, vector<1x32x16xf32>
    %39 = vector.shape_cast %38 : vector<1x32x16xf32> to vector<32x16xf32>
    %cst_16 = arith.constant dense<0.000000e+00> : vector<16x16xf32>
    %40 = tpu.matmul %32, %39, %cst_16 {dimension_numbers = #tpu.dot_dimension_numbers<[1], [0], [0], [1], [0, 0, 1, 1], [], []>} : vector<16x32xf32>, vector<32x16xf32>, vector<16x16xf32> -> vector<16x16xf32>
    %41 = vector.shape_cast %40 : vector<16x16xf32> to vector<2x8x16xf32>
    %c2 = arith.constant 2 : index
    %c0_17 = arith.constant 0 : index
    %c0_18 = arith.constant 0 : index
    %42 = vector.load %arg3[%c2, %c0_17, %c0_18] : memref<16x32x16xf32, #tpu.memory_space<vmem>>, vector<1x32x16xf32>
    %43 = vector.shape_cast %42 : vector<1x32x16xf32> to vector<32x16xf32>
    %cst_19 = arith.constant dense<0.000000e+00> : vector<16x16xf32>
    %44 = tpu.matmul %32, %43, %cst_19 {dimension_numbers = #tpu.dot_dimension_numbers<[1], [0], [0], [1], [0, 0, 1, 1], [], []>} : vector<16x32xf32>, vector<32x16xf32>, vector<16x16xf32> -> vector<16x16xf32>
    %45 = vector.shape_cast %44 : vector<16x16xf32> to vector<2x8x16xf32>
    %46 = vector.extract_strided_slice %37 {offsets = [0, 0, 0], sizes = [2, 16, 8], strides = [1, 1, 1]} : vector<2x32x8xf32> to vector<2x16x8xf32>
    "tpu.trace_start"() <{level = 10 : i32, message = "bid,bdj->bij"}> : () -> ()
    %cst_20 = arith.constant dense<0.000000e+00> : vector<2x8x8xf32>
    %47 = tpu.matmul %41, %46, %cst_20 {dimension_numbers = #tpu.dot_dimension_numbers<[2], [1], [1], [2], [0, 0, 0, 1, 1, 2], [0], [0]>} : vector<2x8x16xf32>, vector<2x16x8xf32>, vector<2x8x8xf32> -> vector<2x8x8xf32>
    "tpu.trace_stop"() : () -> ()
    %cst_21 = arith.constant 2.500000e-01 : f32
    %48 = vector.broadcast %cst_21 : f32 to vector<2x8x8xf32>
    %49 = arith.mulf %47, %48 : vector<2x8x8xf32>
    %c1 = arith.constant 1 : index
    %c0_22 = arith.constant 0 : index
    %c0_23 = arith.constant 0 : index
    %50 = vector.load %arg3[%c1, %c0_22, %c0_23] : memref<16x32x16xf32, #tpu.memory_space<vmem>>, vector<1x32x16xf32>
    %51 = vector.shape_cast %50 : vector<1x32x16xf32> to vector<32x16xf32>
    %cst_24 = arith.constant dense<0.000000e+00> : vector<16x16xf32>
    %52 = tpu.matmul %32, %51, %cst_24 {dimension_numbers = #tpu.dot_dimension_numbers<[1], [0], [0], [1], [0, 0, 1, 1], [], []>} : vector<16x32xf32>, vector<32x16xf32>, vector<16x16xf32> -> vector<16x16xf32>
    %53 = vector.shape_cast %52 : vector<16x16xf32> to vector<2x8x16xf32>
    %c3 = arith.constant 3 : index
    %c0_25 = arith.constant 0 : index
    %c0_26 = arith.constant 0 : index
    %54 = vector.load %arg3[%c3, %c0_25, %c0_26] : memref<16x32x16xf32, #tpu.memory_space<vmem>>, vector<1x32x16xf32>
    %55 = vector.shape_cast %54 : vector<1x32x16xf32> to vector<32x16xf32>
    %cst_27 = arith.constant dense<0.000000e+00> : vector<16x16xf32>
    %56 = tpu.matmul %32, %55, %cst_27 {dimension_numbers = #tpu.dot_dimension_numbers<[1], [0], [0], [1], [0, 0, 1, 1], [], []>} : vector<16x32xf32>, vector<32x16xf32>, vector<16x16xf32> -> vector<16x16xf32>
    %57 = vector.shape_cast %56 : vector<16x16xf32> to vector<2x8x16xf32>
    %58 = vector.extract_strided_slice %37 {offsets = [0, 16, 0], sizes = [2, 16, 8], strides = [1, 1, 1]} : vector<2x32x8xf32> to vector<2x16x8xf32>
    "tpu.trace_start"() <{level = 10 : i32, message = "bid,bdj->bij"}> : () -> ()
    %cst_28 = arith.constant dense<0.000000e+00> : vector<2x8x8xf32>
    %59 = tpu.matmul %53, %58, %cst_28 {dimension_numbers = #tpu.dot_dimension_numbers<[2], [1], [1], [2], [0, 0, 0, 1, 1, 2], [0], [0]>} : vector<2x8x16xf32>, vector<2x16x8xf32>, vector<2x8x8xf32> -> vector<2x8x8xf32>
    "tpu.trace_stop"() : () -> ()
    %cst_29 = arith.constant 2.500000e-01 : f32
    %60 = vector.broadcast %cst_29 : f32 to vector<2x8x8xf32>
    %61 = arith.mulf %59, %60 : vector<2x8x8xf32>
    %62 = tpu.concatenate %49, %61 in 0 : vector<2x8x8xf32>, vector<2x8x8xf32> -> vector<4x8x8xf32>
    %cst_30 = arith.constant dense<0xFF800000> : vector<4x8xf32>
    %63 = vector.multi_reduction <maximumf>, %62, %cst_30 [2] : vector<4x8x8xf32> to vector<4x8xf32>
    %64 = vector.shape_cast %63 : vector<4x8xf32> to vector<4x8x1xf32>
    %65 = vector.broadcast %64 : vector<4x8x1xf32> to vector<4x8x8xf32>
    %66 = arith.subf %62, %65 : vector<4x8x8xf32>
    %67 = math.exp %66 : vector<4x8x8xf32>
    %cst_31 = arith.constant dense<0.000000e+00> : vector<4x8xf32>
    %68 = vector.multi_reduction <add>, %67, %cst_31 [2] : vector<4x8x8xf32> to vector<4x8xf32>
    %69 = vector.shape_cast %68 : vector<4x8xf32> to vector<4x8x1xf32>
    %70 = tpu.reciprocal %69 {approx = true} : vector<4x8x1xf32> -> vector<4x8x1xf32>
    %71 = vector.broadcast %70 : vector<4x8x1xf32> to vector<4x8x8xf32>
    %72 = arith.mulf %67, %71 : vector<4x8x8xf32>
    %73 = vector.broadcast %6 : vector<1x32xf32> to vector<16x32xf32>
    %74 = arith.addf %1, %73 : vector<16x32xf32>
    %75 = vector.extract_strided_slice %72 {offsets = [0, 0, 0], sizes = [2, 8, 8], strides = [1, 1, 1]} : vector<4x8x8xf32> to vector<2x8x8xf32>
    "tpu.trace_start"() <{level = 10 : i32, message = "bij,bjd->bid"}> : () -> ()
    %cst_32 = arith.constant dense<0.000000e+00> : vector<2x8x16xf32>
    %76 = tpu.matmul %75, %45, %cst_32 {dimension_numbers = #tpu.dot_dimension_numbers<[2], [1], [1], [2], [0, 0, 0, 1, 1, 2], [0], [0]>} : vector<2x8x8xf32>, vector<2x8x16xf32>, vector<2x8x16xf32> -> vector<2x8x16xf32>
    "tpu.trace_stop"() : () -> ()
    %77 = vector.shape_cast %76 : vector<2x8x16xf32> to vector<16x16xf32>
    %c0_33 = arith.constant 0 : index
    %c0_34 = arith.constant 0 : index
    %c0_35 = arith.constant 0 : index
    %78 = vector.load %arg5[%c0_33, %c0_34, %c0_35] : memref<8x16x32xf32, #tpu.memory_space<vmem>>, vector<1x16x32xf32>
    %79 = vector.shape_cast %78 : vector<1x16x32xf32> to vector<16x32xf32>
    %cst_36 = arith.constant dense<0.000000e+00> : vector<16x32xf32>
    %80 = tpu.matmul %77, %79, %cst_36 {dimension_numbers = #tpu.dot_dimension_numbers<[1], [0], [0], [1], [0, 0, 1, 1], [], []>} : vector<16x16xf32>, vector<16x32xf32>, vector<16x32xf32> -> vector<16x32xf32>
    %81 = arith.addf %74, %80 : vector<16x32xf32>
    %82 = vector.extract_strided_slice %72 {offsets = [2, 0, 0], sizes = [2, 8, 8], strides = [1, 1, 1]} : vector<4x8x8xf32> to vector<2x8x8xf32>
    "tpu.trace_start"() <{level = 10 : i32, message = "bij,bjd->bid"}> : () -> ()
    %cst_37 = arith.constant dense<0.000000e+00> : vector<2x8x16xf32>
    %83 = tpu.matmul %82, %57, %cst_37 {dimension_numbers = #tpu.dot_dimension_numbers<[2], [1], [1], [2], [0, 0, 0, 1, 1, 2], [0], [0]>} : vector<2x8x8xf32>, vector<2x8x16xf32>, vector<2x8x16xf32> -> vector<2x8x16xf32>
    "tpu.trace_stop"() : () -> ()
    %84 = vector.shape_cast %83 : vector<2x8x16xf32> to vector<16x16xf32>
    %c1_38 = arith.constant 1 : index
    %c0_39 = arith.constant 0 : index
    %c0_40 = arith.constant 0 : index
    %85 = vector.load %arg5[%c1_38, %c0_39, %c0_40] : memref<8x16x32xf32, #tpu.memory_space<vmem>>, vector<1x16x32xf32>
    %86 = vector.shape_cast %85 : vector<1x16x32xf32> to vector<16x32xf32>
    %cst_41 = arith.constant dense<0.000000e+00> : vector<16x32xf32>
    %87 = tpu.matmul %84, %86, %cst_41 {dimension_numbers = #tpu.dot_dimension_numbers<[1], [0], [0], [1], [0, 0, 1, 1], [], []>} : vector<16x16xf32>, vector<16x32xf32>, vector<16x32xf32> -> vector<16x32xf32>
    %88 = arith.addf %81, %87 : vector<16x32xf32>
    %cst_42 = arith.constant dense<0.000000e+00> : vector<16xf32>
    %89 = vector.multi_reduction <add>, %88, %cst_42 [1] : vector<16x32xf32> to vector<16xf32>
    %90 = vector.shape_cast %89 : vector<16xf32> to vector<16x1xf32>
    %cst_43 = arith.constant 3.200000e+01 : f32
    %91 = vector.broadcast %cst_43 : f32 to vector<16x1xf32>
    %92 = arith.divf %90, %91 : vector<16x1xf32>
    %93 = vector.broadcast %92 : vector<16x1xf32> to vector<16x32xf32>
    %94 = arith.subf %88, %93 : vector<16x32xf32>
    %95 = arith.mulf %94, %94 : vector<16x32xf32>
    %cst_44 = arith.constant dense<0.000000e+00> : vector<16xf32>
    %96 = vector.multi_reduction <add>, %95, %cst_44 [1] : vector<16x32xf32> to vector<16xf32>
    %97 = vector.shape_cast %96 : vector<16xf32> to vector<16x1xf32>
    %cst_45 = arith.constant 3.200000e+01 : f32
    %98 = vector.broadcast %cst_45 : f32 to vector<16x1xf32>
    %99 = arith.divf %97, %98 : vector<16x1xf32>
    %100 = vector.broadcast %92 : vector<16x1xf32> to vector<16x32xf32>
    %101 = arith.subf %88, %100 : vector<16x32xf32>
    %cst_46 = arith.constant 9.99999974E-6 : f32
    %102 = vector.broadcast %cst_46 : f32 to vector<16x1xf32>
    %103 = arith.addf %99, %102 : vector<16x1xf32>
    %104 = math.rsqrt %103 : vector<16x1xf32>
    %105 = vector.broadcast %104 : vector<16x1xf32> to vector<16x32xf32>
    %106 = arith.mulf %101, %105 : vector<16x32xf32>
    %107 = vector.broadcast %7 : vector<1x32xf32> to vector<16x32xf32>
    %108 = arith.mulf %106, %107 : vector<16x32xf32>
    %109 = vector.broadcast %8 : vector<1x32xf32> to vector<16x32xf32>
    %110 = arith.addf %108, %109 : vector<16x32xf32>
    %c0_47 = arith.constant 0 : index
    %c0_48 = arith.constant 0 : index
    %c0_49 = arith.constant 0 : index
    %111 = vector.load %arg6[%c0_47, %c0_48, %c0_49] : memref<4x32x64xf32, #tpu.memory_space<vmem>>, vector<1x32x64xf32>
    %112 = vector.shape_cast %111 : vector<1x32x64xf32> to vector<32x64xf32>
    %cst_50 = arith.constant dense<0.000000e+00> : vector<16x64xf32>
    %113 = tpu.matmul %110, %112, %cst_50 {dimension_numbers = #tpu.dot_dimension_numbers<[1], [0], [0], [1], [0, 0, 1, 1], [], []>} : vector<16x32xf32>, vector<32x64xf32>, vector<16x64xf32> -> vector<16x64xf32>
    %114 = vector.broadcast %10 : vector<1x64xf32> to vector<16x64xf32>
    %115 = arith.addf %113, %114 : vector<16x64xf32>
    %116 = arith.mulf %115, %115 : vector<16x64xf32>
    %117 = arith.mulf %115, %116 : vector<16x64xf32>
    %cst_51 = arith.constant 4.471500e-02 : f32
    %118 = vector.broadcast %cst_51 : f32 to vector<16x64xf32>
    %119 = arith.mulf %118, %117 : vector<16x64xf32>
    %120 = arith.addf %115, %119 : vector<16x64xf32>
    %cst_52 = arith.constant 0.797884583 : f32
    %121 = vector.broadcast %cst_52 : f32 to vector<16x64xf32>
    %122 = arith.mulf %121, %120 : vector<16x64xf32>
    %123 = math.tanh %122 : vector<16x64xf32>
    %cst_53 = arith.constant 1.000000e+00 : f32
    %124 = vector.broadcast %cst_53 : f32 to vector<16x64xf32>
    %125 = arith.addf %124, %123 : vector<16x64xf32>
    %cst_54 = arith.constant 5.000000e-01 : f32
    %126 = vector.broadcast %cst_54 : f32 to vector<16x64xf32>
    %127 = arith.mulf %126, %125 : vector<16x64xf32>
    %128 = arith.mulf %115, %127 : vector<16x64xf32>
    %c0_55 = arith.constant 0 : index
    %c0_56 = arith.constant 0 : index
    %c0_57 = arith.constant 0 : index
    %129 = vector.load %arg7[%c0_55, %c0_56, %c0_57] : memref<4x64x32xf32, #tpu.memory_space<vmem>>, vector<1x64x32xf32>
    %130 = vector.shape_cast %129 : vector<1x64x32xf32> to vector<64x32xf32>
    %cst_58 = arith.constant dense<0.000000e+00> : vector<16x32xf32>
    %131 = tpu.matmul %128, %130, %cst_58 {dimension_numbers = #tpu.dot_dimension_numbers<[1], [0], [0], [1], [0, 0, 1, 1], [], []>} : vector<16x64xf32>, vector<64x32xf32>, vector<16x32xf32> -> vector<16x32xf32>
    %132 = arith.addf %88, %131 : vector<16x32xf32>
    %133 = vector.broadcast %9 : vector<1x32xf32> to vector<16x32xf32>
    %134 = arith.addf %132, %133 : vector<16x32xf32>
    %c1_59 = arith.constant 1 : index
    %c0_60 = arith.constant 0 : index
    %c0_61 = arith.constant 0 : index
    %135 = vector.load %arg2[%c1_59, %c0_60, %c0_61] : memref<4x8x64xf32, #tpu.memory_space<vmem>>, vector<1x8x64xf32>
    %136 = vector.shape_cast %135 : vector<1x8x64xf32> to vector<8x64xf32>
    %137 = vector.extract_strided_slice %136 {offsets = [0, 0], sizes = [1, 32], strides = [1, 1]} : vector<8x64xf32> to vector<1x32xf32>
    %138 = vector.extract_strided_slice %136 {offsets = [1, 0], sizes = [1, 32], strides = [1, 1]} : vector<8x64xf32> to vector<1x32xf32>
    %139 = vector.extract_strided_slice %136 {offsets = [2, 0], sizes = [1, 32], strides = [1, 1]} : vector<8x64xf32> to vector<1x32xf32>
    %140 = vector.extract_strided_slice %136 {offsets = [3, 0], sizes = [1, 32], strides = [1, 1]} : vector<8x64xf32> to vector<1x32xf32>
    %141 = vector.extract_strided_slice %136 {offsets = [4, 0], sizes = [1, 32], strides = [1, 1]} : vector<8x64xf32> to vector<1x32xf32>
    %142 = vector.extract_strided_slice %136 {offsets = [5, 0], sizes = [1, 32], strides = [1, 1]} : vector<8x64xf32> to vector<1x32xf32>
    %143 = vector.extract_strided_slice %136 {offsets = [6, 0], sizes = [1, 64], strides = [1, 1]} : vector<8x64xf32> to vector<1x64xf32>
    %cst_62 = arith.constant dense<0.000000e+00> : vector<16xf32>
    %144 = vector.multi_reduction <add>, %134, %cst_62 [1] : vector<16x32xf32> to vector<16xf32>
    %145 = vector.shape_cast %144 : vector<16xf32> to vector<16x1xf32>
    %cst_63 = arith.constant 3.200000e+01 : f32
    %146 = vector.broadcast %cst_63 : f32 to vector<16x1xf32>
    %147 = arith.divf %145, %146 : vector<16x1xf32>
    %148 = vector.broadcast %147 : vector<16x1xf32> to vector<16x32xf32>
    %149 = arith.subf %134, %148 : vector<16x32xf32>
    %150 = arith.mulf %149, %149 : vector<16x32xf32>
    %cst_64 = arith.constant dense<0.000000e+00> : vector<16xf32>
    %151 = vector.multi_reduction <add>, %150, %cst_64 [1] : vector<16x32xf32> to vector<16xf32>
    %152 = vector.shape_cast %151 : vector<16xf32> to vector<16x1xf32>
    %cst_65 = arith.constant 3.200000e+01 : f32
    %153 = vector.broadcast %cst_65 : f32 to vector<16x1xf32>
    %154 = arith.divf %152, %153 : vector<16x1xf32>
    %155 = vector.broadcast %147 : vector<16x1xf32> to vector<16x32xf32>
    %156 = arith.subf %134, %155 : vector<16x32xf32>
    %cst_66 = arith.constant 9.99999974E-6 : f32
    %157 = vector.broadcast %cst_66 : f32 to vector<16x1xf32>
    %158 = arith.addf %154, %157 : vector<16x1xf32>
    %159 = math.rsqrt %158 : vector<16x1xf32>
    %160 = vector.broadcast %159 : vector<16x1xf32> to vector<16x32xf32>
    %161 = arith.mulf %156, %160 : vector<16x32xf32>
    %162 = vector.broadcast %137 : vector<1x32xf32> to vector<16x32xf32>
    %163 = arith.mulf %161, %162 : vector<16x32xf32>
    %164 = vector.broadcast %138 : vector<1x32xf32> to vector<16x32xf32>
    %165 = arith.addf %163, %164 : vector<16x32xf32>
    %c1_67 = arith.constant 1 : index
    %c0_68 = arith.constant 0 : index
    %c0_69 = arith.constant 0 : index
    %166 = vector.load %arg4[%c1_67, %c0_68, %c0_69] : memref<4x32x32xf32, #tpu.memory_space<vmem>>, vector<1x32x32xf32>
    %167 = vector.shape_cast %166 : vector<1x32x32xf32> to vector<32x32xf32>
    %cst_70 = arith.constant dense<0.000000e+00> : vector<16x32xf32>
    %168 = tpu.matmul %165, %167, %cst_70 {dimension_numbers = #tpu.dot_dimension_numbers<[1], [0], [0], [1], [0, 0, 1, 1], [], []>} : vector<16x32xf32>, vector<32x32xf32>, vector<16x32xf32> -> vector<16x32xf32>
    %169 = vector.shape_cast %168 : vector<16x32xf32> to vector<2x8x32xf32>
    %170 = tpu.transpose %169, [0, 2, 1] : vector<2x8x32xf32> -> vector<2x32x8xf32>
    %c4 = arith.constant 4 : index
    %c0_71 = arith.constant 0 : index
    %c0_72 = arith.constant 0 : index
    %171 = vector.load %arg3[%c4, %c0_71, %c0_72] : memref<16x32x16xf32, #tpu.memory_space<vmem>>, vector<1x32x16xf32>
    %172 = vector.shape_cast %171 : vector<1x32x16xf32> to vector<32x16xf32>
    %cst_73 = arith.constant dense<0.000000e+00> : vector<16x16xf32>
    %173 = tpu.matmul %165, %172, %cst_73 {dimension_numbers = #tpu.dot_dimension_numbers<[1], [0], [0], [1], [0, 0, 1, 1], [], []>} : vector<16x32xf32>, vector<32x16xf32>, vector<16x16xf32> -> vector<16x16xf32>
    %174 = vector.shape_cast %173 : vector<16x16xf32> to vector<2x8x16xf32>
    %c6 = arith.constant 6 : index
    %c0_74 = arith.constant 0 : index
    %c0_75 = arith.constant 0 : index
    %175 = vector.load %arg3[%c6, %c0_74, %c0_75] : memref<16x32x16xf32, #tpu.memory_space<vmem>>, vector<1x32x16xf32>
    %176 = vector.shape_cast %175 : vector<1x32x16xf32> to vector<32x16xf32>
    %cst_76 = arith.constant dense<0.000000e+00> : vector<16x16xf32>
    %177 = tpu.matmul %165, %176, %cst_76 {dimension_numbers = #tpu.dot_dimension_numbers<[1], [0], [0], [1], [0, 0, 1, 1], [], []>} : vector<16x32xf32>, vector<32x16xf32>, vector<16x16xf32> -> vector<16x16xf32>
    %178 = vector.shape_cast %177 : vector<16x16xf32> to vector<2x8x16xf32>
    %179 = vector.extract_strided_slice %170 {offsets = [0, 0, 0], sizes = [2, 16, 8], strides = [1, 1, 1]} : vector<2x32x8xf32> to vector<2x16x8xf32>
    "tpu.trace_start"() <{level = 10 : i32, message = "bid,bdj->bij"}> : () -> ()
    %cst_77 = arith.constant dense<0.000000e+00> : vector<2x8x8xf32>
    %180 = tpu.matmul %174, %179, %cst_77 {dimension_numbers = #tpu.dot_dimension_numbers<[2], [1], [1], [2], [0, 0, 0, 1, 1, 2], [0], [0]>} : vector<2x8x16xf32>, vector<2x16x8xf32>, vector<2x8x8xf32> -> vector<2x8x8xf32>
    "tpu.trace_stop"() : () -> ()
    %cst_78 = arith.constant 2.500000e-01 : f32
    %181 = vector.broadcast %cst_78 : f32 to vector<2x8x8xf32>
    %182 = arith.mulf %180, %181 : vector<2x8x8xf32>
    %c5 = arith.constant 5 : index
    %c0_79 = arith.constant 0 : index
    %c0_80 = arith.constant 0 : index
    %183 = vector.load %arg3[%c5, %c0_79, %c0_80] : memref<16x32x16xf32, #tpu.memory_space<vmem>>, vector<1x32x16xf32>
    %184 = vector.shape_cast %183 : vector<1x32x16xf32> to vector<32x16xf32>
    %cst_81 = arith.constant dense<0.000000e+00> : vector<16x16xf32>
    %185 = tpu.matmul %165, %184, %cst_81 {dimension_numbers = #tpu.dot_dimension_numbers<[1], [0], [0], [1], [0, 0, 1, 1], [], []>} : vector<16x32xf32>, vector<32x16xf32>, vector<16x16xf32> -> vector<16x16xf32>
    %186 = vector.shape_cast %185 : vector<16x16xf32> to vector<2x8x16xf32>
    %c7 = arith.constant 7 : index
    %c0_82 = arith.constant 0 : index
    %c0_83 = arith.constant 0 : index
    %187 = vector.load %arg3[%c7, %c0_82, %c0_83] : memref<16x32x16xf32, #tpu.memory_space<vmem>>, vector<1x32x16xf32>
    %188 = vector.shape_cast %187 : vector<1x32x16xf32> to vector<32x16xf32>
    %cst_84 = arith.constant dense<0.000000e+00> : vector<16x16xf32>
    %189 = tpu.matmul %165, %188, %cst_84 {dimension_numbers = #tpu.dot_dimension_numbers<[1], [0], [0], [1], [0, 0, 1, 1], [], []>} : vector<16x32xf32>, vector<32x16xf32>, vector<16x16xf32> -> vector<16x16xf32>
    %190 = vector.shape_cast %189 : vector<16x16xf32> to vector<2x8x16xf32>
    %191 = vector.extract_strided_slice %170 {offsets = [0, 16, 0], sizes = [2, 16, 8], strides = [1, 1, 1]} : vector<2x32x8xf32> to vector<2x16x8xf32>
    "tpu.trace_start"() <{level = 10 : i32, message = "bid,bdj->bij"}> : () -> ()
    %cst_85 = arith.constant dense<0.000000e+00> : vector<2x8x8xf32>
    %192 = tpu.matmul %186, %191, %cst_85 {dimension_numbers = #tpu.dot_dimension_numbers<[2], [1], [1], [2], [0, 0, 0, 1, 1, 2], [0], [0]>} : vector<2x8x16xf32>, vector<2x16x8xf32>, vector<2x8x8xf32> -> vector<2x8x8xf32>
    "tpu.trace_stop"() : () -> ()
    %cst_86 = arith.constant 2.500000e-01 : f32
    %193 = vector.broadcast %cst_86 : f32 to vector<2x8x8xf32>
    %194 = arith.mulf %192, %193 : vector<2x8x8xf32>
    %195 = tpu.concatenate %182, %194 in 0 : vector<2x8x8xf32>, vector<2x8x8xf32> -> vector<4x8x8xf32>
    %cst_87 = arith.constant dense<0xFF800000> : vector<4x8xf32>
    %196 = vector.multi_reduction <maximumf>, %195, %cst_87 [2] : vector<4x8x8xf32> to vector<4x8xf32>
    %197 = vector.shape_cast %196 : vector<4x8xf32> to vector<4x8x1xf32>
    %198 = vector.broadcast %197 : vector<4x8x1xf32> to vector<4x8x8xf32>
    %199 = arith.subf %195, %198 : vector<4x8x8xf32>
    %200 = math.exp %199 : vector<4x8x8xf32>
    %cst_88 = arith.constant dense<0.000000e+00> : vector<4x8xf32>
    %201 = vector.multi_reduction <add>, %200, %cst_88 [2] : vector<4x8x8xf32> to vector<4x8xf32>
    %202 = vector.shape_cast %201 : vector<4x8xf32> to vector<4x8x1xf32>
    %203 = tpu.reciprocal %202 {approx = true} : vector<4x8x1xf32> -> vector<4x8x1xf32>
    %204 = vector.broadcast %203 : vector<4x8x1xf32> to vector<4x8x8xf32>
    %205 = arith.mulf %200, %204 : vector<4x8x8xf32>
    %206 = vector.broadcast %139 : vector<1x32xf32> to vector<16x32xf32>
    %207 = arith.addf %134, %206 : vector<16x32xf32>
    %208 = vector.extract_strided_slice %205 {offsets = [0, 0, 0], sizes = [2, 8, 8], strides = [1, 1, 1]} : vector<4x8x8xf32> to vector<2x8x8xf32>
    "tpu.trace_start"() <{level = 10 : i32, message = "bij,bjd->bid"}> : () -> ()
    %cst_89 = arith.constant dense<0.000000e+00> : vector<2x8x16xf32>
    %209 = tpu.matmul %208, %178, %cst_89 {dimension_numbers = #tpu.dot_dimension_numbers<[2], [1], [1], [2], [0, 0, 0, 1, 1, 2], [0], [0]>} : vector<2x8x8xf32>, vector<2x8x16xf32>, vector<2x8x16xf32> -> vector<2x8x16xf32>
    "tpu.trace_stop"() : () -> ()
    %210 = vector.shape_cast %209 : vector<2x8x16xf32> to vector<16x16xf32>
    %c2_90 = arith.constant 2 : index
    %c0_91 = arith.constant 0 : index
    %c0_92 = arith.constant 0 : index
    %211 = vector.load %arg5[%c2_90, %c0_91, %c0_92] : memref<8x16x32xf32, #tpu.memory_space<vmem>>, vector<1x16x32xf32>
    %212 = vector.shape_cast %211 : vector<1x16x32xf32> to vector<16x32xf32>
    %cst_93 = arith.constant dense<0.000000e+00> : vector<16x32xf32>
    %213 = tpu.matmul %210, %212, %cst_93 {dimension_numbers = #tpu.dot_dimension_numbers<[1], [0], [0], [1], [0, 0, 1, 1], [], []>} : vector<16x16xf32>, vector<16x32xf32>, vector<16x32xf32> -> vector<16x32xf32>
    %214 = arith.addf %207, %213 : vector<16x32xf32>
    %215 = vector.extract_strided_slice %205 {offsets = [2, 0, 0], sizes = [2, 8, 8], strides = [1, 1, 1]} : vector<4x8x8xf32> to vector<2x8x8xf32>
    "tpu.trace_start"() <{level = 10 : i32, message = "bij,bjd->bid"}> : () -> ()
    %cst_94 = arith.constant dense<0.000000e+00> : vector<2x8x16xf32>
    %216 = tpu.matmul %215, %190, %cst_94 {dimension_numbers = #tpu.dot_dimension_numbers<[2], [1], [1], [2], [0, 0, 0, 1, 1, 2], [0], [0]>} : vector<2x8x8xf32>, vector<2x8x16xf32>, vector<2x8x16xf32> -> vector<2x8x16xf32>
    "tpu.trace_stop"() : () -> ()
    %217 = vector.shape_cast %216 : vector<2x8x16xf32> to vector<16x16xf32>
    %c3_95 = arith.constant 3 : index
    %c0_96 = arith.constant 0 : index
    %c0_97 = arith.constant 0 : index
    %218 = vector.load %arg5[%c3_95, %c0_96, %c0_97] : memref<8x16x32xf32, #tpu.memory_space<vmem>>, vector<1x16x32xf32>
    %219 = vector.shape_cast %218 : vector<1x16x32xf32> to vector<16x32xf32>
    %cst_98 = arith.constant dense<0.000000e+00> : vector<16x32xf32>
    %220 = tpu.matmul %217, %219, %cst_98 {dimension_numbers = #tpu.dot_dimension_numbers<[1], [0], [0], [1], [0, 0, 1, 1], [], []>} : vector<16x16xf32>, vector<16x32xf32>, vector<16x32xf32> -> vector<16x32xf32>
    %221 = arith.addf %214, %220 : vector<16x32xf32>
    %cst_99 = arith.constant dense<0.000000e+00> : vector<16xf32>
    %222 = vector.multi_reduction <add>, %221, %cst_99 [1] : vector<16x32xf32> to vector<16xf32>
    %223 = vector.shape_cast %222 : vector<16xf32> to vector<16x1xf32>
    %cst_100 = arith.constant 3.200000e+01 : f32
    %224 = vector.broadcast %cst_100 : f32 to vector<16x1xf32>
    %225 = arith.divf %223, %224 : vector<16x1xf32>
    %226 = vector.broadcast %225 : vector<16x1xf32> to vector<16x32xf32>
    %227 = arith.subf %221, %226 : vector<16x32xf32>
    %228 = arith.mulf %227, %227 : vector<16x32xf32>
    %cst_101 = arith.constant dense<0.000000e+00> : vector<16xf32>
    %229 = vector.multi_reduction <add>, %228, %cst_101 [1] : vector<16x32xf32> to vector<16xf32>
    %230 = vector.shape_cast %229 : vector<16xf32> to vector<16x1xf32>
    %cst_102 = arith.constant 3.200000e+01 : f32
    %231 = vector.broadcast %cst_102 : f32 to vector<16x1xf32>
    %232 = arith.divf %230, %231 : vector<16x1xf32>
    %233 = vector.broadcast %225 : vector<16x1xf32> to vector<16x32xf32>
    %234 = arith.subf %221, %233 : vector<16x32xf32>
    %cst_103 = arith.constant 9.99999974E-6 : f32
    %235 = vector.broadcast %cst_103 : f32 to vector<16x1xf32>
    %236 = arith.addf %232, %235 : vector<16x1xf32>
    %237 = math.rsqrt %236 : vector<16x1xf32>
    %238 = vector.broadcast %237 : vector<16x1xf32> to vector<16x32xf32>
    %239 = arith.mulf %234, %238 : vector<16x32xf32>
    %240 = vector.broadcast %140 : vector<1x32xf32> to vector<16x32xf32>
    %241 = arith.mulf %239, %240 : vector<16x32xf32>
    %242 = vector.broadcast %141 : vector<1x32xf32> to vector<16x32xf32>
    %243 = arith.addf %241, %242 : vector<16x32xf32>
    %c1_104 = arith.constant 1 : index
    %c0_105 = arith.constant 0 : index
    %c0_106 = arith.constant 0 : index
    %244 = vector.load %arg6[%c1_104, %c0_105, %c0_106] : memref<4x32x64xf32, #tpu.memory_space<vmem>>, vector<1x32x64xf32>
    %245 = vector.shape_cast %244 : vector<1x32x64xf32> to vector<32x64xf32>
    %cst_107 = arith.constant dense<0.000000e+00> : vector<16x64xf32>
    %246 = tpu.matmul %243, %245, %cst_107 {dimension_numbers = #tpu.dot_dimension_numbers<[1], [0], [0], [1], [0, 0, 1, 1], [], []>} : vector<16x32xf32>, vector<32x64xf32>, vector<16x64xf32> -> vector<16x64xf32>
    %247 = vector.broadcast %143 : vector<1x64xf32> to vector<16x64xf32>
    %248 = arith.addf %246, %247 : vector<16x64xf32>
    %249 = arith.mulf %248, %248 : vector<16x64xf32>
    %250 = arith.mulf %248, %249 : vector<16x64xf32>
    %cst_108 = arith.constant 4.471500e-02 : f32
    %251 = vector.broadcast %cst_108 : f32 to vector<16x64xf32>
    %252 = arith.mulf %251, %250 : vector<16x64xf32>
    %253 = arith.addf %248, %252 : vector<16x64xf32>
    %cst_109 = arith.constant 0.797884583 : f32
    %254 = vector.broadcast %cst_109 : f32 to vector<16x64xf32>
    %255 = arith.mulf %254, %253 : vector<16x64xf32>
    %256 = math.tanh %255 : vector<16x64xf32>
    %cst_110 = arith.constant 1.000000e+00 : f32
    %257 = vector.broadcast %cst_110 : f32 to vector<16x64xf32>
    %258 = arith.addf %257, %256 : vector<16x64xf32>
    %cst_111 = arith.constant 5.000000e-01 : f32
    %259 = vector.broadcast %cst_111 : f32 to vector<16x64xf32>
    %260 = arith.mulf %259, %258 : vector<16x64xf32>
    %261 = arith.mulf %248, %260 : vector<16x64xf32>
    %c1_112 = arith.constant 1 : index
    %c0_113 = arith.constant 0 : index
    %c0_114 = arith.constant 0 : index
    %262 = vector.load %arg7[%c1_112, %c0_113, %c0_114] : memref<4x64x32xf32, #tpu.memory_space<vmem>>, vector<1x64x32xf32>
    %263 = vector.shape_cast %262 : vector<1x64x32xf32> to vector<64x32xf32>
    %cst_115 = arith.constant dense<0.000000e+00> : vector<16x32xf32>
    %264 = tpu.matmul %261, %263, %cst_115 {dimension_numbers = #tpu.dot_dimension_numbers<[1], [0], [0], [1], [0, 0, 1, 1], [], []>} : vector<16x64xf32>, vector<64x32xf32>, vector<16x32xf32> -> vector<16x32xf32>
    %265 = arith.addf %221, %264 : vector<16x32xf32>
    %266 = vector.broadcast %142 : vector<1x32xf32> to vector<16x32xf32>
    %267 = arith.addf %265, %266 : vector<16x32xf32>
    %c2_116 = arith.constant 2 : index
    %c0_117 = arith.constant 0 : index
    %c0_118 = arith.constant 0 : index
    %268 = vector.load %arg2[%c2_116, %c0_117, %c0_118] : memref<4x8x64xf32, #tpu.memory_space<vmem>>, vector<1x8x64xf32>
    %269 = vector.shape_cast %268 : vector<1x8x64xf32> to vector<8x64xf32>
    %270 = vector.extract_strided_slice %269 {offsets = [0, 0], sizes = [1, 32], strides = [1, 1]} : vector<8x64xf32> to vector<1x32xf32>
    %271 = vector.extract_strided_slice %269 {offsets = [1, 0], sizes = [1, 32], strides = [1, 1]} : vector<8x64xf32> to vector<1x32xf32>
    %272 = vector.extract_strided_slice %269 {offsets = [2, 0], sizes = [1, 32], strides = [1, 1]} : vector<8x64xf32> to vector<1x32xf32>
    %273 = vector.extract_strided_slice %269 {offsets = [3, 0], sizes = [1, 32], strides = [1, 1]} : vector<8x64xf32> to vector<1x32xf32>
    %274 = vector.extract_strided_slice %269 {offsets = [4, 0], sizes = [1, 32], strides = [1, 1]} : vector<8x64xf32> to vector<1x32xf32>
    %275 = vector.extract_strided_slice %269 {offsets = [5, 0], sizes = [1, 32], strides = [1, 1]} : vector<8x64xf32> to vector<1x32xf32>
    %276 = vector.extract_strided_slice %269 {offsets = [6, 0], sizes = [1, 64], strides = [1, 1]} : vector<8x64xf32> to vector<1x64xf32>
    %c0_119 = arith.constant 0 : index
    %c0_120 = arith.constant 0 : index
    %c0_121 = arith.constant 0 : index
    %277 = vector.load %arg8[%c0_119, %c0_120, %c0_121] : memref<4x16x16xf32, #tpu.memory_space<vmem>>, vector<1x16x16xf32>
    %278 = vector.shape_cast %277 : vector<1x16x16xf32> to vector<16x16xf32>
    %c1_122 = arith.constant 1 : index
    %c0_123 = arith.constant 0 : index
    %c0_124 = arith.constant 0 : index
    %279 = vector.load %arg8[%c1_122, %c0_123, %c0_124] : memref<4x16x16xf32, #tpu.memory_space<vmem>>, vector<1x16x16xf32>
    %280 = vector.shape_cast %279 : vector<1x16x16xf32> to vector<16x16xf32>
    %cst_125 = arith.constant dense<0.000000e+00> : vector<16x32xf32>
    %281 = tpu.matmul %278, %267, %cst_125 {dimension_numbers = #tpu.dot_dimension_numbers<[1], [0], [0], [1], [0, 0, 1, 1], [], []>} : vector<16x16xf32>, vector<16x32xf32>, vector<16x32xf32> -> vector<16x32xf32>
    %cst_126 = arith.constant dense<0.000000e+00> : vector<16x32xf32>
    %282 = tpu.matmul %280, %1, %cst_126 {dimension_numbers = #tpu.dot_dimension_numbers<[1], [0], [0], [1], [0, 0, 1, 1], [], []>} : vector<16x16xf32>, vector<16x32xf32>, vector<16x32xf32> -> vector<16x32xf32>
    %283 = arith.addf %281, %282 : vector<16x32xf32>
    %c0_127 = arith.constant 0 : index
    %c0_128 = arith.constant 0 : index
    %c0_129 = arith.constant 0 : index
    %284 = vector.load %arg9[%c0_127, %c0_128, %c0_129] : memref<2x16x1xf32, #tpu.memory_space<vmem>>, vector<1x16x1xf32>
    %285 = vector.shape_cast %284 : vector<1x16x1xf32> to vector<16x1xf32>
    %286 = vector.broadcast %285 : vector<16x1xf32> to vector<16x32xf32>
    %287 = arith.addf %283, %286 : vector<16x32xf32>
    %cst_130 = arith.constant dense<0.000000e+00> : vector<16xf32>
    %288 = vector.multi_reduction <add>, %287, %cst_130 [1] : vector<16x32xf32> to vector<16xf32>
    %289 = vector.shape_cast %288 : vector<16xf32> to vector<16x1xf32>
    %cst_131 = arith.constant 3.200000e+01 : f32
    %290 = vector.broadcast %cst_131 : f32 to vector<16x1xf32>
    %291 = arith.divf %289, %290 : vector<16x1xf32>
    %292 = vector.broadcast %291 : vector<16x1xf32> to vector<16x32xf32>
    %293 = arith.subf %287, %292 : vector<16x32xf32>
    %294 = arith.mulf %293, %293 : vector<16x32xf32>
    %cst_132 = arith.constant dense<0.000000e+00> : vector<16xf32>
    %295 = vector.multi_reduction <add>, %294, %cst_132 [1] : vector<16x32xf32> to vector<16xf32>
    %296 = vector.shape_cast %295 : vector<16xf32> to vector<16x1xf32>
    %cst_133 = arith.constant 3.200000e+01 : f32
    %297 = vector.broadcast %cst_133 : f32 to vector<16x1xf32>
    %298 = arith.divf %296, %297 : vector<16x1xf32>
    %299 = vector.broadcast %291 : vector<16x1xf32> to vector<16x32xf32>
    %300 = arith.subf %287, %299 : vector<16x32xf32>
    %cst_134 = arith.constant 9.99999974E-6 : f32
    %301 = vector.broadcast %cst_134 : f32 to vector<16x1xf32>
    %302 = arith.addf %298, %301 : vector<16x1xf32>
    %303 = math.rsqrt %302 : vector<16x1xf32>
    %304 = vector.broadcast %303 : vector<16x1xf32> to vector<16x32xf32>
    %305 = arith.mulf %300, %304 : vector<16x32xf32>
    %306 = vector.broadcast %270 : vector<1x32xf32> to vector<16x32xf32>
    %307 = arith.mulf %305, %306 : vector<16x32xf32>
    %308 = vector.broadcast %271 : vector<1x32xf32> to vector<16x32xf32>
    %309 = arith.addf %307, %308 : vector<16x32xf32>
    %c2_135 = arith.constant 2 : index
    %c0_136 = arith.constant 0 : index
    %c0_137 = arith.constant 0 : index
    %310 = vector.load %arg4[%c2_135, %c0_136, %c0_137] : memref<4x32x32xf32, #tpu.memory_space<vmem>>, vector<1x32x32xf32>
    %311 = vector.shape_cast %310 : vector<1x32x32xf32> to vector<32x32xf32>
    %cst_138 = arith.constant dense<0.000000e+00> : vector<16x32xf32>
    %312 = tpu.matmul %309, %311, %cst_138 {dimension_numbers = #tpu.dot_dimension_numbers<[1], [0], [0], [1], [0, 0, 1, 1], [], []>} : vector<16x32xf32>, vector<32x32xf32>, vector<16x32xf32> -> vector<16x32xf32>
    %313 = vector.shape_cast %312 : vector<16x32xf32> to vector<2x8x32xf32>
    %314 = tpu.transpose %313, [0, 2, 1] : vector<2x8x32xf32> -> vector<2x32x8xf32>
    %c8 = arith.constant 8 : index
    %c0_139 = arith.constant 0 : index
    %c0_140 = arith.constant 0 : index
    %315 = vector.load %arg3[%c8, %c0_139, %c0_140] : memref<16x32x16xf32, #tpu.memory_space<vmem>>, vector<1x32x16xf32>
    %316 = vector.shape_cast %315 : vector<1x32x16xf32> to vector<32x16xf32>
    %cst_141 = arith.constant dense<0.000000e+00> : vector<16x16xf32>
    %317 = tpu.matmul %309, %316, %cst_141 {dimension_numbers = #tpu.dot_dimension_numbers<[1], [0], [0], [1], [0, 0, 1, 1], [], []>} : vector<16x32xf32>, vector<32x16xf32>, vector<16x16xf32> -> vector<16x16xf32>
    %318 = vector.shape_cast %317 : vector<16x16xf32> to vector<2x8x16xf32>
    %c10 = arith.constant 10 : index
    %c0_142 = arith.constant 0 : index
    %c0_143 = arith.constant 0 : index
    %319 = vector.load %arg3[%c10, %c0_142, %c0_143] : memref<16x32x16xf32, #tpu.memory_space<vmem>>, vector<1x32x16xf32>
    %320 = vector.shape_cast %319 : vector<1x32x16xf32> to vector<32x16xf32>
    %cst_144 = arith.constant dense<0.000000e+00> : vector<16x16xf32>
    %321 = tpu.matmul %309, %320, %cst_144 {dimension_numbers = #tpu.dot_dimension_numbers<[1], [0], [0], [1], [0, 0, 1, 1], [], []>} : vector<16x32xf32>, vector<32x16xf32>, vector<16x16xf32> -> vector<16x16xf32>
    %322 = vector.shape_cast %321 : vector<16x16xf32> to vector<2x8x16xf32>
    %323 = vector.extract_strided_slice %314 {offsets = [0, 0, 0], sizes = [2, 16, 8], strides = [1, 1, 1]} : vector<2x32x8xf32> to vector<2x16x8xf32>
    "tpu.trace_start"() <{level = 10 : i32, message = "bid,bdj->bij"}> : () -> ()
    %cst_145 = arith.constant dense<0.000000e+00> : vector<2x8x8xf32>
    %324 = tpu.matmul %318, %323, %cst_145 {dimension_numbers = #tpu.dot_dimension_numbers<[2], [1], [1], [2], [0, 0, 0, 1, 1, 2], [0], [0]>} : vector<2x8x16xf32>, vector<2x16x8xf32>, vector<2x8x8xf32> -> vector<2x8x8xf32>
    "tpu.trace_stop"() : () -> ()
    %cst_146 = arith.constant 2.500000e-01 : f32
    %325 = vector.broadcast %cst_146 : f32 to vector<2x8x8xf32>
    %326 = arith.mulf %324, %325 : vector<2x8x8xf32>
    %c9 = arith.constant 9 : index
    %c0_147 = arith.constant 0 : index
    %c0_148 = arith.constant 0 : index
    %327 = vector.load %arg3[%c9, %c0_147, %c0_148] : memref<16x32x16xf32, #tpu.memory_space<vmem>>, vector<1x32x16xf32>
    %328 = vector.shape_cast %327 : vector<1x32x16xf32> to vector<32x16xf32>
    %cst_149 = arith.constant dense<0.000000e+00> : vector<16x16xf32>
    %329 = tpu.matmul %309, %328, %cst_149 {dimension_numbers = #tpu.dot_dimension_numbers<[1], [0], [0], [1], [0, 0, 1, 1], [], []>} : vector<16x32xf32>, vector<32x16xf32>, vector<16x16xf32> -> vector<16x16xf32>
    %330 = vector.shape_cast %329 : vector<16x16xf32> to vector<2x8x16xf32>
    %c11 = arith.constant 11 : index
    %c0_150 = arith.constant 0 : index
    %c0_151 = arith.constant 0 : index
    %331 = vector.load %arg3[%c11, %c0_150, %c0_151] : memref<16x32x16xf32, #tpu.memory_space<vmem>>, vector<1x32x16xf32>
    %332 = vector.shape_cast %331 : vector<1x32x16xf32> to vector<32x16xf32>
    %cst_152 = arith.constant dense<0.000000e+00> : vector<16x16xf32>
    %333 = tpu.matmul %309, %332, %cst_152 {dimension_numbers = #tpu.dot_dimension_numbers<[1], [0], [0], [1], [0, 0, 1, 1], [], []>} : vector<16x32xf32>, vector<32x16xf32>, vector<16x16xf32> -> vector<16x16xf32>
    %334 = vector.shape_cast %333 : vector<16x16xf32> to vector<2x8x16xf32>
    %335 = vector.extract_strided_slice %314 {offsets = [0, 16, 0], sizes = [2, 16, 8], strides = [1, 1, 1]} : vector<2x32x8xf32> to vector<2x16x8xf32>
    "tpu.trace_start"() <{level = 10 : i32, message = "bid,bdj->bij"}> : () -> ()
    %cst_153 = arith.constant dense<0.000000e+00> : vector<2x8x8xf32>
    %336 = tpu.matmul %330, %335, %cst_153 {dimension_numbers = #tpu.dot_dimension_numbers<[2], [1], [1], [2], [0, 0, 0, 1, 1, 2], [0], [0]>} : vector<2x8x16xf32>, vector<2x16x8xf32>, vector<2x8x8xf32> -> vector<2x8x8xf32>
    "tpu.trace_stop"() : () -> ()
    %cst_154 = arith.constant 2.500000e-01 : f32
    %337 = vector.broadcast %cst_154 : f32 to vector<2x8x8xf32>
    %338 = arith.mulf %336, %337 : vector<2x8x8xf32>
    %339 = tpu.concatenate %326, %338 in 0 : vector<2x8x8xf32>, vector<2x8x8xf32> -> vector<4x8x8xf32>
    %cst_155 = arith.constant dense<0xFF800000> : vector<4x8xf32>
    %340 = vector.multi_reduction <maximumf>, %339, %cst_155 [2] : vector<4x8x8xf32> to vector<4x8xf32>
    %341 = vector.shape_cast %340 : vector<4x8xf32> to vector<4x8x1xf32>
    %342 = vector.broadcast %341 : vector<4x8x1xf32> to vector<4x8x8xf32>
    %343 = arith.subf %339, %342 : vector<4x8x8xf32>
    %344 = math.exp %343 : vector<4x8x8xf32>
    %cst_156 = arith.constant dense<0.000000e+00> : vector<4x8xf32>
    %345 = vector.multi_reduction <add>, %344, %cst_156 [2] : vector<4x8x8xf32> to vector<4x8xf32>
    %346 = vector.shape_cast %345 : vector<4x8xf32> to vector<4x8x1xf32>
    %347 = tpu.reciprocal %346 {approx = true} : vector<4x8x1xf32> -> vector<4x8x1xf32>
    %348 = vector.broadcast %347 : vector<4x8x1xf32> to vector<4x8x8xf32>
    %349 = arith.mulf %344, %348 : vector<4x8x8xf32>
    %350 = vector.broadcast %272 : vector<1x32xf32> to vector<16x32xf32>
    %351 = arith.addf %287, %350 : vector<16x32xf32>
    %352 = vector.extract_strided_slice %349 {offsets = [0, 0, 0], sizes = [2, 8, 8], strides = [1, 1, 1]} : vector<4x8x8xf32> to vector<2x8x8xf32>
    "tpu.trace_start"() <{level = 10 : i32, message = "bij,bjd->bid"}> : () -> ()
    %cst_157 = arith.constant dense<0.000000e+00> : vector<2x8x16xf32>
    %353 = tpu.matmul %352, %322, %cst_157 {dimension_numbers = #tpu.dot_dimension_numbers<[2], [1], [1], [2], [0, 0, 0, 1, 1, 2], [0], [0]>} : vector<2x8x8xf32>, vector<2x8x16xf32>, vector<2x8x16xf32> -> vector<2x8x16xf32>
    "tpu.trace_stop"() : () -> ()
    %354 = vector.shape_cast %353 : vector<2x8x16xf32> to vector<16x16xf32>
    %c4_158 = arith.constant 4 : index
    %c0_159 = arith.constant 0 : index
    %c0_160 = arith.constant 0 : index
    %355 = vector.load %arg5[%c4_158, %c0_159, %c0_160] : memref<8x16x32xf32, #tpu.memory_space<vmem>>, vector<1x16x32xf32>
    %356 = vector.shape_cast %355 : vector<1x16x32xf32> to vector<16x32xf32>
    %cst_161 = arith.constant dense<0.000000e+00> : vector<16x32xf32>
    %357 = tpu.matmul %354, %356, %cst_161 {dimension_numbers = #tpu.dot_dimension_numbers<[1], [0], [0], [1], [0, 0, 1, 1], [], []>} : vector<16x16xf32>, vector<16x32xf32>, vector<16x32xf32> -> vector<16x32xf32>
    %358 = arith.addf %351, %357 : vector<16x32xf32>
    %359 = vector.extract_strided_slice %349 {offsets = [2, 0, 0], sizes = [2, 8, 8], strides = [1, 1, 1]} : vector<4x8x8xf32> to vector<2x8x8xf32>
    "tpu.trace_start"() <{level = 10 : i32, message = "bij,bjd->bid"}> : () -> ()
    %cst_162 = arith.constant dense<0.000000e+00> : vector<2x8x16xf32>
    %360 = tpu.matmul %359, %334, %cst_162 {dimension_numbers = #tpu.dot_dimension_numbers<[2], [1], [1], [2], [0, 0, 0, 1, 1, 2], [0], [0]>} : vector<2x8x8xf32>, vector<2x8x16xf32>, vector<2x8x16xf32> -> vector<2x8x16xf32>
    "tpu.trace_stop"() : () -> ()
    %361 = vector.shape_cast %360 : vector<2x8x16xf32> to vector<16x16xf32>
    %c5_163 = arith.constant 5 : index
    %c0_164 = arith.constant 0 : index
    %c0_165 = arith.constant 0 : index
    %362 = vector.load %arg5[%c5_163, %c0_164, %c0_165] : memref<8x16x32xf32, #tpu.memory_space<vmem>>, vector<1x16x32xf32>
    %363 = vector.shape_cast %362 : vector<1x16x32xf32> to vector<16x32xf32>
    %cst_166 = arith.constant dense<0.000000e+00> : vector<16x32xf32>
    %364 = tpu.matmul %361, %363, %cst_166 {dimension_numbers = #tpu.dot_dimension_numbers<[1], [0], [0], [1], [0, 0, 1, 1], [], []>} : vector<16x16xf32>, vector<16x32xf32>, vector<16x32xf32> -> vector<16x32xf32>
    %365 = arith.addf %358, %364 : vector<16x32xf32>
    %cst_167 = arith.constant dense<0.000000e+00> : vector<16xf32>
    %366 = vector.multi_reduction <add>, %365, %cst_167 [1] : vector<16x32xf32> to vector<16xf32>
    %367 = vector.shape_cast %366 : vector<16xf32> to vector<16x1xf32>
    %cst_168 = arith.constant 3.200000e+01 : f32
    %368 = vector.broadcast %cst_168 : f32 to vector<16x1xf32>
    %369 = arith.divf %367, %368 : vector<16x1xf32>
    %370 = vector.broadcast %369 : vector<16x1xf32> to vector<16x32xf32>
    %371 = arith.subf %365, %370 : vector<16x32xf32>
    %372 = arith.mulf %371, %371 : vector<16x32xf32>
    %cst_169 = arith.constant dense<0.000000e+00> : vector<16xf32>
    %373 = vector.multi_reduction <add>, %372, %cst_169 [1] : vector<16x32xf32> to vector<16xf32>
    %374 = vector.shape_cast %373 : vector<16xf32> to vector<16x1xf32>
    %cst_170 = arith.constant 3.200000e+01 : f32
    %375 = vector.broadcast %cst_170 : f32 to vector<16x1xf32>
    %376 = arith.divf %374, %375 : vector<16x1xf32>
    %377 = vector.broadcast %369 : vector<16x1xf32> to vector<16x32xf32>
    %378 = arith.subf %365, %377 : vector<16x32xf32>
    %cst_171 = arith.constant 9.99999974E-6 : f32
    %379 = vector.broadcast %cst_171 : f32 to vector<16x1xf32>
    %380 = arith.addf %376, %379 : vector<16x1xf32>
    %381 = math.rsqrt %380 : vector<16x1xf32>
    %382 = vector.broadcast %381 : vector<16x1xf32> to vector<16x32xf32>
    %383 = arith.mulf %378, %382 : vector<16x32xf32>
    %384 = vector.broadcast %273 : vector<1x32xf32> to vector<16x32xf32>
    %385 = arith.mulf %383, %384 : vector<16x32xf32>
    %386 = vector.broadcast %274 : vector<1x32xf32> to vector<16x32xf32>
    %387 = arith.addf %385, %386 : vector<16x32xf32>
    %c2_172 = arith.constant 2 : index
    %c0_173 = arith.constant 0 : index
    %c0_174 = arith.constant 0 : index
    %388 = vector.load %arg6[%c2_172, %c0_173, %c0_174] : memref<4x32x64xf32, #tpu.memory_space<vmem>>, vector<1x32x64xf32>
    %389 = vector.shape_cast %388 : vector<1x32x64xf32> to vector<32x64xf32>
    %cst_175 = arith.constant dense<0.000000e+00> : vector<16x64xf32>
    %390 = tpu.matmul %387, %389, %cst_175 {dimension_numbers = #tpu.dot_dimension_numbers<[1], [0], [0], [1], [0, 0, 1, 1], [], []>} : vector<16x32xf32>, vector<32x64xf32>, vector<16x64xf32> -> vector<16x64xf32>
    %391 = vector.broadcast %276 : vector<1x64xf32> to vector<16x64xf32>
    %392 = arith.addf %390, %391 : vector<16x64xf32>
    %393 = arith.mulf %392, %392 : vector<16x64xf32>
    %394 = arith.mulf %392, %393 : vector<16x64xf32>
    %cst_176 = arith.constant 4.471500e-02 : f32
    %395 = vector.broadcast %cst_176 : f32 to vector<16x64xf32>
    %396 = arith.mulf %395, %394 : vector<16x64xf32>
    %397 = arith.addf %392, %396 : vector<16x64xf32>
    %cst_177 = arith.constant 0.797884583 : f32
    %398 = vector.broadcast %cst_177 : f32 to vector<16x64xf32>
    %399 = arith.mulf %398, %397 : vector<16x64xf32>
    %400 = math.tanh %399 : vector<16x64xf32>
    %cst_178 = arith.constant 1.000000e+00 : f32
    %401 = vector.broadcast %cst_178 : f32 to vector<16x64xf32>
    %402 = arith.addf %401, %400 : vector<16x64xf32>
    %cst_179 = arith.constant 5.000000e-01 : f32
    %403 = vector.broadcast %cst_179 : f32 to vector<16x64xf32>
    %404 = arith.mulf %403, %402 : vector<16x64xf32>
    %405 = arith.mulf %392, %404 : vector<16x64xf32>
    %c2_180 = arith.constant 2 : index
    %c0_181 = arith.constant 0 : index
    %c0_182 = arith.constant 0 : index
    %406 = vector.load %arg7[%c2_180, %c0_181, %c0_182] : memref<4x64x32xf32, #tpu.memory_space<vmem>>, vector<1x64x32xf32>
    %407 = vector.shape_cast %406 : vector<1x64x32xf32> to vector<64x32xf32>
    %cst_183 = arith.constant dense<0.000000e+00> : vector<16x32xf32>
    %408 = tpu.matmul %405, %407, %cst_183 {dimension_numbers = #tpu.dot_dimension_numbers<[1], [0], [0], [1], [0, 0, 1, 1], [], []>} : vector<16x64xf32>, vector<64x32xf32>, vector<16x32xf32> -> vector<16x32xf32>
    %409 = arith.addf %365, %408 : vector<16x32xf32>
    %410 = vector.broadcast %275 : vector<1x32xf32> to vector<16x32xf32>
    %411 = arith.addf %409, %410 : vector<16x32xf32>
    %c3_184 = arith.constant 3 : index
    %c0_185 = arith.constant 0 : index
    %c0_186 = arith.constant 0 : index
    %412 = vector.load %arg2[%c3_184, %c0_185, %c0_186] : memref<4x8x64xf32, #tpu.memory_space<vmem>>, vector<1x8x64xf32>
    %413 = vector.shape_cast %412 : vector<1x8x64xf32> to vector<8x64xf32>
    %414 = vector.extract_strided_slice %413 {offsets = [0, 0], sizes = [1, 32], strides = [1, 1]} : vector<8x64xf32> to vector<1x32xf32>
    %415 = vector.extract_strided_slice %413 {offsets = [1, 0], sizes = [1, 32], strides = [1, 1]} : vector<8x64xf32> to vector<1x32xf32>
    %416 = vector.extract_strided_slice %413 {offsets = [2, 0], sizes = [1, 32], strides = [1, 1]} : vector<8x64xf32> to vector<1x32xf32>
    %417 = vector.extract_strided_slice %413 {offsets = [3, 0], sizes = [1, 32], strides = [1, 1]} : vector<8x64xf32> to vector<1x32xf32>
    %418 = vector.extract_strided_slice %413 {offsets = [4, 0], sizes = [1, 32], strides = [1, 1]} : vector<8x64xf32> to vector<1x32xf32>
    %419 = vector.extract_strided_slice %413 {offsets = [5, 0], sizes = [1, 32], strides = [1, 1]} : vector<8x64xf32> to vector<1x32xf32>
    %420 = vector.extract_strided_slice %413 {offsets = [6, 0], sizes = [1, 64], strides = [1, 1]} : vector<8x64xf32> to vector<1x64xf32>
    %c2_187 = arith.constant 2 : index
    %c0_188 = arith.constant 0 : index
    %c0_189 = arith.constant 0 : index
    %421 = vector.load %arg8[%c2_187, %c0_188, %c0_189] : memref<4x16x16xf32, #tpu.memory_space<vmem>>, vector<1x16x16xf32>
    %422 = vector.shape_cast %421 : vector<1x16x16xf32> to vector<16x16xf32>
    %c3_190 = arith.constant 3 : index
    %c0_191 = arith.constant 0 : index
    %c0_192 = arith.constant 0 : index
    %423 = vector.load %arg8[%c3_190, %c0_191, %c0_192] : memref<4x16x16xf32, #tpu.memory_space<vmem>>, vector<1x16x16xf32>
    %424 = vector.shape_cast %423 : vector<1x16x16xf32> to vector<16x16xf32>
    %cst_193 = arith.constant dense<0.000000e+00> : vector<16x32xf32>
    %425 = tpu.matmul %422, %411, %cst_193 {dimension_numbers = #tpu.dot_dimension_numbers<[1], [0], [0], [1], [0, 0, 1, 1], [], []>} : vector<16x16xf32>, vector<16x32xf32>, vector<16x32xf32> -> vector<16x32xf32>
    %cst_194 = arith.constant dense<0.000000e+00> : vector<16x32xf32>
    %426 = tpu.matmul %424, %134, %cst_194 {dimension_numbers = #tpu.dot_dimension_numbers<[1], [0], [0], [1], [0, 0, 1, 1], [], []>} : vector<16x16xf32>, vector<16x32xf32>, vector<16x32xf32> -> vector<16x32xf32>
    %427 = arith.addf %425, %426 : vector<16x32xf32>
    %c1_195 = arith.constant 1 : index
    %c0_196 = arith.constant 0 : index
    %c0_197 = arith.constant 0 : index
    %428 = vector.load %arg9[%c1_195, %c0_196, %c0_197] : memref<2x16x1xf32, #tpu.memory_space<vmem>>, vector<1x16x1xf32>
    %429 = vector.shape_cast %428 : vector<1x16x1xf32> to vector<16x1xf32>
    %430 = vector.broadcast %429 : vector<16x1xf32> to vector<16x32xf32>
    %431 = arith.addf %427, %430 : vector<16x32xf32>
    %cst_198 = arith.constant dense<0.000000e+00> : vector<16xf32>
    %432 = vector.multi_reduction <add>, %431, %cst_198 [1] : vector<16x32xf32> to vector<16xf32>
    %433 = vector.shape_cast %432 : vector<16xf32> to vector<16x1xf32>
    %cst_199 = arith.constant 3.200000e+01 : f32
    %434 = vector.broadcast %cst_199 : f32 to vector<16x1xf32>
    %435 = arith.divf %433, %434 : vector<16x1xf32>
    %436 = vector.broadcast %435 : vector<16x1xf32> to vector<16x32xf32>
    %437 = arith.subf %431, %436 : vector<16x32xf32>
    %438 = arith.mulf %437, %437 : vector<16x32xf32>
    %cst_200 = arith.constant dense<0.000000e+00> : vector<16xf32>
    %439 = vector.multi_reduction <add>, %438, %cst_200 [1] : vector<16x32xf32> to vector<16xf32>
    %440 = vector.shape_cast %439 : vector<16xf32> to vector<16x1xf32>
    %cst_201 = arith.constant 3.200000e+01 : f32
    %441 = vector.broadcast %cst_201 : f32 to vector<16x1xf32>
    %442 = arith.divf %440, %441 : vector<16x1xf32>
    %443 = vector.broadcast %435 : vector<16x1xf32> to vector<16x32xf32>
    %444 = arith.subf %431, %443 : vector<16x32xf32>
    %cst_202 = arith.constant 9.99999974E-6 : f32
    %445 = vector.broadcast %cst_202 : f32 to vector<16x1xf32>
    %446 = arith.addf %442, %445 : vector<16x1xf32>
    %447 = math.rsqrt %446 : vector<16x1xf32>
    %448 = vector.broadcast %447 : vector<16x1xf32> to vector<16x32xf32>
    %449 = arith.mulf %444, %448 : vector<16x32xf32>
    %450 = vector.broadcast %414 : vector<1x32xf32> to vector<16x32xf32>
    %451 = arith.mulf %449, %450 : vector<16x32xf32>
    %452 = vector.broadcast %415 : vector<1x32xf32> to vector<16x32xf32>
    %453 = arith.addf %451, %452 : vector<16x32xf32>
    %c3_203 = arith.constant 3 : index
    %c0_204 = arith.constant 0 : index
    %c0_205 = arith.constant 0 : index
    %454 = vector.load %arg4[%c3_203, %c0_204, %c0_205] : memref<4x32x32xf32, #tpu.memory_space<vmem>>, vector<1x32x32xf32>
    %455 = vector.shape_cast %454 : vector<1x32x32xf32> to vector<32x32xf32>
    %cst_206 = arith.constant dense<0.000000e+00> : vector<16x32xf32>
    %456 = tpu.matmul %453, %455, %cst_206 {dimension_numbers = #tpu.dot_dimension_numbers<[1], [0], [0], [1], [0, 0, 1, 1], [], []>} : vector<16x32xf32>, vector<32x32xf32>, vector<16x32xf32> -> vector<16x32xf32>
    %457 = vector.shape_cast %456 : vector<16x32xf32> to vector<2x8x32xf32>
    %458 = tpu.transpose %457, [0, 2, 1] : vector<2x8x32xf32> -> vector<2x32x8xf32>
    %c12 = arith.constant 12 : index
    %c0_207 = arith.constant 0 : index
    %c0_208 = arith.constant 0 : index
    %459 = vector.load %arg3[%c12, %c0_207, %c0_208] : memref<16x32x16xf32, #tpu.memory_space<vmem>>, vector<1x32x16xf32>
    %460 = vector.shape_cast %459 : vector<1x32x16xf32> to vector<32x16xf32>
    %cst_209 = arith.constant dense<0.000000e+00> : vector<16x16xf32>
    %461 = tpu.matmul %453, %460, %cst_209 {dimension_numbers = #tpu.dot_dimension_numbers<[1], [0], [0], [1], [0, 0, 1, 1], [], []>} : vector<16x32xf32>, vector<32x16xf32>, vector<16x16xf32> -> vector<16x16xf32>
    %462 = vector.shape_cast %461 : vector<16x16xf32> to vector<2x8x16xf32>
    %c14 = arith.constant 14 : index
    %c0_210 = arith.constant 0 : index
    %c0_211 = arith.constant 0 : index
    %463 = vector.load %arg3[%c14, %c0_210, %c0_211] : memref<16x32x16xf32, #tpu.memory_space<vmem>>, vector<1x32x16xf32>
    %464 = vector.shape_cast %463 : vector<1x32x16xf32> to vector<32x16xf32>
    %cst_212 = arith.constant dense<0.000000e+00> : vector<16x16xf32>
    %465 = tpu.matmul %453, %464, %cst_212 {dimension_numbers = #tpu.dot_dimension_numbers<[1], [0], [0], [1], [0, 0, 1, 1], [], []>} : vector<16x32xf32>, vector<32x16xf32>, vector<16x16xf32> -> vector<16x16xf32>
    %466 = vector.shape_cast %465 : vector<16x16xf32> to vector<2x8x16xf32>
    %467 = vector.extract_strided_slice %458 {offsets = [0, 0, 0], sizes = [2, 16, 8], strides = [1, 1, 1]} : vector<2x32x8xf32> to vector<2x16x8xf32>
    "tpu.trace_start"() <{level = 10 : i32, message = "bid,bdj->bij"}> : () -> ()
    %cst_213 = arith.constant dense<0.000000e+00> : vector<2x8x8xf32>
    %468 = tpu.matmul %462, %467, %cst_213 {dimension_numbers = #tpu.dot_dimension_numbers<[2], [1], [1], [2], [0, 0, 0, 1, 1, 2], [0], [0]>} : vector<2x8x16xf32>, vector<2x16x8xf32>, vector<2x8x8xf32> -> vector<2x8x8xf32>
    "tpu.trace_stop"() : () -> ()
    %cst_214 = arith.constant 2.500000e-01 : f32
    %469 = vector.broadcast %cst_214 : f32 to vector<2x8x8xf32>
    %470 = arith.mulf %468, %469 : vector<2x8x8xf32>
    %c13 = arith.constant 13 : index
    %c0_215 = arith.constant 0 : index
    %c0_216 = arith.constant 0 : index
    %471 = vector.load %arg3[%c13, %c0_215, %c0_216] : memref<16x32x16xf32, #tpu.memory_space<vmem>>, vector<1x32x16xf32>
    %472 = vector.shape_cast %471 : vector<1x32x16xf32> to vector<32x16xf32>
    %cst_217 = arith.constant dense<0.000000e+00> : vector<16x16xf32>
    %473 = tpu.matmul %453, %472, %cst_217 {dimension_numbers = #tpu.dot_dimension_numbers<[1], [0], [0], [1], [0, 0, 1, 1], [], []>} : vector<16x32xf32>, vector<32x16xf32>, vector<16x16xf32> -> vector<16x16xf32>
    %474 = vector.shape_cast %473 : vector<16x16xf32> to vector<2x8x16xf32>
    %c15 = arith.constant 15 : index
    %c0_218 = arith.constant 0 : index
    %c0_219 = arith.constant 0 : index
    %475 = vector.load %arg3[%c15, %c0_218, %c0_219] : memref<16x32x16xf32, #tpu.memory_space<vmem>>, vector<1x32x16xf32>
    %476 = vector.shape_cast %475 : vector<1x32x16xf32> to vector<32x16xf32>
    %cst_220 = arith.constant dense<0.000000e+00> : vector<16x16xf32>
    %477 = tpu.matmul %453, %476, %cst_220 {dimension_numbers = #tpu.dot_dimension_numbers<[1], [0], [0], [1], [0, 0, 1, 1], [], []>} : vector<16x32xf32>, vector<32x16xf32>, vector<16x16xf32> -> vector<16x16xf32>
    %478 = vector.shape_cast %477 : vector<16x16xf32> to vector<2x8x16xf32>
    %479 = vector.extract_strided_slice %458 {offsets = [0, 16, 0], sizes = [2, 16, 8], strides = [1, 1, 1]} : vector<2x32x8xf32> to vector<2x16x8xf32>
    "tpu.trace_start"() <{level = 10 : i32, message = "bid,bdj->bij"}> : () -> ()
    %cst_221 = arith.constant dense<0.000000e+00> : vector<2x8x8xf32>
    %480 = tpu.matmul %474, %479, %cst_221 {dimension_numbers = #tpu.dot_dimension_numbers<[2], [1], [1], [2], [0, 0, 0, 1, 1, 2], [0], [0]>} : vector<2x8x16xf32>, vector<2x16x8xf32>, vector<2x8x8xf32> -> vector<2x8x8xf32>
    "tpu.trace_stop"() : () -> ()
    %cst_222 = arith.constant 2.500000e-01 : f32
    %481 = vector.broadcast %cst_222 : f32 to vector<2x8x8xf32>
    %482 = arith.mulf %480, %481 : vector<2x8x8xf32>
    %483 = tpu.concatenate %470, %482 in 0 : vector<2x8x8xf32>, vector<2x8x8xf32> -> vector<4x8x8xf32>
    %cst_223 = arith.constant dense<0xFF800000> : vector<4x8xf32>
    %484 = vector.multi_reduction <maximumf>, %483, %cst_223 [2] : vector<4x8x8xf32> to vector<4x8xf32>
    %485 = vector.shape_cast %484 : vector<4x8xf32> to vector<4x8x1xf32>
    %486 = vector.broadcast %485 : vector<4x8x1xf32> to vector<4x8x8xf32>
    %487 = arith.subf %483, %486 : vector<4x8x8xf32>
    %488 = math.exp %487 : vector<4x8x8xf32>
    %cst_224 = arith.constant dense<0.000000e+00> : vector<4x8xf32>
    %489 = vector.multi_reduction <add>, %488, %cst_224 [2] : vector<4x8x8xf32> to vector<4x8xf32>
    %490 = vector.shape_cast %489 : vector<4x8xf32> to vector<4x8x1xf32>
    %491 = tpu.reciprocal %490 {approx = true} : vector<4x8x1xf32> -> vector<4x8x1xf32>
    %492 = vector.broadcast %491 : vector<4x8x1xf32> to vector<4x8x8xf32>
    %493 = arith.mulf %488, %492 : vector<4x8x8xf32>
    %494 = vector.broadcast %416 : vector<1x32xf32> to vector<16x32xf32>
    %495 = arith.addf %431, %494 : vector<16x32xf32>
    %496 = vector.extract_strided_slice %493 {offsets = [0, 0, 0], sizes = [2, 8, 8], strides = [1, 1, 1]} : vector<4x8x8xf32> to vector<2x8x8xf32>
    "tpu.trace_start"() <{level = 10 : i32, message = "bij,bjd->bid"}> : () -> ()
    %cst_225 = arith.constant dense<0.000000e+00> : vector<2x8x16xf32>
    %497 = tpu.matmul %496, %466, %cst_225 {dimension_numbers = #tpu.dot_dimension_numbers<[2], [1], [1], [2], [0, 0, 0, 1, 1, 2], [0], [0]>} : vector<2x8x8xf32>, vector<2x8x16xf32>, vector<2x8x16xf32> -> vector<2x8x16xf32>
    "tpu.trace_stop"() : () -> ()
    %498 = vector.shape_cast %497 : vector<2x8x16xf32> to vector<16x16xf32>
    %c6_226 = arith.constant 6 : index
    %c0_227 = arith.constant 0 : index
    %c0_228 = arith.constant 0 : index
    %499 = vector.load %arg5[%c6_226, %c0_227, %c0_228] : memref<8x16x32xf32, #tpu.memory_space<vmem>>, vector<1x16x32xf32>
    %500 = vector.shape_cast %499 : vector<1x16x32xf32> to vector<16x32xf32>
    %cst_229 = arith.constant dense<0.000000e+00> : vector<16x32xf32>
    %501 = tpu.matmul %498, %500, %cst_229 {dimension_numbers = #tpu.dot_dimension_numbers<[1], [0], [0], [1], [0, 0, 1, 1], [], []>} : vector<16x16xf32>, vector<16x32xf32>, vector<16x32xf32> -> vector<16x32xf32>
    %502 = arith.addf %495, %501 : vector<16x32xf32>
    %503 = vector.extract_strided_slice %493 {offsets = [2, 0, 0], sizes = [2, 8, 8], strides = [1, 1, 1]} : vector<4x8x8xf32> to vector<2x8x8xf32>
    "tpu.trace_start"() <{level = 10 : i32, message = "bij,bjd->bid"}> : () -> ()
    %cst_230 = arith.constant dense<0.000000e+00> : vector<2x8x16xf32>
    %504 = tpu.matmul %503, %478, %cst_230 {dimension_numbers = #tpu.dot_dimension_numbers<[2], [1], [1], [2], [0, 0, 0, 1, 1, 2], [0], [0]>} : vector<2x8x8xf32>, vector<2x8x16xf32>, vector<2x8x16xf32> -> vector<2x8x16xf32>
    "tpu.trace_stop"() : () -> ()
    %505 = vector.shape_cast %504 : vector<2x8x16xf32> to vector<16x16xf32>
    %c7_231 = arith.constant 7 : index
    %c0_232 = arith.constant 0 : index
    %c0_233 = arith.constant 0 : index
    %506 = vector.load %arg5[%c7_231, %c0_232, %c0_233] : memref<8x16x32xf32, #tpu.memory_space<vmem>>, vector<1x16x32xf32>
    %507 = vector.shape_cast %506 : vector<1x16x32xf32> to vector<16x32xf32>
    %cst_234 = arith.constant dense<0.000000e+00> : vector<16x32xf32>
    %508 = tpu.matmul %505, %507, %cst_234 {dimension_numbers = #tpu.dot_dimension_numbers<[1], [0], [0], [1], [0, 0, 1, 1], [], []>} : vector<16x16xf32>, vector<16x32xf32>, vector<16x32xf32> -> vector<16x32xf32>
    %509 = arith.addf %502, %508 : vector<16x32xf32>
    %cst_235 = arith.constant dense<0.000000e+00> : vector<16xf32>
    %510 = vector.multi_reduction <add>, %509, %cst_235 [1] : vector<16x32xf32> to vector<16xf32>
    %511 = vector.shape_cast %510 : vector<16xf32> to vector<16x1xf32>
    %cst_236 = arith.constant 3.200000e+01 : f32
    %512 = vector.broadcast %cst_236 : f32 to vector<16x1xf32>
    %513 = arith.divf %511, %512 : vector<16x1xf32>
    %514 = vector.broadcast %513 : vector<16x1xf32> to vector<16x32xf32>
    %515 = arith.subf %509, %514 : vector<16x32xf32>
    %516 = arith.mulf %515, %515 : vector<16x32xf32>
    %cst_237 = arith.constant dense<0.000000e+00> : vector<16xf32>
    %517 = vector.multi_reduction <add>, %516, %cst_237 [1] : vector<16x32xf32> to vector<16xf32>
    %518 = vector.shape_cast %517 : vector<16xf32> to vector<16x1xf32>
    %cst_238 = arith.constant 3.200000e+01 : f32
    %519 = vector.broadcast %cst_238 : f32 to vector<16x1xf32>
    %520 = arith.divf %518, %519 : vector<16x1xf32>
    %521 = vector.broadcast %513 : vector<16x1xf32> to vector<16x32xf32>
    %522 = arith.subf %509, %521 : vector<16x32xf32>
    %cst_239 = arith.constant 9.99999974E-6 : f32
    %523 = vector.broadcast %cst_239 : f32 to vector<16x1xf32>
    %524 = arith.addf %520, %523 : vector<16x1xf32>
    %525 = math.rsqrt %524 : vector<16x1xf32>
    %526 = vector.broadcast %525 : vector<16x1xf32> to vector<16x32xf32>
    %527 = arith.mulf %522, %526 : vector<16x32xf32>
    %528 = vector.broadcast %417 : vector<1x32xf32> to vector<16x32xf32>
    %529 = arith.mulf %527, %528 : vector<16x32xf32>
    %530 = vector.broadcast %418 : vector<1x32xf32> to vector<16x32xf32>
    %531 = arith.addf %529, %530 : vector<16x32xf32>
    %c3_240 = arith.constant 3 : index
    %c0_241 = arith.constant 0 : index
    %c0_242 = arith.constant 0 : index
    %532 = vector.load %arg6[%c3_240, %c0_241, %c0_242] : memref<4x32x64xf32, #tpu.memory_space<vmem>>, vector<1x32x64xf32>
    %533 = vector.shape_cast %532 : vector<1x32x64xf32> to vector<32x64xf32>
    %cst_243 = arith.constant dense<0.000000e+00> : vector<16x64xf32>
    %534 = tpu.matmul %531, %533, %cst_243 {dimension_numbers = #tpu.dot_dimension_numbers<[1], [0], [0], [1], [0, 0, 1, 1], [], []>} : vector<16x32xf32>, vector<32x64xf32>, vector<16x64xf32> -> vector<16x64xf32>
    %535 = vector.broadcast %420 : vector<1x64xf32> to vector<16x64xf32>
    %536 = arith.addf %534, %535 : vector<16x64xf32>
    %537 = arith.mulf %536, %536 : vector<16x64xf32>
    %538 = arith.mulf %536, %537 : vector<16x64xf32>
    %cst_244 = arith.constant 4.471500e-02 : f32
    %539 = vector.broadcast %cst_244 : f32 to vector<16x64xf32>
    %540 = arith.mulf %539, %538 : vector<16x64xf32>
    %541 = arith.addf %536, %540 : vector<16x64xf32>
    %cst_245 = arith.constant 0.797884583 : f32
    %542 = vector.broadcast %cst_245 : f32 to vector<16x64xf32>
    %543 = arith.mulf %542, %541 : vector<16x64xf32>
    %544 = math.tanh %543 : vector<16x64xf32>
    %cst_246 = arith.constant 1.000000e+00 : f32
    %545 = vector.broadcast %cst_246 : f32 to vector<16x64xf32>
    %546 = arith.addf %545, %544 : vector<16x64xf32>
    %cst_247 = arith.constant 5.000000e-01 : f32
    %547 = vector.broadcast %cst_247 : f32 to vector<16x64xf32>
    %548 = arith.mulf %547, %546 : vector<16x64xf32>
    %549 = arith.mulf %536, %548 : vector<16x64xf32>
    %c3_248 = arith.constant 3 : index
    %c0_249 = arith.constant 0 : index
    %c0_250 = arith.constant 0 : index
    %550 = vector.load %arg7[%c3_248, %c0_249, %c0_250] : memref<4x64x32xf32, #tpu.memory_space<vmem>>, vector<1x64x32xf32>
    %551 = vector.shape_cast %550 : vector<1x64x32xf32> to vector<64x32xf32>
    %cst_251 = arith.constant dense<0.000000e+00> : vector<16x32xf32>
    %552 = tpu.matmul %549, %551, %cst_251 {dimension_numbers = #tpu.dot_dimension_numbers<[1], [0], [0], [1], [0, 0, 1, 1], [], []>} : vector<16x64xf32>, vector<64x32xf32>, vector<16x32xf32> -> vector<16x32xf32>
    %553 = arith.addf %509, %552 : vector<16x32xf32>
    %554 = vector.broadcast %419 : vector<1x32xf32> to vector<16x32xf32>
    %555 = arith.addf %553, %554 : vector<16x32xf32>
    %556 = vector.shape_cast %555 : vector<16x32xf32> to vector<2x8x32xf32>
    %c0_252 = arith.constant 0 : index
    %c0_253 = arith.constant 0 : index
    %c0_254 = arith.constant 0 : index
    %557 = vector.load %arg10[%c0_252, %c0_253, %c0_254] : memref<2x8x32xf32, #tpu.memory_space<vmem>>, vector<2x8x32xf32>
    tpu.vector_store %arg10[%c0_252, %c0_253, %c0_254], %556 {strides = array<i32>} : memref<2x8x32xf32, #tpu.memory_space<vmem>>, vector<2x8x32xf32>,
    return
  }
  func.func @transform_0(%arg0: i32) -> (i32, i32, i32) {
    %c0_i32 = arith.constant 0 : i32
    %c0_i32_0 = arith.constant 0 : i32
    %c0_i32_1 = arith.constant 0 : i32
    %c0_i32_2 = arith.constant 0 : i32
    return %c0_i32, %c0_i32_0, %c0_i32_1 : i32, i32, i32
  }
  func.func @transform_1(%arg0: i32) -> (i32, i32, i32) {
    %c0_i32 = arith.constant 0 : i32
    %c0_i32_0 = arith.constant 0 : i32
    %c0_i32_1 = arith.constant 0 : i32
    %c0_i32_2 = arith.constant 0 : i32
    return %c0_i32, %c0_i32_0, %c0_i32_1 : i32, i32, i32
  }
  func.func @transform_2(%arg0: i32) -> (i32, i32, i32) {
    %c0_i32 = arith.constant 0 : i32
    %c0_i32_0 = arith.constant 0 : i32
    %c0_i32_1 = arith.constant 0 : i32
    %c0_i32_2 = arith.constant 0 : i32
    return %c0_i32, %c0_i32_0, %c0_i32_1 : i32, i32, i32
  }
  func.func @transform_3(%arg0: i32) -> (i32, i32, i32) {
    %c0_i32 = arith.constant 0 : i32
    %c0_i32_0 = arith.constant 0 : i32
    %c0_i32_1 = arith.constant 0 : i32
    %c0_i32_2 = arith.constant 0 : i32
    return %c0_i32, %c0_i32_0, %c0_i32_1 : i32, i32, i32
  }
  func.func @transform_4(%arg0: i32) -> (i32, i32, i32) {
    %c0_i32 = arith.constant 0 : i32
    %c0_i32_0 = arith.constant 0 : i32
    %c0_i32_1 = arith.constant 0 : i32
    %c0_i32_2 = arith.constant 0 : i32
    return %c0_i32, %c0_i32_0, %c0_i32_1 : i32, i32, i32
  }
  func.func @transform_5(%arg0: i32) -> (i32, i32, i32) {
    %c0_i32 = arith.constant 0 : i32
    %c0_i32_0 = arith.constant 0 : i32
    %c0_i32_1 = arith.constant 0 : i32
    %c0_i32_2 = arith.constant 0 : i32
    return %c0_i32, %c0_i32_0, %c0_i32_1 : i32, i32, i32
  }
  func.func @transform_6(%arg0: i32) -> (i32, i32, i32) {
    %c0_i32 = arith.constant 0 : i32
    %c0_i32_0 = arith.constant 0 : i32
    %c0_i32_1 = arith.constant 0 : i32
    %c0_i32_2 = arith.constant 0 : i32
    return %c0_i32, %c0_i32_0, %c0_i32_1 : i32, i32, i32
  }
  func.func @transform_7(%arg0: i32) -> (i32, i32, i32) {
    %c0_i32 = arith.constant 0 : i32
    %c0_i32_0 = arith.constant 0 : i32
    %c0_i32_1 = arith.constant 0 : i32
    %c0_i32_2 = arith.constant 0 : i32
    return %c0_i32, %c0_i32_0, %c0_i32_1 : i32, i32, i32
  }
  func.func @transform_8(%arg0: i32) -> (i32, i32, i32) {
    %c0_i32 = arith.constant 0 : i32
    %c0_i32_0 = arith.constant 0 : i32
    %c0_i32_1 = arith.constant 0 : i32
    %c0_i32_2 = arith.constant 0 : i32
    return %c0_i32, %c0_i32_0, %c0_i32_1 : i32, i32, i32
  }
  func.func @transform_9(%arg0: i32) -> (i32, i32, i32) {
    %c0_i32 = arith.constant 0 : i32
    %c0_i32_0 = arith.constant 0 : i32
    %c0_i32_1 = arith.constant 0 : i32
    %c0_i32_2 = arith.constant 0 : i32
    return %c0_i32, %c0_i32_0, %c0_i32_1 : i32, i32, i32
  }
}

</mosaic_0001>

<bundles_post_ra>
// kernel: tpu_custom_call.1
= control target key start
LH: loop header
LB: loop body
LE: loop exit
PB: predicated region body
PF: predicated region fallthrough
CT: control target
= control target key end

     0   :  { %vm36_vm0 = vcmask 261120   ;;  %s4208_s0 = inlined_call_operand.vmem [shape: f32[2,8,32], index: 0, kind: input, shape index: {}]   ;;  %s4209_s1 = inlined_call_operand.vmem [shape: f32[4,8,64], index: 1, kind: input, shape index: {}]   ;;  %s4210_s2 = inlined_call_operand.vmem [shape: f32[16,32,16], index: 2, kind: input, shape index: {}]   ;;  %s4211_s3 = inlined_call_operand.vmem [shape: f32[4,32,32], index: 3, kind: input, shape index: {}]   ;;  %s4212_s4 = inlined_call_operand.vmem [shape: f32[8,16,32], index: 4, kind: input, shape index: {}]   ;;  %s4213_s5 = inlined_call_operand.vmem [shape: f32[4,32,64], index: 5, kind: input, shape index: {}]   ;;  %s4214_s6 = inlined_call_operand.vmem [shape: f32[4,64,32], index: 6, kind: input, shape index: {}]   ;;  %s4215_s7 = inlined_call_operand.vmem [shape: f32[4,16,16], index: 7, kind: input, shape index: {}]   ;;  %s4216_s8 = inlined_call_operand.vmem [shape: f32[2,16,1], index: 8, kind: input, shape index: {}]   ;;  %s4217_s9 = inlined_call_operand.hbm [shape: f32[2,8,32], index: 9, kind: output, shape index: {}]  }
   0x1   :  { %v3334_v0 = vld [vmem:[%s4208_s0] sm:$0xff] }
   0x2   :  { %14 = vsyncpa [#allocation3], 0  ;;  %v37_v1 = vsel %vm36_vm0, %v3334_v0, 0.0  ;;  %v3341_v2 = vld [vmem:[%s4208_s0 + $0x8] sm:$0xff]  ;;  %v3275_v4 = vmov 32.0   ;;  %v97_v21 = vld [vmem:[%s4211_s3 + $0x18] sm:$0xff] }
   0x3   :  { %38 = vadd.xlane.f32.xlu0 %v37_v1  ;;  %v40_v3 = vsel %vm36_vm0, %v3341_v2, 0.0  ;;  %3134 = vrcp.f32 %v3275_v4  ;;  %v130_v22 = vld [vmem:[%s4210_s2 + $0x18] sm:$0xff]  ;;  %116 = vmatpush.msra.mxu0 %v97_v21  ;;  %v96_v24 = vld [vmem:[%s4211_s3 + $0x10] sm:$0xff]  ;;  %v95_v27 = vld [vmem:[%s4211_s3 + $0x8] sm:$0xff]  ;;  %vm182_vm8 = vcmask 130048   ;;  %s3276_s26 = smov 112  }
   0x4   :  { %v2867_v23 = vld [vmem:[%s4210_s2 + $0x58] sm:$0xff]  ;;  %143 = vmatpush.msra.mxu1 %v130_v22  ;;  %v129_v25 = vld [vmem:[%s4210_s2 + $0x10] sm:$0xff]  ;;  %3121 = vmatpush.msra.mxu3 %v130_v22  ;;  %v128_v28 = vld [vmem:[%s4210_s2 + $0x8] sm:$0xff]  ;;  %vm349_vm9 = vcmask 64512   ;;  %s3279_s12 = smov 128  }
   0x5   :  { %171 = vmatpush.msra.mxu2 %v2867_v23  ;;  %v2866_v26 = vld [vmem:[%s4210_s2 + $0x50] sm:$0xff]  ;;  %117 = vmatpush.msra.mxu0 %v96_v24  ;;  %v2865_v29 = vld [vmem:[%s4210_s2 + $0x48] sm:$0xff]  ;;  %v94_v30 = vld [vmem:[%s4211_s3] sm:$0xff] }
   0x6   :  { %144 = vmatpush.msra.mxu1 %v129_v25  ;;  %3122 = vmatpush.msra.mxu3 %v129_v25  ;;  %v127_v31 = vld [vmem:[%s4210_s2] sm:$0xff]  ;;  %v2883_v36 = vld [vmem:[%s4210_s2 + $0x78] sm:$0xff]  ;;  %v2882_v37 = vld [vmem:[%s4210_s2 + $0x70] sm:$0xff] }
   0x7   :  { %172 = vmatpush.msra.mxu2 %v2866_v26  ;;  %118 = vmatpush.msra.mxu0 %v95_v27  ;;  %v2864_v32 = vld [vmem:[%s4210_s2 + $0x40] sm:$0xff]  ;;  %v2881_v39 = vld [vmem:[%s4210_s2 + $0x68] sm:$0xff] }
   0x8   :  { %145 = vmatpush.msra.mxu1 %v128_v28  ;;  %3123 = vmatpush.msra.mxu3 %v128_v28  ;;  %v2880_v41 = vld [vmem:[%s4210_s2 + $0x60] sm:$0xff] }
   0x9   :  { %v3135_v5 = vpop.eup %3134  ;;  %173 = vmatpush.msra.mxu2 %v2865_v29  ;;  %119 = vmatpush.msra.mxu0 %v94_v30  ;;  %v3414_v47 = vld [vmem:[%s4209_s1] sm:$0xff] }
   0xa   :  { %v44_v6 = vmul.f32 32.0, %v3135_v5  ;;  %vm48_vm1 = vweird.f32 %v3135_v5  ;;  %146 = vmatpush.msra.mxu1 %v127_v31  ;;  %3124 = vmatpush.msra.mxu3 %v127_v31  ;;  %v88_v52 = vperm.slane %v3414_v47, 0  ;;  %v91_v56 = vperm.slane %v3414_v47, 1 }
   0xb   :  { %41 = vadd.xlane.f32.xlu0 %v40_v3  ;;  %174 = vmatpush.msra.mxu2 %v2864_v32 }
   0xc   :  { %v45_v7 = vsub.f32 1.0, %v44_v6  ;;  %282 = vmatpush.msrb.mxu0 %v2883_v36  ;;  %v2877_v6 = vld [vmem:[%s4210_s2 + $0x38] sm:$0xff]  ;;  %v444_v36 = vld [vmem:[%s4212_s4 + $0x8] sm:$0xff] }
   0xe   :  { %v46_v8 = vmul.f32 %v3135_v5, %v45_v7  ;;  %283 = vmatpush.msrb.mxu0 %v2882_v37 }
  0x10   :  { %v47_v9 = vadd.f32 %v3135_v5, %v46_v8  ;;  %284 = vmatpush.msrb.mxu0 %v2881_v39  ;;  %v2876_v8 = vld [vmem:[%s4210_s2 + $0x30] sm:$0xff] }
  0x12   :  { %v3345_v10 = vsel %vm48_vm1, %v3135_v5, %v47_v9  ;;  %285 = vmatpush.msrb.mxu0 %v2880_v41  ;;  %v2875_v9 = vld [vmem:[%s4210_s2 + $0x28] sm:$0xff]  ;;  %vm666_vm1 = vcmask 523264  }
  0x76   :  { %v39_v11 = vpop.xlane.xlu0 %38 }
  0x77   :  { %v50_v12 = vmul.f32 %v3345_v10, %v39_v11  ;;  %v2874_v11 = vld [vmem:[%s4210_s2 + $0x20] sm:$0xff] }
  0x79   :  { %v3349_v13 = vsub.f32 %v3334_v0, %v50_v12 }
  0x7b   :  { %v54_v14 = vmul.f32 %v3349_v13, %v3349_v13 }
  0x7d   :  { %v56_v15 = vsel %vm36_vm0, %v54_v14, 0.0 }
  0x7e   :  { %57 = vadd.xlane.f32.xlu1 %v56_v15  ;;  %v42_v16 = vpop.xlane.xlu0 %41 }
  0x7f   :  { %v51_v17 = vmul.f32 %v3345_v10, %v42_v16 }
  0x81   :  { %v3356_v18 = vsub.f32 %v3341_v2, %v51_v17 }
  0x83   :  { %v55_v19 = vmul.f32 %v3356_v18, %v3356_v18 }
  0x85   :  { %v59_v20 = vsel %vm36_vm0, %v55_v19, 0.0 }
  0x86   :  { %60 = vadd.xlane.f32.xlu1 %v59_v20 }
  0xf1   :  { %v58_v33 = vpop.xlane.xlu1 %57 }
  0xf2   :  { %v62_v34 = vmul.f32 %v58_v33, %v3345_v10 }
  0xf4   :  { %v64_v35 = vadd.f32 1e-05, %v62_v34 }
  0xf6   :  { %3136 = vrsqrt.f32 %v64_v35  ;;  %vm72_vm3 = vweird.f32 %v64_v35 }
  0xf9   :  { %v61_v38 = vpop.xlane.xlu1 %60 }
  0xfa   :  { %v63_v40 = vmul.f32 %v61_v38, %v3345_v10 }
  0xfc   :  { %v3137_v42 = vpop.eup %3136  ;;  %v65_v43 = vadd.f32 1e-05, %v63_v40 }
  0xfd   :  { %v67_v44 = vmul.f32 %v3137_v42, %v64_v35  ;;  %vm73_vm2 = vweird.f32 %v3137_v42 }
  0xfe   :  { %3138 = vrsqrt.f32 %v65_v43  ;;  %vm74_vm4 = vmor %vm72_vm3, %vm73_vm2  ;;  %vm82_vm6 = vweird.f32 %v65_v43 }
  0xff   :  { %v68_v45 = vmul.f32 %v3137_v42, %v67_v44 }
 0x101   :  { %v69_v46 = vmul.f32 0.5, %v68_v45 }
 0x103   :  { %v70_v48 = vsub.f32 1.5, %v69_v46 }
 0x104   :  { %v3139_v49 = vpop.eup %3138 }
 0x105   :  { %v71_v50 = vmul.f32 %v3137_v42, %v70_v48  ;;  %v77_v51 = vmul.f32 %v3139_v49, %v65_v43  ;;  %vm83_vm5 = vweird.f32 %v3139_v49 }
 0x106   :  { %vm84_vm7 = vmor %vm82_vm6, %vm83_vm5 }
 0x107   :  { %v75_v53 = vsel %vm74_vm4, %v3137_v42, %v71_v50  ;;  %v78_v54 = vmul.f32 %v3139_v49, %v77_v51 }
 0x108   :  { %v86_v55 = vmul.f32 %v75_v53, %v3349_v13  ;;  %v443_v53 = vld [vmem:[%s4212_s4] sm:$0xff] }
 0x109   :  { %v79_v57 = vmul.f32 0.5, %v78_v54 }
 0x10a   :  { %v89_v58 = vmul.f32 %v88_v52, %v86_v55 }
 0x10b   :  { %v80_v59 = vsub.f32 1.5, %v79_v57 }
 0x10c   :  { %v92_v60 = vadd.f32 %v91_v56, %v89_v58 }
 0x10d   :  { %v81_v61 = vmul.f32 %v3139_v49, %v80_v59 }
 0x10e   :  { %2860 = vmatmul.msk.f32.vlgmr.msra.gmra.mxu0 %vm36_vm0, %v92_v60  ;;  %2862 = vmatmul.msk.f32.vlgmr.msra.gmra.mxu1 %vm36_vm0, %v92_v60 }
 0x10f   :  { %v85_v62 = vsel %vm84_vm7, %v3139_v49, %v81_v61  ;;  %2868 = vmatmul.msk.f32.vlgmr.msra.gmra.mxu2 %vm36_vm0, %v92_v60 }
 0x110   :  { %v87_v63 = vmul.f32 %v85_v62, %v3356_v18 }
 0x112   :  { %v90_v1 = vmul.f32 %v88_v52, %v87_v63 }
 0x114   :  { %v93_v3 = vadd.f32 %v91_v56, %v90_v1 }
 0x116   :  { %2861 = vmatmul.msk.f32.gmra.mxu0 %vm36_vm0, %v93_v3  ;;  %2863 = vmatmul.msk.f32.vlgmr.msra.gmra.mxu3 %vm36_vm0, %v93_v3 }
 0x117   :  { %2869 = vmatmul.msk.f32.gmra.mxu2 %vm36_vm0, %v93_v3 }
 0x11e   :  { %2884 = vmatmul.msk.f32.vlgmr.msrb.gmra.mxu0 %vm36_vm0, %v92_v60 }
 0x126   :  { %2885 = vmatmul.msk.f32.gmra.mxu0 %vm36_vm0, %v93_v3 }
 0x18b   :  { %v121_v4 = vpop.f32.mrf.mxu0  ;;  %v148_v5 = vpop.f32.mrf.mxu1 }
 0x18c   :  { %293 = vrot.lane.b32.xlu2 %v121_v4, %s3276_s26  ;;  %2870 = vmatpush.xpose.msk.msrb.mxu3 %vm182_vm8, %v121_v4  ;;  %v2897_v4 = vld [vmem:[%s4212_s4 + $0x18] sm:$0xff] }
 0x18f   :  { %2871 = vmatmul.msk.f32.vlgmr.msrb.gmra.mxu3 %vm182_vm8, %v148_v5  ;;  %v2896_v5 = vld [vmem:[%s4212_s4 + $0x10] sm:$0xff] }
 0x192   :  { %v176_v14 = vpop.f32.mrf.mxu2 }
 0x193   :  { %v124_v7 = vpop.f32.mrf.mxu0 }
 0x194   :  { %320 = vrot.lane.b32.xlu2 %v124_v7, %s3276_s26  ;;  %2872 = vmatpush.xpose.msk.msra.mxu3 %vm182_vm8, %v124_v7 }
 0x198   :  { %254 = vmatpush.msrb.mxu3 %v2877_v6 }
 0x199   :  { %v151_v12 = vpop.f32.mrf.mxu3 }
 0x19a   :  { %255 = vmatpush.msrb.mxu3 %v2876_v8  ;;  %v179_v17 = vpop.f32.mrf.mxu2 }
 0x19b   :  { %2873 = vmatmul.msk.f32.vlgmr.msra.gmra.mxu3 %vm182_vm8, %v151_v12  ;;  %v287_v13 = vpop.f32.mrf.mxu0  ;;  %v394_v12 = vperm.slane %v3414_v47, 2 }
 0x19c   :  { %256 = vmatpush.msrb.mxu3 %v2875_v9  ;;  %494 = vmatpush.msra.mxu0 %v287_v13 }
 0x19d   :  { %v395_v13 = vadd.f32 %v394_v12, %v3334_v0 }
 0x19e   :  { %257 = vmatpush.msrb.mxu3 %v2874_v11 }
 0x1a0   :  { %465 = vmatpush.msra.mxu3 %v444_v36 }
 0x1a2   :  { %466 = vmatpush.msra.mxu3 %v443_v53 }
 0x1a3   :  { %2878 = vmatmul.msk.f32.vlgmr.msrb.gmra.mxu3 %vm36_vm0, %v92_v60  ;;  %v290_v23 = vpop.f32.mrf.mxu0 }
 0x1ab   :  { %2879 = vmatmul.msk.f32.gmra.mxu3 %vm36_vm0, %v93_v3 }
 0x1e6   :  { %v294_v15 = vpop.permute.xlu2 %293 }
 0x1e7   :  { %2886 = vmatpush.xpose.msk.msrb.mxu1 %vm182_vm8, %v294_v15 }
 0x1eb   :  { %415 = vmatpush.msra.mxu1 %v176_v14 }
 0x1ee   :  { %v321_v16 = vpop.permute.xlu2 %320 }
 0x1ef   :  { %2888 = vmatpush.xpose.msk.msrb.mxu2 %vm182_vm8, %v321_v16 }
 0x1f3   :  { %438 = vmatpush.msra.mxu2 %v179_v17 }
 0x212   :  { %v206_v18 = vpop.f32.mrf.mxu3 }
 0x213   :  { %v235_v19 = vmul.f32 0.25, %v206_v18 }
 0x215   :  { %v350_v20 = vsel %vm349_vm9, %v235_v19, -inf }
 0x216   :  { %351 = vmax.xlane.f32.xlu0 %v350_v20 }
 0x21e   :  { %v232_v21 = vpop.f32.mrf.mxu3 }
 0x21f   :  { %v236_v33 = vmul.f32 0.25, %v232_v21 }
 0x221   :  { %v353_v34 = vsel %vm349_vm9, %v236_v33, -inf }
 0x226   :  { %v259_v22 = vpop.f32.mrf.mxu3 }
 0x227   :  { %2887 = vmatmul.msk.f32.vlgmr.msrb.gmra.mxu1 %vm182_vm8, %v259_v22 }
 0x228   :  { %517 = vmatpush.msrb.mxu1 %v290_v23 }
 0x22e   :  { %v262_v24 = vpop.f32.mrf.mxu3 }
 0x22f   :  { %2889 = vmatmul.msk.f32.vlgmr.msrb.gmra.mxu2 %vm182_vm8, %v262_v24  ;;  %v396_v24 = vadd.f32 %v394_v12, %v3341_v2 }
 0x230   :  { %545 = vmatpush.msrb.mxu2 %v2897_v4 }
 0x232   :  { %546 = vmatpush.msrb.mxu2 %v2896_v5 }
 0x289   :  { %v352_v25 = vpop.xlane.xlu0 %351 }
 0x28a   :  { %v362_v26 = vsub.f32 %v235_v19, %v352_v25 }
 0x28c   :  { %v366_v27 = vmul.f32 1.442695, %v362_v26 }
 0x28e   :  { %3140 = vpow2.f32 %v366_v27 }
 0x294   :  { %v3141_v28 = vpop.eup %3140 }
 0x295   :  { %v374_v29 = vsel %vm349_vm9, %v3141_v28, 0.0 }
 0x296   :  { %375 = vadd.xlane.f32.xlu2 %v374_v29 }
 0x2a4   :  { %v317_v30 = vpop.f32.mrf.mxu1 }
 0x2a5   :  { %v347_v31 = vmul.f32 0.25, %v317_v30  ;;  %v609_v30 = vld [vmem:[%s4213_s5 + $0x18] sm:$0xff] }
 0x2a6   :  { %629 = vmatpush.msrb.mxu0 %v609_v30 }
 0x2a7   :  { %v356_v32 = vsel %vm349_vm9, %v347_v31, -inf }
 0x2a8   :  { %357 = vmax.xlane.f32.xlu1 %v356_v32  ;;  %v607_v32 = vld [vmem:[%s4213_s5 + $0x8] sm:$0xff] }
 0x2b0   :  { %354 = vmax.xlane.f32.xlu1 %v353_v34 }
 0x2b2   :  { %v344_v48 = vpop.f32.mrf.mxu2 }
 0x2b3   :  { %v348_v49 = vmul.f32 0.25, %v344_v48 }
 0x2b5   :  { %v359_v51 = vsel %vm349_vm9, %v348_v49, -inf }
 0x309   :  { %v376_v35 = vpop.xlane.xlu2 %375 }
 0x30a   :  { %3142 = vrcp.f32 %v376_v35 }
 0x310   :  { %v3143_v37 = vpop.eup %3142 }
 0x311   :  { %v390_v38 = vmul.f32 %v3143_v37, %v3141_v28 }
 0x313   :  { %2890 = vmatmul.msk.f32.vlgmr.msra.gmra.mxu1 %vm349_vm9, %v390_v38 }
 0x31b   :  { %v358_v39 = vpop.xlane.xlu1 %357 }
 0x31c   :  { %v364_v40 = vsub.f32 %v347_v31, %v358_v39  ;;  %v608_v31 = vld [vmem:[%s4213_s5 + $0x10] sm:$0xff] }
 0x31d   :  { %630 = vmatpush.msrb.mxu0 %v608_v31 }
 0x31e   :  { %v370_v41 = vmul.f32 1.442695, %v364_v40 }
 0x31f   :  { %631 = vmatpush.msrb.mxu0 %v607_v32 }
 0x320   :  { %3144 = vpow2.f32 %v370_v41 }
 0x323   :  { %v355_v42 = vpop.xlane.xlu1 %354 }
 0x324   :  { %v363_v43 = vsub.f32 %v236_v33, %v355_v42  ;;  %v606_v33 = vld [vmem:[%s4213_s5] sm:$0xff] }
 0x325   :  { %632 = vmatpush.msrb.mxu0 %v606_v33 }
 0x326   :  { %v3145_v44 = vpop.eup %3144  ;;  %v368_v45 = vmul.f32 1.442695, %v363_v43 }
 0x327   :  { %v380_v46 = vsel %vm349_vm9, %v3145_v44, 0.0 }
 0x328   :  { %3146 = vpow2.f32 %v368_v45  ;;  %381 = vadd.xlane.f32.xlu0 %v380_v46 }
 0x32e   :  { %v3147_v50 = vpop.eup %3146 }
 0x32f   :  { %v377_v52 = vsel %vm349_vm9, %v3147_v50, 0.0 }
 0x330   :  { %360 = vmax.xlane.f32.xlu0 %v359_v51  ;;  %378 = vadd.xlane.f32.xlu1 %v377_v52  ;;  %v603_v52 = vperm.slane %v3414_v47, 4 }
 0x390   :  { %v417_v54 = vpop.f32.mrf.mxu1 }
 0x391   :  { %2892 = vmatmul.msk.f32.vlgmr.msra.gmra.mxu3 %vm182_vm8, %v417_v54 }
 0x39b   :  { %v382_v55 = vpop.xlane.xlu0 %381 }
 0x39c   :  { %3148 = vrcp.f32 %v382_v55  ;;  %v665_v55 = vld [vmem:[%s4214_s6 + $0x38] sm:$0xff] }
 0x39d   :  { %681 = vmatpush.msrb.mxu3 %v665_v55  ;;  %v2913_v55 = vld [vmem:[%s4210_s2 + $0x90] sm:$0xff] }
 0x3a2   :  { %v3149_v56 = vpop.eup %3148 }
 0x3a3   :  { %v392_v57 = vmul.f32 %v3149_v56, %v3145_v44  ;;  %v361_v58 = vpop.xlane.xlu0 %360  ;;  %v379_v59 = vpop.xlane.xlu1 %378  ;;  %v664_v56 = vld [vmem:[%s4214_s6 + $0x30] sm:$0xff] }
 0x3a4   :  { %v365_v60 = vsub.f32 %v348_v49, %v361_v58  ;;  %3150 = vrcp.f32 %v379_v59  ;;  %v600_v49 = vperm.slane %v3414_v47, 3  ;;  %682 = vmatpush.msrb.mxu3 %v664_v56  ;;  %v663_v59 = vld [vmem:[%s4214_s6 + $0x28] sm:$0xff]  ;;  %v2919_v56 = vld [vmem:[%s4210_s2 + $0xd0] sm:$0xff] }
 0x3a5   :  { %2894 = vmatmul.msk.f32.vlgmr.msra.gmra.mxu0 %vm349_vm9, %v392_v57 }
 0x3a6   :  { %v372_v61 = vmul.f32 1.442695, %v365_v60  ;;  %683 = vmatpush.msrb.mxu3 %v663_v59  ;;  %v2918_v59 = vld [vmem:[%s4210_s2 + $0xc8] sm:$0xff] }
 0x3a8   :  { %3152 = vpow2.f32 %v372_v61  ;;  %v662_v61 = vld [vmem:[%s4214_s6 + $0x20] sm:$0xff] }
 0x3a9   :  { %684 = vmatpush.msrb.mxu3 %v662_v61  ;;  %v2911_v61 = vld [vmem:[%s4210_s2 + $0x80] sm:$0xff] }
 0x3aa   :  { %v3151_v62 = vpop.eup %3150 }
 0x3ab   :  { %v391_v63 = vmul.f32 %v3151_v62, %v3147_v50  ;;  %v661_v62 = vld [vmem:[%s4214_s6 + $0x18] sm:$0xff] }
 0x3ac   :  { %685 = vmatpush.msrb.mxu3 %v661_v62  ;;  %v2917_v62 = vld [vmem:[%s4210_s2 + $0xc0] sm:$0xff] }
 0x3ad   :  { %2891 = vmatmul.msk.f32.vlgmr.msra.gmra.mxu2 %vm349_vm9, %v391_v63  ;;  %v660_v63 = vld [vmem:[%s4214_s6 + $0x10] sm:$0xff] }
 0x3ae   :  { %v3153_v1 = vpop.eup %3152  ;;  %686 = vmatpush.msrb.mxu3 %v660_v63 }
 0x3af   :  { %v383_v3 = vsel %vm349_vm9, %v3153_v1, 0.0 }
 0x3b0   :  { %384 = vadd.xlane.f32.xlu0 %v383_v3  ;;  %v658_v3 = vld [vmem:[%s4214_s6] sm:$0xff] }
 0x414   :  { %v468_v14 = vpop.f32.mrf.mxu3 }
 0x415   :  { %v474_v15 = vadd.f32 %v468_v14, %v395_v13 }
 0x422   :  { %v496_v6 = vpop.f32.mrf.mxu0 }
 0x423   :  { %v385_v7 = vpop.xlane.xlu0 %384  ;;  %2898 = vmatmul.msk.f32.vlgmr.msrb.gmra.mxu2 %vm182_vm8, %v496_v6 }
 0x424   :  { %3154 = vrcp.f32 %v385_v7  ;;  %v610_v7 = vperm.slane %v3414_v47, 6 }
 0x42a   :  { %v3155_v8 = vpop.eup %3154 }
 0x42b   :  { %v393_v9 = vmul.f32 %v3155_v8, %v3153_v1  ;;  %v659_v1 = vld [vmem:[%s4214_s6 + $0x8] sm:$0xff] }
 0x42c   :  { %687 = vmatpush.msrb.mxu3 %v659_v1 }
 0x42d   :  { %2895 = vmatmul.msk.f32.vlgmr.msrb.gmra.mxu1 %vm349_vm9, %v393_v9 }
 0x42e   :  { %688 = vmatpush.msrb.mxu3 %v658_v3 }
 0x430   :  { %v440_v11 = vpop.f32.mrf.mxu2 }
 0x431   :  { %2893 = vmatmul.msk.f32.gmra.mxu3 %vm182_vm8, %v440_v11 }
 0x4a6   :  { %v548_v16 = vpop.f32.mrf.mxu2 }
 0x4a7   :  { %v3481_v17 = vadd.f32 %v548_v16, %v474_v15 }
 0x4a9   :  { %v556_v18 = vsel %vm36_vm0, %v3481_v17, 0.0 }
 0x4aa   :  { %v519_v19 = vpop.f32.mrf.mxu1  ;;  %557 = vadd.xlane.f32.xlu1 %v556_v18 }
 0x4ab   :  { %2899 = vmatmul.msk.f32.gmra.mxu2 %vm182_vm8, %v519_v19 }
 0x4b4   :  { %v471_v25 = vpop.f32.mrf.mxu3 }
 0x4b5   :  { %v475_v26 = vadd.f32 %v471_v25, %v396_v24 }
 0x51d   :  { %v558_v20 = vpop.xlane.xlu1 %557 }
 0x51e   :  { %v562_v21 = vmul.f32 %v558_v20, %v3345_v10 }
 0x520   :  { %v564_v22 = vsub.f32 %v3481_v17, %v562_v21 }
 0x522   :  { %v566_v23 = vmul.f32 %v564_v22, %v564_v22 }
 0x524   :  { %v568_v0 = vsel %vm36_vm0, %v566_v23, 0.0 }
 0x525   :  { %569 = vadd.xlane.f32.xlu0 %v568_v0 }
 0x52e   :  { %v551_v27 = vpop.f32.mrf.mxu2 }
 0x52f   :  { %v3490_v28 = vadd.f32 %v551_v27, %v475_v26 }
 0x531   :  { %v559_v29 = vsel %vm36_vm0, %v3490_v28, 0.0 }
 0x532   :  { %560 = vadd.xlane.f32.xlu1 %v559_v29 }
 0x598   :  { %v570_v34 = vpop.xlane.xlu0 %569 }
 0x599   :  { %v574_v35 = vmul.f32 %v570_v34, %v3345_v10 }
 0x59b   :  { %v576_v36 = vadd.f32 1e-05, %v574_v35 }
 0x59d   :  { %3156 = vrsqrt.f32 %v576_v36  ;;  %vm584_vm11 = vweird.f32 %v576_v36 }
 0x5a3   :  { %v3157_v37 = vpop.eup %3156 }
 0x5a4   :  { %v579_v38 = vmul.f32 %v3157_v37, %v576_v36  ;;  %vm585_vm10 = vweird.f32 %v3157_v37  ;;  %v698_v36 = vperm.slane %v3414_v47, 5 }
 0x5a5   :  { %v561_v39 = vpop.xlane.xlu1 %560  ;;  %vm586_vm12 = vmor %vm584_vm11, %vm585_vm10 }
 0x5a6   :  { %v580_v40 = vmul.f32 %v3157_v37, %v579_v38  ;;  %v563_v41 = vmul.f32 %v561_v39, %v3345_v10 }
 0x5a8   :  { %v581_v42 = vmul.f32 0.5, %v580_v40  ;;  %v565_v43 = vsub.f32 %v3490_v28, %v563_v41 }
 0x5aa   :  { %v582_v44 = vsub.f32 1.5, %v581_v42  ;;  %v567_v45 = vmul.f32 %v565_v43, %v565_v43 }
 0x5ac   :  { %v583_v46 = vmul.f32 %v3157_v37, %v582_v44  ;;  %v571_v48 = vsel %vm36_vm0, %v567_v45, 0.0 }
 0x5ad   :  { %572 = vadd.xlane.f32.xlu0 %v571_v48 }
 0x5ae   :  { %v587_v50 = vsel %vm586_vm12, %v3157_v37, %v583_v46 }
 0x5af   :  { %v598_v51 = vmul.f32 %v587_v50, %v564_v22 }
 0x5b1   :  { %v601_v53 = vmul.f32 %v600_v49, %v598_v51 }
 0x5b3   :  { %v604_v54 = vadd.f32 %v603_v52, %v601_v53  ;;  %v2914_v53 = vld [vmem:[%s4210_s2 + $0x98] sm:$0xff] }
 0x5b4   :  { %804 = vmatpush.msra.mxu2 %v2914_v53 }
 0x5b5   :  { %2900 = vmatmul.msk.f32.vlgmr.msrb.gmra.mxu0 %vm36_vm0, %v604_v54  ;;  %v2920_v54 = vld [vmem:[%s4210_s2 + $0xd8] sm:$0xff] }
 0x5b6   :  { %832 = vmatpush.msra.mxu0 %v2920_v54  ;;  %805 = vmatpush.msra.mxu2 %v2913_v55 }
 0x5b8   :  { %833 = vmatpush.msra.mxu0 %v2919_v56 }
 0x5ba   :  { %834 = vmatpush.msra.mxu0 %v2918_v59 }
 0x5bc   :  { %835 = vmatpush.msra.mxu0 %v2917_v62 }
 0x620   :  { %v573_v57 = vpop.xlane.xlu0 %572 }
 0x621   :  { %v575_v58 = vmul.f32 %v573_v57, %v3345_v10  ;;  %v2906_v57 = vld [vmem:[%s4211_s3 + $0x28] sm:$0xff] }
 0x623   :  { %v577_v60 = vadd.f32 1e-05, %v575_v58  ;;  %v2912_v58 = vld [vmem:[%s4210_s2 + $0x88] sm:$0xff] }
 0x624   :  { %806 = vmatpush.msra.mxu2 %v2912_v58 }
 0x625   :  { %3158 = vrsqrt.f32 %v577_v60  ;;  %vm594_vm14 = vweird.f32 %v577_v60 }
 0x626   :  { %807 = vmatpush.msra.mxu2 %v2911_v61 }
 0x62b   :  { %v3159_v4 = vpop.eup %3158 }
 0x62c   :  { %v589_v5 = vmul.f32 %v3159_v4, %v577_v60  ;;  %vm595_vm13 = vweird.f32 %v3159_v4  ;;  %v2905_v60 = vld [vmem:[%s4211_s3 + $0x20] sm:$0xff] }
 0x62d   :  { %vm596_vm15 = vmor %vm594_vm14, %vm595_vm13 }
 0x62e   :  { %v590_v6 = vmul.f32 %v3159_v4, %v589_v5 }
 0x630   :  { %v591_v8 = vmul.f32 0.5, %v590_v6 }
 0x632   :  { %v592_v9 = vsub.f32 1.5, %v591_v8  ;;  %v634_v11 = vpop.f32.mrf.mxu0 }
 0x633   :  { %v635_v12 = vadd.f32 %v634_v11, %v610_v7 }
 0x634   :  { %v593_v13 = vmul.f32 %v3159_v4, %v592_v9 }
 0x635   :  { %v640_v14 = vmul.f32 %v635_v12, %v635_v12 }
 0x636   :  { %v597_v15 = vsel %vm596_vm15, %v3159_v4, %v593_v13 }
 0x637   :  { %v642_v16 = vmul.f32 %v640_v14, %v635_v12  ;;  %v599_v18 = vmul.f32 %v597_v15, %v565_v43  ;;  %v3598_v14 = vld [vmem:[%s4209_s1 + $0x8] sm:$0xff] }
 0x639   :  { %v644_v19 = vmul.f32 0.044715, %v642_v16  ;;  %v602_v20 = vmul.f32 %v600_v49, %v599_v18  ;;  %v747_v18 = vperm.slane %v3598_v14, 0 }
 0x63b   :  { %v646_v21 = vadd.f32 %v644_v19, %v635_v12  ;;  %v605_v22 = vadd.f32 %v603_v52, %v602_v20  ;;  %v2908_v52 = vld [vmem:[%s4211_s3 + $0x38] sm:$0xff] }
 0x63c   :  { %776 = vmatpush.msra.mxu1 %v2908_v52 }
 0x63d   :  { %v648_v23 = vmul.f32 0.7978846, %v646_v21  ;;  %2901 = vmatmul.msk.f32.gmra.mxu0 %vm36_vm0, %v605_v22  ;;  %v750_v21 = vperm.slane %v3598_v14, 1 }
 0x63f   :  { %3160 = vtanh.f32 %v648_v23 }
 0x645   :  { %v3161_v0 = vpop.eup %3160 }
 0x646   :  { %v652_v24 = vadd.f32 1.0, %v3161_v0  ;;  %v2936_v0 = vld [vmem:[%s4210_s2 + $0xf8] sm:$0xff] }
 0x647   :  { %942 = vmatpush.msrb.mxu2 %v2936_v0  ;;  %v2946_v0 = vld [vmem:[%s4212_s4 + $0x28] sm:$0xff] }
 0x648   :  { %v654_v25 = vmul.f32 0.5, %v652_v24  ;;  %v2935_v24 = vld [vmem:[%s4210_s2 + $0xf0] sm:$0xff] }
 0x649   :  { %943 = vmatpush.msrb.mxu2 %v2935_v24 }
 0x64a   :  { %v656_v26 = vmul.f32 %v654_v25, %v635_v12 }
 0x64c   :  { %2902 = vmatmul.msk.f32.vlgmr.msrb.gmra.mxu3 %vm666_vm1, %v656_v26  ;;  %v2934_v26 = vld [vmem:[%s4210_s2 + $0xe8] sm:$0xff] }
 0x64d   :  { %944 = vmatpush.msrb.mxu2 %v2934_v26  ;;  %v2945_v26 = vld [vmem:[%s4212_s4 + $0x20] sm:$0xff] }
 0x6ba   :  { %v637_v27 = vpop.f32.mrf.mxu0 }
 0x6bb   :  { %v638_v29 = vadd.f32 %v637_v27, %v610_v7 }
 0x6bd   :  { %v641_v30 = vmul.f32 %v638_v29, %v638_v29 }
 0x6bf   :  { %v643_v31 = vmul.f32 %v641_v30, %v638_v29 }
 0x6c1   :  { %v645_v32 = vmul.f32 0.044715, %v643_v31 }
 0x6c3   :  { %v647_v33 = vadd.f32 %v645_v32, %v638_v29 }
 0x6c5   :  { %v649_v34 = vmul.f32 0.7978846, %v647_v33 }
 0x6c7   :  { %3162 = vtanh.f32 %v649_v34 }
 0x6cd   :  { %v3163_v35 = vpop.eup %3162 }
 0x6ce   :  { %v653_v37 = vadd.f32 1.0, %v3163_v35  ;;  %v2930_v35 = vld [vmem:[%s4210_s2 + $0xb8] sm:$0xff] }
 0x6cf   :  { %v690_v38 = vpop.f32.mrf.mxu3 }
 0x6d0   :  { %v696_v39 = vadd.f32 %v690_v38, %v3481_v17  ;;  %v655_v40 = vmul.f32 0.5, %v653_v37  ;;  %v2929_v38 = vld [vmem:[%s4210_s2 + $0xb0] sm:$0xff] }
 0x6d2   :  { %v3543_v41 = vadd.f32 %v698_v36, %v696_v39  ;;  %v657_v42 = vmul.f32 %v655_v40, %v638_v29  ;;  %v2933_v29 = vld [vmem:[%s4210_s2 + $0xe0] sm:$0xff]  ;;  %v2928_v40 = vld [vmem:[%s4210_s2 + $0xa8] sm:$0xff] }
 0x6d3   :  { %945 = vmatpush.msrb.mxu2 %v2933_v29 }
 0x6d4   :  { %2903 = vmatmul.msk.f32.gmra.mxu3 %vm666_vm1, %v657_v42  ;;  %v703_v43 = vsel %vm36_vm0, %v3543_v41, 0.0 }
 0x6d5   :  { %704 = vadd.xlane.f32.xlu1 %v703_v43 }
 0x748   :  { %v705_v44 = vpop.xlane.xlu1 %704 }
 0x749   :  { %v709_v45 = vmul.f32 %v705_v44, %v3345_v10  ;;  %v2927_v44 = vld [vmem:[%s4210_s2 + $0xa0] sm:$0xff] }
 0x74b   :  { %v711_v46 = vsub.f32 %v3543_v41, %v709_v45 }
 0x74d   :  { %v713_v47 = vmul.f32 %v711_v46, %v711_v46 }
 0x74f   :  { %v715_v48 = vsel %vm36_vm0, %v713_v47, 0.0 }
 0x750   :  { %716 = vadd.xlane.f32.xlu2 %v715_v48 }
 0x757   :  { %v693_v17 = vpop.f32.mrf.mxu3 }
 0x758   :  { %v697_v49 = vadd.f32 %v693_v17, %v3490_v28  ;;  %v2907_v28 = vld [vmem:[%s4211_s3 + $0x30] sm:$0xff] }
 0x759   :  { %777 = vmatpush.msra.mxu1 %v2907_v28 }
 0x75a   :  { %v3552_v50 = vadd.f32 %v698_v36, %v697_v49 }
 0x75b   :  { %778 = vmatpush.msra.mxu1 %v2906_v57 }
 0x75c   :  { %v706_v51 = vsel %vm36_vm0, %v3552_v50, 0.0 }
 0x75d   :  { %707 = vadd.xlane.f32.xlu0 %v706_v51  ;;  %779 = vmatpush.msra.mxu1 %v2905_v60 }
 0x7c3   :  { %v717_v63 = vpop.xlane.xlu2 %716 }
 0x7c4   :  { %v721_v1 = vmul.f32 %v717_v63, %v3345_v10 }
 0x7c6   :  { %v723_v3 = vadd.f32 1e-05, %v721_v1 }
 0x7c8   :  { %3164 = vrsqrt.f32 %v723_v3  ;;  %vm731_vm3 = vweird.f32 %v723_v3 }
 0x7ce   :  { %v3165_v4 = vpop.eup %3164 }
 0x7cf   :  { %v726_v5 = vmul.f32 %v3165_v4, %v723_v3  ;;  %vm732_vm2 = vweird.f32 %v3165_v4 }
 0x7d0   :  { %v708_v6 = vpop.xlane.xlu0 %707  ;;  %vm733_vm4 = vmor %vm731_vm3, %vm732_vm2 }
 0x7d1   :  { %v727_v7 = vmul.f32 %v3165_v4, %v726_v5  ;;  %v710_v8 = vmul.f32 %v708_v6, %v3345_v10 }
 0x7d3   :  { %v728_v9 = vmul.f32 0.5, %v727_v7  ;;  %v712_v11 = vsub.f32 %v3552_v50, %v710_v8 }
 0x7d5   :  { %v729_v12 = vsub.f32 1.5, %v728_v9  ;;  %v714_v13 = vmul.f32 %v712_v11, %v712_v11 }
 0x7d7   :  { %v730_v15 = vmul.f32 %v3165_v4, %v729_v12  ;;  %v718_v16 = vsel %vm36_vm0, %v714_v13, 0.0 }
 0x7d8   :  { %719 = vadd.xlane.f32.xlu1 %v718_v16 }
 0x7d9   :  { %v734_v19 = vsel %vm733_vm4, %v3165_v4, %v730_v15 }
 0x7da   :  { %v745_v20 = vmul.f32 %v734_v19, %v711_v46 }
 0x7dc   :  { %v748_v22 = vmul.f32 %v747_v18, %v745_v20  ;;  %v3248_v20 = vld [vmem:[%s4208_s0] sm:$0xff] }
 0x7de   :  { %v751_v23 = vadd.f32 %v750_v21, %v748_v22 }
 0x7e0   :  { %2909 = vmatmul.msk.f32.vlgmr.msra.gmra.mxu1 %vm36_vm0, %v751_v23  ;;  %2915 = vmatmul.msk.f32.vlgmr.msra.gmra.mxu2 %vm36_vm0, %v751_v23 }
 0x7e1   :  { %2921 = vmatmul.msk.f32.vlgmr.msra.gmra.mxu0 %vm36_vm0, %v751_v23 }
 0x84b   :  { %v720_v25 = vpop.xlane.xlu1 %719 }
 0x84c   :  { %v722_v27 = vmul.f32 %v720_v25, %v3345_v10 }
 0x84e   :  { %v724_v30 = vadd.f32 1e-05, %v722_v27 }
 0x850   :  { %3166 = vrsqrt.f32 %v724_v30  ;;  %vm741_vm6 = vweird.f32 %v724_v30 }
 0x856   :  { %v3167_v31 = vpop.eup %3166 }
 0x857   :  { %v736_v32 = vmul.f32 %v3167_v31, %v724_v30  ;;  %vm742_vm5 = vweird.f32 %v3167_v31 }
 0x858   :  { %vm743_vm7 = vmor %vm741_vm6, %vm742_vm5 }
 0x859   :  { %v737_v33 = vmul.f32 %v3167_v31, %v736_v32 }
 0x85b   :  { %v738_v34 = vmul.f32 0.5, %v737_v33 }
 0x85d   :  { %v739_v36 = vsub.f32 1.5, %v738_v34  ;;  %v781_v37 = vpop.f32.mrf.mxu1 }
 0x85e   :  { %953 = vrot.lane.b32.xlu2 %v781_v37, %s3276_s26  ;;  %2923 = vmatpush.xpose.msk.msrb.mxu1 %vm182_vm8, %v781_v37  ;;  %v837_v51 = vpop.f32.mrf.mxu0 }
 0x85f   :  { %v740_v39 = vmul.f32 %v3167_v31, %v739_v36 }
 0x861   :  { %v744_v42 = vsel %vm743_vm7, %v3167_v31, %v740_v39 }
 0x862   :  { %914 = vmatpush.msra.mxu1 %v2930_v35  ;;  %v746_v43 = vmul.f32 %v744_v42, %v712_v11 }
 0x863   :  { %v809_v47 = vpop.f32.mrf.mxu2 }
 0x864   :  { %915 = vmatpush.msra.mxu1 %v2929_v38  ;;  %v749_v45 = vmul.f32 %v747_v18, %v746_v43 }
 0x866   :  { %916 = vmatpush.msra.mxu1 %v2928_v40  ;;  %v752_v46 = vadd.f32 %v750_v21, %v749_v45  ;;  %v2952_v40 = vld [vmem:[%s4212_s4 + $0x38] sm:$0xff]  ;;  %v2951_v45 = vld [vmem:[%s4212_s4 + $0x30] sm:$0xff] }
 0x868   :  { %917 = vmatpush.msra.mxu1 %v2927_v44  ;;  %2916 = vmatmul.msk.f32.gmra.mxu2 %vm36_vm0, %v752_v46 }
 0x869   :  { %2910 = vmatmul.msk.f32.gmra.mxu1 %vm36_vm0, %v752_v46  ;;  %2922 = vmatmul.msk.f32.gmra.mxu0 %vm36_vm0, %v752_v46 }
 0x870   :  { %2937 = vmatmul.msk.f32.vlgmr.msrb.gmra.mxu2 %vm36_vm0, %v751_v23 }
 0x871   :  { %2924 = vmatmul.msk.f32.vlgmr.msrb.gmra.mxu1 %vm182_vm8, %v809_v47 }
 0x872   :  { %1125 = vmatpush.msrb.mxu1 %v2946_v0 }
 0x874   :  { %1126 = vmatpush.msrb.mxu1 %v2945_v26 }
 0x878   :  { %2938 = vmatmul.msk.f32.gmra.mxu2 %vm36_vm0, %v752_v46 }
 0x879   :  { %2931 = vmatmul.msk.f32.vlgmr.msra.gmra.mxu1 %vm36_vm0, %v751_v23 }
 0x881   :  { %2932 = vmatmul.msk.f32.gmra.mxu1 %vm36_vm0, %v752_v46 }
 0x8b8   :  { %v954_v17 = vpop.permute.xlu2 %953 }
 0x8e6   :  { %v784_v48 = vpop.f32.mrf.mxu1  ;;  %v840_v58 = vpop.f32.mrf.mxu0 }
 0x8e7   :  { %980 = vrot.lane.b32.xlu0 %v784_v48, %s3276_s26  ;;  %2925 = vmatpush.xpose.msk.msra.mxu3 %vm182_vm8, %v784_v48 }
 0x8eb   :  { %2939 = vmatpush.xpose.msk.msrb.mxu3 %vm182_vm8, %v954_v17  ;;  %v812_v49 = vpop.f32.mrf.mxu2 }
 0x8ec   :  { %2926 = vmatmul.msk.f32.vlgmr.msra.gmra.mxu3 %vm182_vm8, %v812_v49 }
 0x8ee   :  { %v866_v52 = vpop.f32.mrf.mxu1 }
 0x8ef   :  { %1074 = vmatpush.msra.mxu3 %v837_v51  ;;  %v895_v53 = vmul.f32 0.25, %v866_v52  ;;  %v1053_v51 = vperm.slane %v3598_v14, 2 }
 0x8f1   :  { %v1009_v54 = vsel %vm349_vm9, %v895_v53, -inf }
 0x8f2   :  { %1010 = vmax.xlane.f32.xlu1 %v1009_v54 }
 0x8f3   :  { %v947_v28 = vpop.f32.mrf.mxu2 }
 0x8f4   :  { %1154 = vmatpush.msra.mxu2 %v947_v28 }
 0x8f6   :  { %v919_v55 = vpop.f32.mrf.mxu1 }
 0x8f7   :  { %2940 = vmatmul.msk.f32.vlgmr.msrb.gmra.mxu3 %vm182_vm8, %v919_v55 }
 0x8fb   :  { %v950_v56 = vpop.f32.mrf.mxu2 }
 0x8fc   :  { %1177 = vmatpush.msrb.mxu3 %v950_v56 }
 0x8fe   :  { %v922_v59 = vpop.f32.mrf.mxu1 }
 0x959   :  { %v981_v57 = vpop.permute.xlu0 %980 }
 0x95a   :  { %2941 = vmatpush.xpose.msk.msrb.mxu0 %vm182_vm8, %v981_v57  ;;  %v1055_v57 = vadd.f32 %v1053_v51, %v3552_v50 }
 0x95d   :  { %2942 = vmatmul.msk.f32.vlgmr.msrb.gmra.mxu0 %vm182_vm8, %v922_v59 }
 0x95e   :  { %1097 = vmatpush.msra.mxu0 %v840_v58 }
 0x960   :  { %1205 = vmatpush.msrb.mxu0 %v2952_v40 }
 0x962   :  { %1206 = vmatpush.msrb.mxu0 %v2951_v45 }
 0x965   :  { %v1011_v60 = vpop.xlane.xlu1 %1010 }
 0x966   :  { %v1021_v61 = vsub.f32 %v895_v53, %v1011_v60  ;;  %v1054_v53 = vadd.f32 %v1053_v51, %v3543_v41  ;;  %v2963_v51 = vld [vmem:[%s4214_s6 + $0x50] sm:$0xff] }
 0x968   :  { %v1025_v62 = vmul.f32 1.442695, %v1021_v61 }
 0x96a   :  { %3168 = vpow2.f32 %v1025_v62 }
 0x96f   :  { %v892_v1 = vpop.f32.mrf.mxu3 }
 0x970   :  { %v3169_v63 = vpop.eup %3168  ;;  %v896_v3 = vmul.f32 0.25, %v892_v1 }
 0x971   :  { %v1033_v4 = vsel %vm349_vm9, %v3169_v63, 0.0 }
 0x972   :  { %1034 = vadd.xlane.f32.xlu0 %v1033_v4  ;;  %v1012_v5 = vsel %vm349_vm9, %v896_v3, -inf }
 0x973   :  { %1013 = vmax.xlane.f32.xlu2 %v1012_v5 }
 0x97a   :  { %v977_v6 = vpop.f32.mrf.mxu3 }
 0x97b   :  { %v1007_v7 = vmul.f32 0.25, %v977_v6 }
 0x97d   :  { %v1015_v8 = vsel %vm349_vm9, %v1007_v7, -inf }
 0x97e   :  { %1016 = vmax.xlane.f32.xlu1 %v1015_v8 }
 0x9da   :  { %v1004_v9 = vpop.f32.mrf.mxu0 }
 0x9db   :  { %v1008_v11 = vmul.f32 0.25, %v1004_v9 }
 0x9dd   :  { %v1018_v12 = vsel %vm349_vm9, %v1008_v11, -inf }
 0x9de   :  { %1019 = vmax.xlane.f32.xlu1 %v1018_v12  ;;  %v2958_v12 = vld [vmem:[%s4213_s5 + $0x38] sm:$0xff] }
 0x9df   :  { %1290 = vmatpush.msrb.mxu2 %v2958_v12 }
 0x9e5   :  { %v1035_v13 = vpop.xlane.xlu0 %1034 }
 0x9e6   :  { %3170 = vrcp.f32 %v1035_v13  ;;  %v1014_v24 = vpop.xlane.xlu2 %1013  ;;  %v2957_v13 = vld [vmem:[%s4213_s5 + $0x30] sm:$0xff] }
 0x9e7   :  { %v1022_v27 = vsub.f32 %v896_v3, %v1014_v24  ;;  %1291 = vmatpush.msrb.mxu2 %v2957_v13 }
 0x9e9   :  { %v1027_v30 = vmul.f32 1.442695, %v1022_v27 }
 0x9ec   :  { %v3171_v15 = vpop.eup %3170 }
 0x9ed   :  { %v1049_v16 = vmul.f32 %v3171_v15, %v3169_v63  ;;  %v2956_v15 = vld [vmem:[%s4213_s5 + $0x28] sm:$0xff] }
 0x9ee   :  { %1292 = vmatpush.msrb.mxu2 %v2956_v15 }
 0x9ef   :  { %2943 = vmatmul.msk.f32.vlgmr.msra.gmra.mxu3 %vm349_vm9, %v1049_v16  ;;  %v2955_v16 = vld [vmem:[%s4213_s5 + $0x20] sm:$0xff] }
 0x9f0   :  { %1389 = vmatpush.msra.mxu3 %v3341_v2  ;;  %1293 = vmatpush.msrb.mxu2 %v2955_v16 }
 0x9f1   :  { %v1017_v18 = vpop.xlane.xlu1 %1016 }
 0x9f2   :  { %v1023_v19 = vsub.f32 %v1007_v7, %v1017_v18  ;;  %1390 = vmatpush.msra.mxu3 %v3248_v20 }
 0x9f4   :  { %v1029_v21 = vmul.f32 1.442695, %v1023_v19 }
 0x9f6   :  { %3172 = vpow2.f32 %v1029_v21 }
 0x9fc   :  { %v3173_v22 = vpop.eup %3172 }
 0x9fd   :  { %v1039_v23 = vsel %vm349_vm9, %v3173_v22, 0.0 }
 0x9fe   :  { %1040 = vadd.xlane.f32.xlu1 %v1039_v23 }
 0xa51   :  { %v1020_v2 = vpop.xlane.xlu1 %1019 }
 0xa52   :  { %v1024_v25 = vsub.f32 %v1008_v11, %v1020_v2 }
 0xa54   :  { %v1031_v29 = vmul.f32 1.442695, %v1024_v25  ;;  %v1260_v25 = vperm.slane %v3598_v14, 3 }
 0xa56   :  { %3174 = vpow2.f32 %v1031_v29  ;;  %v1263_v29 = vperm.slane %v3598_v14, 4 }
 0xa57   :  { %3176 = vpow2.f32 %v1027_v30 }
 0xa5c   :  { %v3175_v31 = vpop.eup %3174 }
 0xa5d   :  { %v1042_v32 = vsel %vm349_vm9, %v3175_v31, 0.0  ;;  %v3177_v33 = vpop.eup %3176 }
 0xa5e   :  { %1043 = vadd.xlane.f32.xlu1 %v1042_v32  ;;  %v1036_v34 = vsel %vm349_vm9, %v3177_v33, 0.0 }
 0xa66   :  { %1037 = vadd.xlane.f32.xlu1 %v1036_v34 }
 0xa71   :  { %v1041_v35 = vpop.xlane.xlu1 %1040 }
 0xa72   :  { %3178 = vrcp.f32 %v1041_v35  ;;  %v1076_v36 = vpop.f32.mrf.mxu3 }
 0xa73   :  { %2947 = vmatmul.msk.f32.vlgmr.msrb.gmra.mxu1 %vm182_vm8, %v1076_v36 }
 0xa78   :  { %v3179_v37 = vpop.eup %3178 }
 0xa79   :  { %v1051_v38 = vmul.f32 %v3179_v37, %v3173_v22 }
 0xa7b   :  { %2949 = vmatmul.msk.f32.vlgmr.msra.gmra.mxu2 %vm349_vm9, %v1051_v38 }
 0xad1   :  { %v1044_v39 = vpop.xlane.xlu1 %1043 }
 0xad2   :  { %3180 = vrcp.f32 %v1044_v39 }
 0xad8   :  { %v3181_v42 = vpop.eup %3180 }
 0xad9   :  { %v1052_v43 = vmul.f32 %v3181_v42, %v3175_v31  ;;  %v1038_v44 = vpop.xlane.xlu1 %1037 }
 0xada   :  { %3182 = vrcp.f32 %v1038_v44 }
 0xadb   :  { %2950 = vmatmul.msk.f32.vlgmr.msrb.gmra.mxu3 %vm349_vm9, %v1052_v43 }
 0xae0   :  { %v3183_v46 = vpop.eup %3182 }
 0xae1   :  { %v1050_v47 = vmul.f32 %v3183_v46, %v3177_v33  ;;  %v2968_v46 = vld [vmem:[%s4214_s6 + $0x78] sm:$0xff] }
 0xae2   :  { %1342 = vmatpush.msra.mxu1 %v2968_v46 }
 0xae3   :  { %2944 = vmatmul.msk.f32.vlgmr.msra.gmra.mxu0 %vm349_vm9, %v1050_v47  ;;  %v2967_v47 = vld [vmem:[%s4214_s6 + $0x70] sm:$0xff] }
 0xae4   :  { %1343 = vmatpush.msra.mxu1 %v2967_v47 }
 0xaf0   :  { %v1128_v52 = vpop.f32.mrf.mxu1 }
 0xaf1   :  { %v1134_v54 = vadd.f32 %v1128_v52, %v1054_v53  ;;  %v2962_v52 = vld [vmem:[%s4214_s6 + $0x48] sm:$0xff]  ;;  %v2961_v53 = vld [vmem:[%s4214_s6 + $0x40] sm:$0xff] }
 0xafe   :  { %v1156_v48 = vpop.f32.mrf.mxu2 }
 0xaff   :  { %2953 = vmatmul.msk.f32.vlgmr.msrb.gmra.mxu0 %vm182_vm8, %v1156_v48  ;;  %v2966_v48 = vld [vmem:[%s4214_s6 + $0x68] sm:$0xff] }
 0xb00   :  { %1344 = vmatpush.msra.mxu1 %v2966_v48 }
 0xb5e   :  { %v1179_v17 = vpop.f32.mrf.mxu3 }
 0xb5f   :  { %2954 = vmatmul.msk.f32.gmra.mxu0 %vm182_vm8, %v1179_v17  ;;  %v2965_v17 = vld [vmem:[%s4214_s6 + $0x60] sm:$0xff] }
 0xb60   :  { %v1099_v49 = vpop.f32.mrf.mxu0  ;;  %1345 = vmatpush.msra.mxu1 %v2965_v17 }
 0xb61   :  { %2948 = vmatmul.msk.f32.gmra.mxu1 %vm182_vm8, %v1099_v49  ;;  %v2964_v49 = vld [vmem:[%s4214_s6 + $0x58] sm:$0xff] }
 0xb62   :  { %1346 = vmatpush.msra.mxu1 %v2964_v49 }
 0xb64   :  { %1347 = vmatpush.msra.mxu1 %v2963_v51 }
 0xb66   :  { %1348 = vmatpush.msra.mxu1 %v2962_v52  ;;  %v2981_v52 = vld [vmem:[%s4211_s3 + $0x58] sm:$0xff] }
 0xb67   :  { %1514 = vmatpush.msra.mxu2 %v2981_v52 }
 0xb68   :  { %1349 = vmatpush.msra.mxu1 %v2961_v53  ;;  %v2987_v53 = vld [vmem:[%s4210_s2 + $0x118] sm:$0xff] }
 0xb69   :  { %1542 = vmatpush.msrb.mxu3 %v2987_v53 }
 0xb7c   :  { %v1208_v28 = vpop.f32.mrf.mxu0 }
 0xb7d   :  { %v3682_v55 = vadd.f32 %v1208_v28, %v1134_v54  ;;  %v1271_v54 = vperm.slane %v3598_v14, 6 }
 0xb7f   :  { %v1216_v56 = vsel %vm36_vm0, %v3682_v55, 0.0 }
 0xb80   :  { %1217 = vadd.xlane.f32.xlu1 %v1216_v56 }
 0xbdc   :  { %v1211_v60 = vpop.f32.mrf.mxu0 }
 0xbde   :  { %v1131_v58 = vpop.f32.mrf.mxu1 }
 0xbdf   :  { %v1135_v59 = vadd.f32 %v1131_v58, %v1055_v57 }
 0xbe1   :  { %v3687_v61 = vadd.f32 %v1211_v60, %v1135_v59 }
 0xbe3   :  { %v1219_v62 = vsel %vm36_vm0, %v3687_v61, 0.0 }
 0xbe4   :  { %1220 = vadd.xlane.f32.xlu1 %v1219_v62 }
 0xbf3   :  { %v1218_v63 = vpop.xlane.xlu1 %1217 }
 0xbf4   :  { %v1222_v1 = vmul.f32 %v1218_v63, %v3345_v10 }
 0xbf6   :  { %v1224_v3 = vsub.f32 %v3682_v55, %v1222_v1 }
 0xbf8   :  { %v1226_v4 = vmul.f32 %v1224_v3, %v1224_v3 }
 0xbfa   :  { %v1228_v5 = vsel %vm36_vm0, %v1226_v4, 0.0 }
 0xbfb   :  { %1229 = vadd.xlane.f32.xlu2 %v1228_v5 }
 0xc57   :  { %v1221_v6 = vpop.xlane.xlu1 %1220 }
 0xc58   :  { %v1223_v7 = vmul.f32 %v1221_v6, %v3345_v10 }
 0xc5a   :  { %v1225_v8 = vsub.f32 %v3687_v61, %v1223_v7 }
 0xc5c   :  { %v1227_v9 = vmul.f32 %v1225_v8, %v1225_v8 }
 0xc5e   :  { %v1231_v11 = vsel %vm36_vm0, %v1227_v9, 0.0 }
 0xc5f   :  { %1232 = vadd.xlane.f32.xlu0 %v1231_v11 }
 0xc6e   :  { %v1230_v18 = vpop.xlane.xlu2 %1229 }
 0xc6f   :  { %v1234_v19 = vmul.f32 %v1230_v18, %v3345_v10 }
 0xc71   :  { %v1236_v20 = vadd.f32 1e-05, %v1234_v19  ;;  %v2972_v19 = vld [vmem:[%s4215_s7 + $0x10] sm:$0xff] }
 0xc72   :  { %2974 = vmatmul.msk.f32.vlgmr.msra.gmra.mxu3 %vm182_vm8, %v2972_v19 }
 0xc73   :  { %3184 = vrsqrt.f32 %v1236_v20  ;;  %vm1244_vm11 = vweird.f32 %v1236_v20 }
 0xc79   :  { %v3185_v21 = vpop.eup %3184 }
 0xc7a   :  { %v1239_v22 = vmul.f32 %v3185_v21, %v1236_v20  ;;  %vm1245_vm10 = vweird.f32 %v3185_v21  ;;  %v2973_v20 = vld [vmem:[%s4215_s7 + $0x18] sm:$0xff] }
 0xc7b   :  { %vm1246_vm12 = vmor %vm1244_vm11, %vm1245_vm10  ;;  %2975 = vmatmul.msk.f32.gmra.mxu3 %vm182_vm8, %v2973_v20 }
 0xc7c   :  { %v1240_v23 = vmul.f32 %v3185_v21, %v1239_v22  ;;  %v1428_v22 = vld [vmem:[%s4216_s8 + $0x8] sm:$0xff] }
 0xc7e   :  { %v1241_v0 = vmul.f32 0.5, %v1240_v23  ;;  %v3277_v23 = vmov 0  }
 0xc7f   :  { %3131 = vset.pattern.permute.xlu1 %v3277_v23  ;;  %3132 = vset.pattern.permute.xlu2 %v3277_v23 }
 0xc80   :  { %v1242_v24 = vsub.f32 1.5, %v1241_v0  ;;  %1436 = vperm.xlu2 %3132, %v1428_v22   ;;  %3133 = vset.pattern.permute.xlu0 %v3277_v23  ;;  %v3842_v22 = vld [vmem:[%s4209_s1 + $0x10] sm:$0xff] }
 0xc82   :  { %v1243_v2 = vmul.f32 %v3185_v21, %v1242_v24 }
 0xc84   :  { %v1247_v26 = vsel %vm1246_vm12, %v3185_v21, %v1243_v2  ;;  %v1427_v21 = vld [vmem:[%s4216_s8] sm:$0xff] }
 0xc85   :  { %v1258_v27 = vmul.f32 %v1247_v26, %v1224_v3  ;;  %1431 = vperm.xlu1 %3131, %v1427_v21  }
 0xc87   :  { %v1261_v30 = vmul.f32 %v1260_v25, %v1258_v27 }
 0xc89   :  { %v1264_v31 = vadd.f32 %v1263_v29, %v1261_v30  ;;  %v1364_v30 = vld [vmem:[%s4215_s7] sm:$0xff] }
 0xc8b   :  { %2959 = vmatmul.msk.f32.vlgmr.msrb.gmra.mxu2 %vm36_vm0, %v1264_v31  ;;  %v1365_v31 = vld [vmem:[%s4215_s7 + $0x8] sm:$0xff] }
 0xcd2   :  { %v1233_v32 = vpop.xlane.xlu0 %1232 }
 0xcd3   :  { %v1235_v33 = vmul.f32 %v1233_v32, %v3345_v10 }
 0xcd5   :  { %v1237_v34 = vadd.f32 1e-05, %v1235_v33 }
 0xcd7   :  { %3186 = vrsqrt.f32 %v1237_v34  ;;  %vm1254_vm14 = vweird.f32 %v1237_v34 }
 0xcdd   :  { %v3187_v35 = vpop.eup %3186 }
 0xcde   :  { %v1249_v36 = vmul.f32 %v3187_v35, %v1237_v34  ;;  %vm1255_vm13 = vweird.f32 %v3187_v35 }
 0xcdf   :  { %vm1256_vm15 = vmor %vm1254_vm14, %vm1255_vm13 }
 0xce0   :  { %v1250_v37 = vmul.f32 %v3187_v35, %v1249_v36 }
 0xce2   :  { %v1251_v38 = vmul.f32 0.5, %v1250_v37  ;;  %v1437_v37 = vpop.permute.xlu2 %1436 }
 0xce4   :  { %v1252_v39 = vsub.f32 1.5, %v1251_v38 }
 0xce6   :  { %v1253_v40 = vmul.f32 %v3187_v35, %v1252_v39 }
 0xce8   :  { %v1257_v42 = vsel %vm1256_vm15, %v3187_v35, %v1253_v40 }
 0xce9   :  { %v1259_v43 = vmul.f32 %v1257_v42, %v1225_v8 }
 0xceb   :  { %v1262_v44 = vmul.f32 %v1260_v25, %v1259_v43  ;;  %v1359_v25 = vperm.slane %v3598_v14, 5 }
 0xced   :  { %v1265_v45 = vadd.f32 %v1263_v29, %v1262_v44 }
 0xcef   :  { %2960 = vmatmul.msk.f32.gmra.mxu2 %vm36_vm0, %v1265_v45 }
 0xcf7   :  { %v1432_v32 = vpop.permute.xlu1 %1431 }
 0xd0e   :  { %v1295_v28 = vpop.f32.mrf.mxu2 }
 0xd0f   :  { %v1296_v56 = vadd.f32 %v1295_v28, %v1271_v54  ;;  %v2980_v28 = vld [vmem:[%s4211_s3 + $0x50] sm:$0xff] }
 0xd10   :  { %1515 = vmatpush.msra.mxu2 %v2980_v28 }
 0xd11   :  { %v1301_v57 = vmul.f32 %v1296_v56, %v1296_v56 }
 0xd13   :  { %v1303_v58 = vmul.f32 %v1301_v57, %v1296_v56  ;;  %v2992_v57 = vld [vmem:[%s4210_s2 + $0x150] sm:$0xff] }
 0xd15   :  { %v1305_v59 = vmul.f32 0.044715, %v1303_v58  ;;  %v2979_v58 = vld [vmem:[%s4211_s3 + $0x48] sm:$0xff] }
 0xd16   :  { %1516 = vmatpush.msra.mxu2 %v2979_v58 }
 0xd17   :  { %v1307_v60 = vadd.f32 %v1305_v59, %v1296_v56  ;;  %v2985_v59 = vld [vmem:[%s4210_s2 + $0x108] sm:$0xff] }
 0xd19   :  { %v1309_v62 = vmul.f32 0.7978846, %v1307_v60  ;;  %v2991_v60 = vld [vmem:[%s4210_s2 + $0x148] sm:$0xff] }
 0xd1b   :  { %3188 = vtanh.f32 %v1309_v62  ;;  %v2978_v62 = vld [vmem:[%s4211_s3 + $0x40] sm:$0xff] }
 0xd1c   :  { %1517 = vmatpush.msra.mxu2 %v2978_v62 }
 0xd21   :  { %v3189_v63 = vpop.eup %3188 }
 0xd22   :  { %v1313_v1 = vadd.f32 1.0, %v3189_v63  ;;  %v2984_v63 = vld [vmem:[%s4210_s2 + $0x100] sm:$0xff] }
 0xd24   :  { %v1315_v3 = vmul.f32 0.5, %v1313_v1  ;;  %v2990_v1 = vld [vmem:[%s4210_s2 + $0x140] sm:$0xff] }
 0xd26   :  { %v1317_v4 = vmul.f32 %v1315_v3, %v1296_v56  ;;  %v2986_v56 = vld [vmem:[%s4210_s2 + $0x110] sm:$0xff] }
 0xd27   :  { %1543 = vmatpush.msrb.mxu3 %v2986_v56 }
 0xd28   :  { %2969 = vmatmul.msk.f32.vlgmr.msra.gmra.mxu1 %vm666_vm1, %v1317_v4 }
 0xd29   :  { %1544 = vmatpush.msrb.mxu3 %v2985_v59 }
 0xd2b   :  { %1545 = vmatpush.msrb.mxu3 %v2984_v63 }
 0xd72   :  { %v1298_v5 = vpop.f32.mrf.mxu2 }
 0xd73   :  { %v1299_v6 = vadd.f32 %v1298_v5, %v1271_v54  ;;  %v2993_v54 = vld [vmem:[%s4210_s2 + $0x158] sm:$0xff] }
 0xd74   :  { %1570 = vmatpush.msrb.mxu1 %v2993_v54 }
 0xd75   :  { %v1302_v7 = vmul.f32 %v1299_v6, %v1299_v6 }
 0xd76   :  { %1571 = vmatpush.msrb.mxu1 %v2992_v57 }
 0xd77   :  { %v1304_v8 = vmul.f32 %v1302_v7, %v1299_v6  ;;  %v3002_v7 = vld [vmem:[%s4210_s2 + $0x130] sm:$0xff] }
 0xd78   :  { %1572 = vmatpush.msrb.mxu1 %v2991_v60 }
 0xd79   :  { %v1306_v9 = vmul.f32 0.044715, %v1304_v8 }
 0xd7a   :  { %1573 = vmatpush.msrb.mxu1 %v2990_v1 }
 0xd7b   :  { %v1308_v11 = vadd.f32 %v1306_v9, %v1299_v6  ;;  %v3001_v9 = vld [vmem:[%s4210_s2 + $0x128] sm:$0xff] }
 0xd7d   :  { %v1310_v12 = vmul.f32 0.7978846, %v1308_v11 }
 0xd7f   :  { %3190 = vtanh.f32 %v1310_v12  ;;  %v3000_v12 = vld [vmem:[%s4210_s2 + $0x120] sm:$0xff] }
 0xd85   :  { %v3191_v13 = vpop.eup %3190 }
 0xd86   :  { %v1314_v15 = vadd.f32 1.0, %v3191_v13 }
 0xd88   :  { %v1316_v16 = vmul.f32 0.5, %v1314_v15 }
 0xd8a   :  { %v1318_v18 = vmul.f32 %v1316_v16, %v1299_v6  ;;  %v3003_v6 = vld [vmem:[%s4210_s2 + $0x138] sm:$0xff] }
 0xd8b   :  { %1652 = vmatpush.msra.mxu3 %v3003_v6 }
 0xd8c   :  { %2970 = vmatmul.msk.f32.gmra.mxu1 %vm666_vm1, %v1318_v18 }
 0xd8d   :  { %1653 = vmatpush.msra.mxu3 %v3002_v7 }
 0xd8f   :  { %1654 = vmatpush.msra.mxu3 %v3001_v9 }
 0xd91   :  { %1655 = vmatpush.msra.mxu3 %v3000_v12 }
 0xda5   :  { %v1351_v0 = vpop.f32.mrf.mxu1 }
 0xda6   :  { %v1357_v2 = vadd.f32 %v1351_v0, %v3682_v55  ;;  %v1392_v55 = vpop.f32.mrf.mxu3 }
 0xda8   :  { %v1360_v29 = vadd.f32 %v1359_v25, %v1357_v2 }
 0xdae   :  { %v1395_v35 = vpop.f32.mrf.mxu3 }
 0xe09   :  { %v1354_v24 = vpop.f32.mrf.mxu1 }
 0xe0a   :  { %v1358_v26 = vadd.f32 %v1354_v24, %v3687_v61  ;;  %v1485_v24 = vperm.slane %v3842_v22, 0 }
 0xe0c   :  { %v1361_v27 = vadd.f32 %v1359_v25, %v1358_v26 }
 0xe0e   :  { %1418 = vmatpush.msra.mxu0 %v1361_v27  ;;  %v1488_v27 = vperm.slane %v3842_v22, 1 }
 0xe10   :  { %1419 = vmatpush.msra.mxu0 %v1360_v29 }
 0xe11   :  { %2976 = vmatmul.msk.f32.vlgmr.msra.gmra.mxu0 %vm182_vm8, %v1364_v30 }
 0xe19   :  { %2977 = vmatmul.msk.f32.gmra.mxu0 %vm182_vm8, %v1365_v31 }
 0xe8e   :  { %v1421_v14 = vpop.f32.mrf.mxu0 }
 0xe8f   :  { %v1422_v61 = vadd.f32 %v1421_v14, %v1392_v55 }
 0xe91   :  { %v3767_v33 = vadd.f32 %v1432_v32, %v1422_v61 }
 0xe93   :  { %v1441_v34 = vsel %vm36_vm0, %v3767_v33, 0.0 }
 0xe94   :  { %1442 = vadd.xlane.f32.xlu0 %v1441_v34 }
 0xe96   :  { %v1424_v36 = vpop.f32.mrf.mxu0 }
 0xe97   :  { %v1425_v38 = vadd.f32 %v1424_v36, %v1395_v35  ;;  %v3009_v36 = vld [vmem:[%s4210_s2 + $0x178] sm:$0xff] }
 0xe99   :  { %v3771_v39 = vadd.f32 %v1437_v37, %v1425_v38 }
 0xe9b   :  { %v1444_v40 = vsel %vm36_vm0, %v3771_v39, 0.0 }
 0xe9c   :  { %1445 = vadd.xlane.f32.xlu0 %v1444_v40  ;;  %v3008_v40 = vld [vmem:[%s4210_s2 + $0x170] sm:$0xff] }
 0xf07   :  { %v1443_v42 = vpop.xlane.xlu0 %1442 }
 0xf08   :  { %v1447_v43 = vmul.f32 %v1443_v42, %v3345_v10  ;;  %v3007_v42 = vld [vmem:[%s4210_s2 + $0x168] sm:$0xff] }
 0xf0a   :  { %v3777_v44 = vsub.f32 %v3767_v33, %v1447_v43  ;;  %v3006_v43 = vld [vmem:[%s4210_s2 + $0x160] sm:$0xff] }
 0xf0c   :  { %v1451_v45 = vmul.f32 %v3777_v44, %v3777_v44 }
 0xf0e   :  { %v1453_v46 = vsel %vm36_vm0, %v1451_v45, 0.0 }
 0xf0f   :  { %1454 = vadd.xlane.f32.xlu0 %v1453_v46  ;;  %v1446_v47 = vpop.xlane.xlu0 %1445 }
 0xf10   :  { %v1448_v48 = vmul.f32 %v1446_v47, %v3345_v10 }
 0xf12   :  { %v3784_v17 = vsub.f32 %v3771_v39, %v1448_v48 }
 0xf14   :  { %v1452_v49 = vmul.f32 %v3784_v17, %v3784_v17 }
 0xf16   :  { %v1456_v51 = vsel %vm36_vm0, %v1452_v49, 0.0 }
 0xf17   :  { %1457 = vadd.xlane.f32.xlu1 %v1456_v51 }
 0xf82   :  { %v1455_v3 = vpop.xlane.xlu0 %1454 }
 0xf83   :  { %v1459_v4 = vmul.f32 %v1455_v3, %v3345_v10 }
 0xf85   :  { %v1461_v5 = vadd.f32 1e-05, %v1459_v4 }
 0xf87   :  { %3192 = vrsqrt.f32 %v1461_v5  ;;  %vm1469_vm3 = vweird.f32 %v1461_v5 }
 0xf8a   :  { %v1458_v8 = vpop.xlane.xlu1 %1457 }
 0xf8b   :  { %v1460_v11 = vmul.f32 %v1458_v8, %v3345_v10 }
 0xf8d   :  { %v3193_v13 = vpop.eup %3192  ;;  %v1462_v15 = vadd.f32 1e-05, %v1460_v11 }
 0xf8e   :  { %v1464_v16 = vmul.f32 %v3193_v13, %v1461_v5  ;;  %vm1470_vm2 = vweird.f32 %v3193_v13 }
 0xf8f   :  { %3194 = vrsqrt.f32 %v1462_v15  ;;  %vm1471_vm4 = vmor %vm1469_vm3, %vm1470_vm2  ;;  %vm1479_vm6 = vweird.f32 %v1462_v15 }
 0xf90   :  { %v1465_v18 = vmul.f32 %v3193_v13, %v1464_v16 }
 0xf92   :  { %v1466_v19 = vmul.f32 0.5, %v1465_v18 }
 0xf94   :  { %v1467_v20 = vsub.f32 1.5, %v1466_v19 }
 0xf95   :  { %v3195_v21 = vpop.eup %3194 }
 0xf96   :  { %v1468_v23 = vmul.f32 %v3193_v13, %v1467_v20  ;;  %v1474_v0 = vmul.f32 %v3195_v21, %v1462_v15  ;;  %vm1480_vm5 = vweird.f32 %v3195_v21 }
 0xf97   :  { %vm1481_vm7 = vmor %vm1479_vm6, %vm1480_vm5 }
 0xf98   :  { %v1472_v2 = vsel %vm1471_vm4, %v3193_v13, %v1468_v23  ;;  %v1475_v25 = vmul.f32 %v3195_v21, %v1474_v0 }
 0xf99   :  { %v1483_v26 = vmul.f32 %v1472_v2, %v3777_v44 }
 0xf9a   :  { %v1476_v29 = vmul.f32 0.5, %v1475_v25 }
 0xf9b   :  { %v1486_v30 = vmul.f32 %v1485_v24, %v1483_v26 }
 0xf9c   :  { %v1477_v31 = vsub.f32 1.5, %v1476_v29 }
 0xf9d   :  { %v1489_v55 = vadd.f32 %v1488_v27, %v1486_v30 }
 0xf9e   :  { %v1478_v14 = vmul.f32 %v3195_v21, %v1477_v31 }
 0xf9f   :  { %2982 = vmatmul.msk.f32.vlgmr.msra.gmra.mxu2 %vm36_vm0, %v1489_v55  ;;  %2988 = vmatmul.msk.f32.vlgmr.msrb.gmra.mxu3 %vm36_vm0, %v1489_v55 }
 0xfa0   :  { %v1482_v32 = vsel %vm1481_vm7, %v3195_v21, %v1478_v14  ;;  %2994 = vmatmul.msk.f32.vlgmr.msrb.gmra.mxu1 %vm36_vm0, %v1489_v55 }
 0xfa1   :  { %v1484_v61 = vmul.f32 %v1482_v32, %v3784_v17 }
 0xfa3   :  { %v1487_v34 = vmul.f32 %v1485_v24, %v1484_v61 }
 0xfa5   :  { %v1490_v35 = vadd.f32 %v1488_v27, %v1487_v34 }
 0xfa7   :  { %2983 = vmatmul.msk.f32.gmra.mxu2 %vm36_vm0, %v1490_v35  ;;  %2989 = vmatmul.msk.f32.gmra.mxu3 %vm36_vm0, %v1490_v35 }
 0xfa8   :  { %2995 = vmatmul.msk.f32.gmra.mxu1 %vm36_vm0, %v1490_v35 }
 0xfaf   :  { %3004 = vmatmul.msk.f32.vlgmr.msra.gmra.mxu3 %vm36_vm0, %v1489_v55 }
 0xfb7   :  { %3005 = vmatmul.msk.f32.gmra.mxu3 %vm36_vm0, %v1490_v35 }
0x101d   :  { %v1575_v47 = vpop.f32.mrf.mxu1 }
0x1022   :  { %v1519_v37 = vpop.f32.mrf.mxu2  ;;  %v1547_v38 = vpop.f32.mrf.mxu3 }
0x1023   :  { %1691 = vrot.lane.b32.xlu2 %v1519_v37, %s3276_s26  ;;  %2996 = vmatpush.xpose.msk.msrb.mxu0 %vm182_vm8, %v1519_v37 }
0x1025   :  { %v1578_v49 = vpop.f32.mrf.mxu1 }
0x1026   :  { %2997 = vmatmul.msk.f32.vlgmr.msrb.gmra.mxu0 %vm182_vm8, %v1547_v38 }
0x1027   :  { %1680 = vmatpush.msra.mxu0 %v3009_v36 }
0x1029   :  { %1681 = vmatpush.msra.mxu0 %v3008_v40 }
0x102a   :  { %v1522_v44 = vpop.f32.mrf.mxu2  ;;  %v1550_v45 = vpop.f32.mrf.mxu3 }
0x102b   :  { %1682 = vmatpush.msra.mxu0 %v3007_v42  ;;  %1718 = vrot.lane.b32.xlu0 %v1522_v44, %s3276_s26 }
0x102c   :  { %2998 = vmatpush.xpose.msk.msrb.mxu2 %vm182_vm8, %v1522_v44 }
0x102d   :  { %1683 = vmatpush.msra.mxu0 %v3006_v43  ;;  %v3024_v43 = vld [vmem:[%s4212_s4 + $0x50] sm:$0xff] }
0x102e   :  { %3010 = vmatmul.msk.f32.vlgmr.msra.gmra.mxu0 %vm36_vm0, %v1489_v55 }
0x102f   :  { %2999 = vmatmul.msk.f32.vlgmr.msrb.gmra.mxu2 %vm182_vm8, %v1550_v45 }
0x1032   :  { %v1657_v48 = vpop.f32.mrf.mxu3 }
0x1036   :  { %3011 = vmatmul.msk.f32.gmra.mxu0 %vm36_vm0, %v1490_v35  ;;  %v3025_v35 = vld [vmem:[%s4212_s4 + $0x58] sm:$0xff] }
0x103a   :  { %v1660_v51 = vpop.f32.mrf.mxu3 }
0x107d   :  { %v1692_v46 = vpop.permute.xlu2 %1691 }
0x107e   :  { %3012 = vmatpush.xpose.msk.msra.mxu1 %vm182_vm8, %v1692_v46  ;;  %v1791_v46 = vperm.slane %v3842_v22, 2 }
0x1081   :  { %3013 = vmatmul.msk.f32.vlgmr.msra.gmra.mxu1 %vm182_vm8, %v1657_v48  ;;  %v1792_v48 = vadd.f32 %v1791_v46, %v3767_v33 }
0x1082   :  { %1812 = vmatpush.msrb.mxu1 %v1575_v47 }
0x109d   :  { %v1719_v17 = vpop.permute.xlu0 %1718 }
0x109e   :  { %3014 = vmatpush.xpose.msk.msra.mxu2 %vm182_vm8, %v1719_v17 }
0x10a1   :  { %3015 = vmatmul.msk.f32.vlgmr.msra.gmra.mxu2 %vm182_vm8, %v1660_v51 }
0x10a2   :  { %1835 = vmatpush.msrb.mxu2 %v1578_v49 }
0x10a3   :  { %v1604_v52 = vpop.f32.mrf.mxu0 }
0x10a4   :  { %v1633_v53 = vmul.f32 0.25, %v1604_v52  ;;  %1943 = vmatpush.msra.mxu2 %v3025_v35 }
0x10a6   :  { %v1747_v54 = vsel %vm349_vm9, %v1633_v53, -inf  ;;  %1944 = vmatpush.msra.mxu2 %v3024_v43  ;;  %v3038_v43 = vld [vmem:[%s4214_s6 + $0xa0] sm:$0xff] }
0x10a7   :  { %1748 = vmax.xlane.f32.xlu2 %v1747_v54  ;;  %v1793_v54 = vadd.f32 %v1791_v46, %v3771_v39  ;;  %v3054_v39 = vld [vmem:[%s4216_s8 + $0x18] sm:$0xff]  ;;  %v3035_v46 = vld [vmem:[%s4214_s6 + $0x88] sm:$0xff] }
0x10ab   :  { %v1685_v28 = vpop.f32.mrf.mxu0 }
0x10ac   :  { %1892 = vmatpush.msrb.mxu0 %v1685_v28 }
0x10b2   :  { %v1630_v56 = vpop.f32.mrf.mxu2 }
0x10b3   :  { %v1634_v57 = vmul.f32 0.25, %v1630_v56  ;;  %v1688_v58 = vpop.f32.mrf.mxu0 }
0x10b4   :  { %1915 = vmatpush.msra.mxu1 %v1688_v58 }
0x10b5   :  { %v1750_v59 = vsel %vm349_vm9, %v1634_v57, -inf }
0x10b6   :  { %1751 = vmax.xlane.f32.xlu0 %v1750_v59 }
0x10fe   :  { %v1715_v60 = vpop.f32.mrf.mxu1 }
0x10ff   :  { %v1745_v62 = vmul.f32 0.25, %v1715_v60 }
0x1101   :  { %v1753_v63 = vsel %vm349_vm9, %v1745_v62, -inf }
0x1102   :  { %1754 = vmax.xlane.f32.xlu1 %v1753_v63 }
0x111a   :  { %v1749_v1 = vpop.xlane.xlu2 %1748 }
0x111b   :  { %v1759_v3 = vsub.f32 %v1633_v53, %v1749_v1 }
0x111d   :  { %v1763_v4 = vmul.f32 1.442695, %v1759_v3 }
0x111f   :  { %3196 = vpow2.f32 %v1763_v4 }
0x1124   :  { %v1742_v5 = vpop.f32.mrf.mxu2 }
0x1125   :  { %v3197_v6 = vpop.eup %3196  ;;  %v1746_v7 = vmul.f32 0.25, %v1742_v5 }
0x1126   :  { %v1771_v8 = vsel %vm349_vm9, %v3197_v6, 0.0 }
0x1127   :  { %1772 = vadd.xlane.f32.xlu2 %v1771_v8  ;;  %v1756_v9 = vsel %vm349_vm9, %v1746_v7, -inf  ;;  %v3030_v8 = vld [vmem:[%s4213_s5 + $0x50] sm:$0xff] }
0x1128   :  { %1757 = vmax.xlane.f32.xlu1 %v1756_v9  ;;  %v3029_v9 = vld [vmem:[%s4213_s5 + $0x48] sm:$0xff] }
0x1129   :  { %v1752_v11 = vpop.xlane.xlu0 %1751 }
0x112a   :  { %v1760_v12 = vsub.f32 %v1634_v57, %v1752_v11  ;;  %v3028_v11 = vld [vmem:[%s4213_s5 + $0x40] sm:$0xff] }
0x112c   :  { %v1765_v13 = vmul.f32 1.442695, %v1760_v12 }
0x112e   :  { %3198 = vpow2.f32 %v1765_v13 }
0x1134   :  { %v3199_v15 = vpop.eup %3198 }
0x1135   :  { %v1774_v16 = vsel %vm349_vm9, %v3199_v15, 0.0 }
0x1136   :  { %1775 = vadd.xlane.f32.xlu1 %v1774_v16 }
0x1175   :  { %v1755_v18 = vpop.xlane.xlu1 %1754 }
0x1176   :  { %v1761_v19 = vsub.f32 %v1745_v62, %v1755_v18 }
0x1178   :  { %v1767_v20 = vmul.f32 1.442695, %v1761_v19 }
0x117a   :  { %3200 = vpow2.f32 %v1767_v20 }
0x1180   :  { %v3201_v21 = vpop.eup %3200 }
0x1181   :  { %v1777_v23 = vsel %vm349_vm9, %v3201_v21, 0.0 }
0x1182   :  { %1778 = vadd.xlane.f32.xlu2 %v1777_v23 }
0x119a   :  { %v1773_v0 = vpop.xlane.xlu2 %1772 }
0x119b   :  { %3202 = vrcp.f32 %v1773_v0  ;;  %v1758_v24 = vpop.xlane.xlu1 %1757  ;;  %v1998_v0 = vperm.slane %v3842_v22, 3 }
0x119c   :  { %v1762_v2 = vsub.f32 %v1746_v7, %v1758_v24  ;;  %v3031_v7 = vld [vmem:[%s4213_s5 + $0x58] sm:$0xff] }
0x119d   :  { %2028 = vmatpush.msra.mxu0 %v3031_v7 }
0x119e   :  { %v1769_v25 = vmul.f32 1.442695, %v1762_v2 }
0x119f   :  { %2029 = vmatpush.msra.mxu0 %v3030_v8 }
0x11a0   :  { %3204 = vpow2.f32 %v1769_v25  ;;  %v2001_v25 = vperm.slane %v3842_v22, 4 }
0x11a1   :  { %v3203_v26 = vpop.eup %3202  ;;  %2030 = vmatpush.msra.mxu0 %v3029_v9 }
0x11a2   :  { %v1787_v27 = vmul.f32 %v3203_v26, %v3197_v6 }
0x11a3   :  { %2031 = vmatpush.msra.mxu0 %v3028_v11  ;;  %v3047_v11 = vld [vmem:[%s4215_s7 + $0x30] sm:$0xff] }
0x11a4   :  { %3016 = vmatmul.msk.f32.vlgmr.msrb.gmra.mxu1 %vm349_vm9, %v1787_v27 }
0x11a5   :  { %2128 = vmatpush.msrb.mxu1 %v3552_v50  ;;  %v3019_v50 = vld [vmem:[%s4212_s4 + $0x48] sm:$0xff] }
0x11a6   :  { %v3205_v29 = vpop.eup %3204  ;;  %1863 = vmatpush.msrb.mxu3 %v3019_v50 }
0x11a7   :  { %2129 = vmatpush.msrb.mxu1 %v3543_v41  ;;  %v1780_v30 = vsel %vm349_vm9, %v3205_v29, 0.0  ;;  %v3018_v41 = vld [vmem:[%s4212_s4 + $0x40] sm:$0xff] }
0x11a8   :  { %1781 = vadd.xlane.f32.xlu1 %v1780_v30  ;;  %1864 = vmatpush.msrb.mxu3 %v3018_v41 }
0x11a9   :  { %v1776_v31 = vpop.xlane.xlu1 %1775 }
0x11aa   :  { %3206 = vrcp.f32 %v1776_v31 }
0x11b0   :  { %v3207_v55 = vpop.eup %3206 }
0x11b1   :  { %v1788_v14 = vmul.f32 %v3207_v55, %v3199_v15 }
0x11b3   :  { %3017 = vmatmul.msk.f32.vlgmr.msrb.gmra.mxu2 %vm349_vm9, %v1788_v14 }
0x11f5   :  { %v1779_v32 = vpop.xlane.xlu2 %1778 }
0x11f6   :  { %3208 = vrcp.f32 %v1779_v32 }
0x11fc   :  { %v3209_v61 = vpop.eup %3208 }
0x11fd   :  { %v1789_v34 = vmul.f32 %v3209_v61, %v3201_v21 }
0x11ff   :  { %3022 = vmatmul.msk.f32.vlgmr.msrb.gmra.mxu0 %vm349_vm9, %v1789_v34 }
0x121b   :  { %v1782_v36 = vpop.xlane.xlu1 %1781 }
0x121c   :  { %3210 = vrcp.f32 %v1782_v36 }
0x1221   :  { %v1814_v37 = vpop.f32.mrf.mxu1 }
0x1222   :  { %v3211_v38 = vpop.eup %3210  ;;  %3020 = vmatmul.msk.f32.vlgmr.msrb.gmra.mxu3 %vm182_vm8, %v1814_v37 }
0x1223   :  { %v1790_v40 = vmul.f32 %v3211_v38, %v3205_v29  ;;  %v3041_v38 = vld [vmem:[%s4214_s6 + $0xb8] sm:$0xff] }
0x1224   :  { %2080 = vmatpush.msra.mxu3 %v3041_v38 }
0x1225   :  { %3023 = vmatmul.msk.f32.vlgmr.msra.gmra.mxu1 %vm349_vm9, %v1790_v40  ;;  %v3040_v40 = vld [vmem:[%s4214_s6 + $0xb0] sm:$0xff] }
0x1226   :  { %2081 = vmatpush.msra.mxu3 %v3040_v40 }
0x122d   :  { %3049 = vmatmul.msk.f32.vlgmr.msrb.gmra.mxu1 %vm182_vm8, %v3047_v11 }
0x1236   :  { %v1837_v42 = vpop.f32.mrf.mxu2 }
0x1237   :  { %3021 = vmatmul.msk.f32.gmra.mxu3 %vm182_vm8, %v1837_v42  ;;  %v3039_v42 = vld [vmem:[%s4214_s6 + $0xa8] sm:$0xff] }
0x1238   :  { %2082 = vmatpush.msra.mxu3 %v3039_v42  ;;  %v3058_v42 = vld [vmem:[%s4211_s3 + $0x78] sm:$0xff] }
0x1239   :  { %2254 = vmatpush.msrb.mxu0 %v3058_v42 }
0x123a   :  { %2083 = vmatpush.msra.mxu3 %v3038_v43  ;;  %v3064_v43 = vld [vmem:[%s4210_s2 + $0x198] sm:$0xff] }
0x123b   :  { %2282 = vmatpush.msra.mxu1 %v3064_v43 }
0x127c   :  { %v1894_v44 = vpop.f32.mrf.mxu0 }
0x127d   :  { %3026 = vmatmul.msk.f32.vlgmr.msra.gmra.mxu2 %vm182_vm8, %v1894_v44  ;;  %v3037_v44 = vld [vmem:[%s4214_s6 + $0x98] sm:$0xff] }
0x127e   :  { %2084 = vmatpush.msra.mxu3 %v3037_v44  ;;  %v3070_v44 = vld [vmem:[%s4210_s2 + $0x1d8] sm:$0xff] }
0x12a2   :  { %v1917_v45 = vpop.f32.mrf.mxu1 }
0x12a3   :  { %3027 = vmatmul.msk.f32.gmra.mxu2 %vm182_vm8, %v1917_v45  ;;  %v3036_v45 = vld [vmem:[%s4214_s6 + $0x90] sm:$0xff] }
0x12a4   :  { %2085 = vmatpush.msra.mxu3 %v3036_v45  ;;  %v3057_v45 = vld [vmem:[%s4211_s3 + $0x70] sm:$0xff] }
0x12a5   :  { %v1866_v47 = vpop.f32.mrf.mxu3  ;;  %2255 = vmatpush.msrb.mxu0 %v3057_v45 }
0x12a6   :  { %v1872_v17 = vadd.f32 %v1866_v47, %v1792_v48  ;;  %2086 = vmatpush.msra.mxu3 %v3035_v46  ;;  %v3034_v47 = vld [vmem:[%s4214_s6 + $0x80] sm:$0xff]  ;;  %v2009_v48 = vperm.slane %v3842_v22, 6  ;;  %v3063_v46 = vld [vmem:[%s4210_s2 + $0x190] sm:$0xff] }
0x12a7   :  { %2283 = vmatpush.msra.mxu1 %v3063_v46 }
0x12a8   :  { %2087 = vmatpush.msra.mxu3 %v3034_v47  ;;  %v3069_v47 = vld [vmem:[%s4210_s2 + $0x1d0] sm:$0xff] }
0x12aa   :  { %2310 = vmatpush.msrb.mxu3 %v3070_v44 }
0x12ac   :  { %2311 = vmatpush.msrb.mxu3 %v3069_v47 }
0x12ba   :  { %v1869_v53 = vpop.f32.mrf.mxu3 }
0x12bb   :  { %v1873_v28 = vadd.f32 %v1869_v53, %v1793_v54 }
0x1300   :  { %v1946_v49 = vpop.f32.mrf.mxu2 }
0x1301   :  { %v3912_v51 = vadd.f32 %v1946_v49, %v1872_v17 }
0x1303   :  { %v1954_v52 = vsel %vm36_vm0, %v3912_v51, 0.0 }
0x1304   :  { %1955 = vadd.xlane.f32.xlu2 %v1954_v52 }
0x1326   :  { %v1949_v56 = vpop.f32.mrf.mxu2 }
0x1327   :  { %v3917_v57 = vadd.f32 %v1949_v56, %v1873_v28 }
0x1329   :  { %v1957_v58 = vsel %vm36_vm0, %v3917_v57, 0.0 }
0x132a   :  { %1958 = vadd.xlane.f32.xlu0 %v1957_v58 }
0x1377   :  { %v1956_v33 = vpop.xlane.xlu2 %1955 }
0x1378   :  { %v1960_v59 = vmul.f32 %v1956_v33, %v3345_v10 }
0x137a   :  { %v1962_v60 = vsub.f32 %v3912_v51, %v1960_v59 }
0x137c   :  { %v1964_v62 = vmul.f32 %v1962_v60, %v1962_v60 }
0x137e   :  { %v1966_v63 = vsel %vm36_vm0, %v1964_v62, 0.0 }
0x137f   :  { %1967 = vadd.xlane.f32.xlu1 %v1966_v63 }
0x1398   :  { %2176 = vperm.xlu1 %3131, %v3054_v39  }
0x139d   :  { %v1959_v1 = vpop.xlane.xlu0 %1958 }
0x139e   :  { %v1961_v3 = vmul.f32 %v1959_v1, %v3345_v10 }
0x13a0   :  { %v1963_v4 = vsub.f32 %v3917_v57, %v1961_v3 }
0x13a2   :  { %v1965_v5 = vmul.f32 %v1963_v4, %v1963_v4 }
0x13a4   :  { %v1969_v6 = vsel %vm36_vm0, %v1965_v5, 0.0 }
0x13a5   :  { %1970 = vadd.xlane.f32.xlu2 %v1969_v6 }
0x13f2   :  { %v1968_v12 = vpop.xlane.xlu1 %1967 }
0x13f3   :  { %v1972_v13 = vmul.f32 %v1968_v12, %v3345_v10  ;;  %v3048_v12 = vld [vmem:[%s4215_s7 + $0x38] sm:$0xff] }
0x13f4   :  { %3050 = vmatmul.msk.f32.gmra.mxu1 %vm182_vm8, %v3048_v12 }
0x13f5   :  { %v1974_v15 = vadd.f32 1e-05, %v1972_v13  ;;  %v3053_v13 = vld [vmem:[%s4216_s8 + $0x10] sm:$0xff]  ;;  %s2848_s8 = sshll.u32 %s4217_s9, 4  ;;  %s2849_s8 = int_to_ptr.hbm [resolvable:$true] %s2848_s8 }
0x13f6   :  { %2171 = vperm.xlu0 %3133, %v3053_v13  }
0x13f7   :  { %3212 = vrsqrt.f32 %v1974_v15  ;;  %vm1982_vm11 = vweird.f32 %v1974_v15 }
0x13fd   :  { %v3213_v16 = vpop.eup %3212 }
0x13fe   :  { %v1977_v18 = vmul.f32 %v3213_v16, %v1974_v15  ;;  %vm1983_vm10 = vweird.f32 %v3213_v16 }
0x13ff   :  { %vm1984_vm12 = vmor %vm1982_vm11, %vm1983_vm10 }
0x1400   :  { %v1978_v19 = vmul.f32 %v3213_v16, %v1977_v18 }
0x1402   :  { %v1979_v20 = vmul.f32 0.5, %v1978_v19  ;;  %v2097_v19 = vperm.slane %v3842_v22, 5 }
0x1404   :  { %v1980_v21 = vsub.f32 1.5, %v1979_v20 }
0x1406   :  { %v1981_v23 = vmul.f32 %v3213_v16, %v1980_v21 }
0x1408   :  { %v1985_v24 = vsel %vm1984_vm12, %v3213_v16, %v1981_v23 }
0x1409   :  { %v1996_v2 = vmul.f32 %v1985_v24, %v1962_v60  ;;  %v3046_v24 = vld [vmem:[%s4215_s7 + $0x28] sm:$0xff] }
0x140b   :  { %v1999_v26 = vmul.f32 %v1998_v0, %v1996_v2 }
0x140d   :  { %v2002_v27 = vadd.f32 %v2001_v25, %v1999_v26 }
0x140f   :  { %3032 = vmatmul.msk.f32.vlgmr.msra.gmra.mxu0 %vm36_vm0, %v2002_v27 }
0x1418   :  { %v1971_v29 = vpop.xlane.xlu2 %1970 }
0x1419   :  { %v1973_v30 = vmul.f32 %v1971_v29, %v3345_v10 }
0x141b   :  { %v1975_v31 = vadd.f32 1e-05, %v1973_v30 }
0x141d   :  { %3214 = vrsqrt.f32 %v1975_v31  ;;  %vm1992_vm14 = vweird.f32 %v1975_v31 }
0x1423   :  { %v3215_v55 = vpop.eup %3214 }
0x1424   :  { %v1987_v14 = vmul.f32 %v3215_v55, %v1975_v31  ;;  %vm1993_vm13 = vweird.f32 %v3215_v55  ;;  %v2177_v31 = vpop.permute.xlu1 %2176 }
0x1425   :  { %vm1994_vm15 = vmor %vm1992_vm14, %vm1993_vm13 }
0x1426   :  { %v1988_v32 = vmul.f32 %v3215_v55, %v1987_v14 }
0x1428   :  { %v1989_v61 = vmul.f32 0.5, %v1988_v32 }
0x142a   :  { %v1990_v34 = vsub.f32 1.5, %v1989_v61 }
0x142c   :  { %v1991_v50 = vmul.f32 %v3215_v55, %v1990_v34 }
0x142e   :  { %v1995_v41 = vsel %vm1994_vm15, %v3215_v55, %v1991_v50 }
0x142f   :  { %v1997_v35 = vmul.f32 %v1995_v41, %v1963_v4 }
0x1431   :  { %v2000_v36 = vmul.f32 %v1998_v0, %v1997_v35  ;;  %v3045_v0 = vld [vmem:[%s4215_s7 + $0x20] sm:$0xff] }
0x1433   :  { %v2003_v37 = vadd.f32 %v2001_v25, %v2000_v36 }
0x1435   :  { %3033 = vmatmul.msk.f32.gmra.mxu0 %vm36_vm0, %v2003_v37 }
0x1468   :  { %v2172_v2 = vpop.permute.xlu0 %2171 }
0x148c   :  { %v2033_v17 = vpop.f32.mrf.mxu0 }
0x148d   :  { %v2034_v49 = vadd.f32 %v2033_v17, %v2009_v48  ;;  %v3062_v17 = vld [vmem:[%s4210_s2 + $0x188] sm:$0xff] }
0x148e   :  { %2284 = vmatpush.msra.mxu1 %v3062_v17 }
0x148f   :  { %v2039_v52 = vmul.f32 %v2034_v49, %v2034_v49 }
0x1491   :  { %v2041_v53 = vmul.f32 %v2039_v52, %v2034_v49  ;;  %v3055_v52 = vld [vmem:[%s4211_s3 + $0x60] sm:$0xff] }
0x1493   :  { %v2043_v54 = vmul.f32 0.044715, %v2041_v53  ;;  %v3061_v53 = vld [vmem:[%s4210_s2 + $0x180] sm:$0xff] }
0x1494   :  { %2285 = vmatpush.msra.mxu1 %v3061_v53 }
0x1495   :  { %v2045_v28 = vadd.f32 %v2043_v54, %v2034_v49  ;;  %v3067_v54 = vld [vmem:[%s4210_s2 + $0x1c0] sm:$0xff] }
0x1497   :  { %v2047_v56 = vmul.f32 0.7978846, %v2045_v28 }
0x1499   :  { %3216 = vtanh.f32 %v2047_v56 }
0x149f   :  { %v3217_v58 = vpop.eup %3216 }
0x14a0   :  { %v2051_v33 = vadd.f32 1.0, %v3217_v58 }
0x14a2   :  { %v2053_v59 = vmul.f32 0.5, %v2051_v33  ;;  %v3080_v33 = vld [vmem:[%s4210_s2 + $0x1b8] sm:$0xff] }
0x14a3   :  { %2392 = vmatpush.msrb.mxu1 %v3080_v33 }
0x14a4   :  { %v2055_v60 = vmul.f32 %v2053_v59, %v2034_v49  ;;  %v3068_v49 = vld [vmem:[%s4210_s2 + $0x1c8] sm:$0xff]  ;;  %v3079_v59 = vld [vmem:[%s4210_s2 + $0x1b0] sm:$0xff] }
0x14a5   :  { %2312 = vmatpush.msrb.mxu3 %v3068_v49  ;;  %2393 = vmatpush.msrb.mxu1 %v3079_v59 }
0x14a6   :  { %3042 = vmatmul.msk.f32.vlgmr.msra.gmra.mxu3 %vm666_vm1, %v2055_v60 }
0x14a7   :  { %2313 = vmatpush.msrb.mxu3 %v3067_v54 }
0x14b2   :  { %v2036_v62 = vpop.f32.mrf.mxu0 }
0x14b3   :  { %v2037_v63 = vadd.f32 %v2036_v62, %v2009_v48  ;;  %v3056_v48 = vld [vmem:[%s4211_s3 + $0x68] sm:$0xff] }
0x14b4   :  { %2256 = vmatpush.msrb.mxu0 %v3056_v48  ;;  %v3078_v62 = vld [vmem:[%s4210_s2 + $0x1a8] sm:$0xff] }
0x14b5   :  { %v2040_v39 = vmul.f32 %v2037_v63, %v2037_v63  ;;  %2394 = vmatpush.msrb.mxu1 %v3078_v62 }
0x14b6   :  { %2257 = vmatpush.msrb.mxu0 %v3055_v52 }
0x14b7   :  { %v2042_v1 = vmul.f32 %v2040_v39, %v2037_v63  ;;  %v3077_v39 = vld [vmem:[%s4210_s2 + $0x1a0] sm:$0xff] }
0x14b8   :  { %2395 = vmatpush.msrb.mxu1 %v3077_v39 }
0x14b9   :  { %v2044_v3 = vmul.f32 0.044715, %v2042_v1 }
0x14bb   :  { %v2046_v4 = vadd.f32 %v2044_v3, %v2037_v63 }
0x14bd   :  { %v2048_v5 = vmul.f32 0.7978846, %v2046_v4 }
0x14bf   :  { %3218 = vtanh.f32 %v2048_v5 }
0x14c5   :  { %v3219_v6 = vpop.eup %3218 }
0x14c6   :  { %v2052_v7 = vadd.f32 1.0, %v3219_v6 }
0x14c8   :  { %v2054_v8 = vmul.f32 0.5, %v2052_v7 }
0x14ca   :  { %v2056_v9 = vmul.f32 %v2054_v8, %v2037_v63 }
0x14cc   :  { %3043 = vmatmul.msk.f32.gmra.mxu3 %vm666_vm1, %v2056_v9  ;;  %v4072_v9 = vld [vmem:[%s4209_s1 + $0x18] sm:$0xff] }
0x14cd   :  { %v2225_v13 = vperm.slane %v4072_v9, 0 }
0x1529   :  { %v2089_v15 = vpop.f32.mrf.mxu3 }
0x152a   :  { %v2095_v18 = vadd.f32 %v2089_v15, %v3912_v51  ;;  %v2131_v51 = vpop.f32.mrf.mxu1 }
0x152c   :  { %v2098_v23 = vadd.f32 %v2097_v19, %v2095_v18 }
0x1532   :  { %v2134_v27 = vpop.f32.mrf.mxu1 }
0x154f   :  { %v2092_v16 = vpop.f32.mrf.mxu3 }
0x1550   :  { %v2096_v20 = vadd.f32 %v2092_v16, %v3917_v57 }
0x1552   :  { %v2099_v21 = vadd.f32 %v2097_v19, %v2096_v20  ;;  %v2228_v19 = vperm.slane %v4072_v9, 1 }
0x1554   :  { %2157 = vmatpush.msrb.mxu2 %v2099_v21 }
0x1556   :  { %2158 = vmatpush.msrb.mxu2 %v2098_v23 }
0x1557   :  { %3051 = vmatmul.msk.f32.vlgmr.msrb.gmra.mxu2 %vm182_vm8, %v3045_v0 }
0x155f   :  { %3052 = vmatmul.msk.f32.gmra.mxu2 %vm182_vm8, %v3046_v24 }
0x15da   :  { %v2160_v22 = vpop.f32.mrf.mxu2 }
0x15db   :  { %v2161_v57 = vadd.f32 %v2160_v22, %v2131_v51 }
0x15dd   :  { %v3997_v25 = vadd.f32 %v2172_v2, %v2161_v57 }
0x15df   :  { %v2181_v26 = vsel %vm36_vm0, %v3997_v25, 0.0 }
0x15e0   :  { %2182 = vadd.xlane.f32.xlu2 %v2181_v26  ;;  %v3086_v26 = vld [vmem:[%s4210_s2 + $0x1f8] sm:$0xff] }
0x15e2   :  { %v2163_v29 = vpop.f32.mrf.mxu2 }
0x15e3   :  { %v2164_v30 = vadd.f32 %v2163_v29, %v2134_v27 }
0x15e5   :  { %v4001_v55 = vadd.f32 %v2177_v31, %v2164_v30  ;;  %v3085_v30 = vld [vmem:[%s4210_s2 + $0x1f0] sm:$0xff]  ;;  %v3084_v31 = vld [vmem:[%s4210_s2 + $0x1e8] sm:$0xff] }
0x15e7   :  { %v2184_v14 = vsel %vm36_vm0, %v4001_v55, 0.0 }
0x15e8   :  { %2185 = vadd.xlane.f32.xlu2 %v2184_v14  ;;  %v3083_v14 = vld [vmem:[%s4210_s2 + $0x1e0] sm:$0xff] }
0x1653   :  { %v2183_v32 = vpop.xlane.xlu2 %2182 }
0x1654   :  { %v2187_v61 = vmul.f32 %v2183_v32, %v3345_v10 }
0x1656   :  { %v4007_v34 = vsub.f32 %v3997_v25, %v2187_v61 }
0x1658   :  { %v2191_v50 = vmul.f32 %v4007_v34, %v4007_v34 }
0x165a   :  { %v2193_v41 = vsel %vm36_vm0, %v2191_v50, 0.0 }
0x165b   :  { %2194 = vadd.xlane.f32.xlu2 %v2193_v41  ;;  %v2186_v35 = vpop.xlane.xlu2 %2185 }
0x165c   :  { %v2188_v36 = vmul.f32 %v2186_v35, %v3345_v10 }
0x165e   :  { %v4014_v37 = vsub.f32 %v4001_v55, %v2188_v36 }
0x1660   :  { %v2192_v38 = vmul.f32 %v4014_v37, %v4014_v37 }
0x1662   :  { %v2196_v40 = vsel %vm36_vm0, %v2192_v38, 0.0 }
0x1663   :  { %2197 = vadd.xlane.f32.xlu2 %v2196_v40 }
0x16ce   :  { %v2195_v28 = vpop.xlane.xlu2 %2194 }
0x16cf   :  { %v2199_v56 = vmul.f32 %v2195_v28, %v3345_v10 }
0x16d1   :  { %v2201_v58 = vadd.f32 1e-05, %v2199_v56 }
0x16d3   :  { %3220 = vrsqrt.f32 %v2201_v58  ;;  %vm2209_vm3 = vweird.f32 %v2201_v58 }
0x16d6   :  { %v2198_v60 = vpop.xlane.xlu2 %2197 }
0x16d7   :  { %v2200_v63 = vmul.f32 %v2198_v60, %v3345_v10 }
0x16d9   :  { %v3221_v1 = vpop.eup %3220  ;;  %v2202_v3 = vadd.f32 1e-05, %v2200_v63 }
0x16da   :  { %v2204_v4 = vmul.f32 %v3221_v1, %v2201_v58  ;;  %vm2210_vm2 = vweird.f32 %v3221_v1 }
0x16db   :  { %3222 = vrsqrt.f32 %v2202_v3  ;;  %vm2211_vm4 = vmor %vm2209_vm3, %vm2210_vm2  ;;  %vm2219_vm6 = vweird.f32 %v2202_v3 }
0x16dc   :  { %v2205_v5 = vmul.f32 %v3221_v1, %v2204_v4 }
0x16de   :  { %v2206_v6 = vmul.f32 0.5, %v2205_v5 }
0x16e0   :  { %v2207_v7 = vsub.f32 1.5, %v2206_v6 }
0x16e1   :  { %v3223_v8 = vpop.eup %3222 }
0x16e2   :  { %v2208_v11 = vmul.f32 %v3221_v1, %v2207_v7  ;;  %v2214_v12 = vmul.f32 %v3223_v8, %v2202_v3  ;;  %vm2220_vm5 = vweird.f32 %v3223_v8 }
0x16e3   :  { %vm2221_vm7 = vmor %vm2219_vm6, %vm2220_vm5 }
0x16e4   :  { %v2212_v15 = vsel %vm2211_vm4, %v3221_v1, %v2208_v11  ;;  %v2215_v16 = vmul.f32 %v3223_v8, %v2214_v12 }
0x16e5   :  { %v2223_v18 = vmul.f32 %v2212_v15, %v4007_v34 }
0x16e6   :  { %v2216_v20 = vmul.f32 0.5, %v2215_v16 }
0x16e7   :  { %v2226_v21 = vmul.f32 %v2225_v13, %v2223_v18 }
0x16e8   :  { %v2217_v23 = vsub.f32 1.5, %v2216_v20 }
0x16e9   :  { %v2229_v0 = vadd.f32 %v2228_v19, %v2226_v21 }
0x16ea   :  { %v2218_v24 = vmul.f32 %v3223_v8, %v2217_v23 }
0x16eb   :  { %3059 = vmatmul.msk.f32.vlgmr.msrb.gmra.mxu0 %vm36_vm0, %v2229_v0  ;;  %3065 = vmatmul.msk.f32.vlgmr.msra.gmra.mxu1 %vm36_vm0, %v2229_v0 }
0x16ec   :  { %v2222_v51 = vsel %vm2221_vm7, %v3223_v8, %v2218_v24  ;;  %3071 = vmatmul.msk.f32.vlgmr.msrb.gmra.mxu3 %vm36_vm0, %v2229_v0  ;;  %v3095_v24 = vld [vmem:[%s4212_s4 + $0x60] sm:$0xff] }
0x16ed   :  { %v2224_v22 = vmul.f32 %v2222_v51, %v4014_v37 }
0x16ef   :  { %v2227_v2 = vmul.f32 %v2225_v13, %v2224_v22 }
0x16f1   :  { %v2230_v57 = vadd.f32 %v2228_v19, %v2227_v2 }
0x16f3   :  { %3060 = vmatmul.msk.f32.gmra.mxu0 %vm36_vm0, %v2230_v57  ;;  %3066 = vmatmul.msk.f32.gmra.mxu1 %vm36_vm0, %v2230_v57 }
0x16f4   :  { %3072 = vmatmul.msk.f32.gmra.mxu3 %vm36_vm0, %v2230_v57 }
0x16fb   :  { %3081 = vmatmul.msk.f32.vlgmr.msrb.gmra.mxu1 %vm36_vm0, %v2229_v0 }
0x1703   :  { %3082 = vmatmul.msk.f32.gmra.mxu1 %vm36_vm0, %v2230_v57 }
0x1768   :  { %v2259_v27 = vpop.f32.mrf.mxu0  ;;  %v2287_v29 = vpop.f32.mrf.mxu1 }
0x1769   :  { %2431 = vrot.lane.b32.xlu1 %v2259_v27, %s3276_s26  ;;  %3073 = vmatpush.xpose.msk.msra.mxu2 %vm182_vm8, %v2259_v27 }
0x176c   :  { %3074 = vmatmul.msk.f32.vlgmr.msra.gmra.mxu2 %vm182_vm8, %v2287_v29 }
0x176d   :  { %2420 = vmatpush.msrb.mxu2 %v3086_v26 }
0x176f   :  { %2421 = vmatpush.msrb.mxu2 %v3085_v30  ;;  %v2315_v34 = vpop.f32.mrf.mxu3  ;;  %v3102_v30 = vld [vmem:[%s4212_s4 + $0x78] sm:$0xff] }
0x1770   :  { %v2262_v32 = vpop.f32.mrf.mxu0  ;;  %v2290_v61 = vpop.f32.mrf.mxu1 }
0x1771   :  { %2422 = vmatpush.msrb.mxu2 %v3084_v31  ;;  %2458 = vrot.lane.b32.xlu2 %v2262_v32, %s3276_s26  ;;  %v3101_v31 = vld [vmem:[%s4212_s4 + $0x70] sm:$0xff] }
0x1772   :  { %3075 = vmatpush.xpose.msk.msra.mxu0 %vm182_vm8, %v2262_v32 }
0x1773   :  { %2423 = vmatpush.msrb.mxu2 %v3083_v14 }
0x1774   :  { %3087 = vmatmul.msk.f32.vlgmr.msrb.gmra.mxu2 %vm36_vm0, %v2229_v0  ;;  %v3096_v0 = vld [vmem:[%s4212_s4 + $0x68] sm:$0xff]  ;;  %s3280_s4 = smov 8  }
0x1775   :  { %3076 = vmatmul.msk.f32.vlgmr.msra.gmra.mxu0 %vm182_vm8, %v2290_v61  ;;  %2603 = vmatpush.msra.mxu1 %v3096_v0 }
0x1777   :  { %v2318_v35 = vpop.f32.mrf.mxu3  ;;  %2604 = vmatpush.msra.mxu1 %v3095_v24 }
0x1778   :  { %v2397_v50 = vpop.f32.mrf.mxu1 }
0x177c   :  { %3088 = vmatmul.msk.f32.gmra.mxu2 %vm36_vm0, %v2230_v57 }
0x1780   :  { %v2400_v36 = vpop.f32.mrf.mxu1 }
0x17cb   :  { %v2459_v41 = vpop.permute.xlu2 %2458 }
0x17cc   :  { %3091 = vmatpush.xpose.msk.msrb.mxu0 %vm182_vm8, %v2459_v41 }
0x17cf   :  { %3092 = vmatmul.msk.f32.vlgmr.msrb.gmra.mxu0 %vm182_vm8, %v2400_v36 }
0x17d0   :  { %2575 = vmatpush.msra.mxu0 %v2318_v35 }
0x17d2   :  { %2683 = vmatpush.msrb.mxu0 %v3102_v30  ;;  %v3115_v30 = vld [vmem:[%s4214_s6 + $0xe0] sm:$0xff] }
0x17d4   :  { %2684 = vmatpush.msrb.mxu0 %v3101_v31  ;;  %v3114_v31 = vld [vmem:[%s4214_s6 + $0xd8] sm:$0xff] }
0x17db   :  { %v2432_v37 = vpop.permute.xlu1 %2431 }
0x17dc   :  { %3089 = vmatpush.xpose.msk.msra.mxu3 %vm182_vm8, %v2432_v37 }
0x17df   :  { %3090 = vmatmul.msk.f32.vlgmr.msra.gmra.mxu3 %vm182_vm8, %v2397_v50 }
0x17e0   :  { %2552 = vmatpush.msrb.mxu3 %v2315_v34  ;;  %v2531_v34 = vperm.slane %v4072_v9, 2 }
0x17e2   :  { %v2532_v41 = vadd.f32 %v2531_v34, %v3997_v25 }
0x17ef   :  { %v2344_v38 = vpop.f32.mrf.mxu2 }
0x17f0   :  { %v2373_v40 = vmul.f32 0.25, %v2344_v38 }
0x17f2   :  { %v2487_v42 = vsel %vm349_vm9, %v2373_v40, -inf  ;;  %v2370_v43 = vpop.f32.mrf.mxu0 }
0x17f3   :  { %2488 = vmax.xlane.f32.xlu0 %v2487_v42  ;;  %v2374_v44 = vmul.f32 0.25, %v2370_v43  ;;  %v2533_v42 = vadd.f32 %v2531_v34, %v4001_v55  ;;  %v2749_v34 = vperm.slane %v4072_v9, 6 }
0x17f5   :  { %v2490_v46 = vsel %vm349_vm9, %v2374_v44, -inf }
0x17f7   :  { %v2425_v45 = vpop.f32.mrf.mxu2 }
0x17f8   :  { %2632 = vmatpush.msra.mxu2 %v2425_v45 }
0x17fb   :  { %2491 = vmax.xlane.f32.xlu0 %v2490_v46 }
0x17ff   :  { %v2428_v47 = vpop.f32.mrf.mxu2 }
0x1800   :  { %2655 = vmatpush.msra.mxu3 %v2428_v47 }
0x184c   :  { %v2482_v48 = vpop.f32.mrf.mxu0 }
0x184d   :  { %v2486_v17 = vmul.f32 0.25, %v2482_v48 }
0x184f   :  { %v2496_v49 = vsel %vm349_vm9, %v2486_v17, -inf }
0x1850   :  { %2497 = vmax.xlane.f32.xlu2 %v2496_v49 }
0x1862   :  { %v2455_v52 = vpop.f32.mrf.mxu3 }
0x1863   :  { %v2485_v53 = vmul.f32 0.25, %v2455_v52 }
0x1865   :  { %v2493_v54 = vsel %vm349_vm9, %v2485_v53, -inf }
0x1866   :  { %v2489_v28 = vpop.xlane.xlu0 %2488  ;;  %2494 = vmax.xlane.f32.xlu1 %v2493_v54 }
0x1867   :  { %v2499_v56 = vsub.f32 %v2373_v40, %v2489_v28 }
0x1869   :  { %v2503_v58 = vmul.f32 1.442695, %v2499_v56  ;;  %v3108_v56 = vld [vmem:[%s4213_s5 + $0x78] sm:$0xff] }
0x186a   :  { %2768 = vmatpush.msrb.mxu2 %v3108_v56 }
0x186b   :  { %3224 = vpow2.f32 %v2503_v58  ;;  %v3107_v58 = vld [vmem:[%s4213_s5 + $0x70] sm:$0xff] }
0x186c   :  { %2769 = vmatpush.msrb.mxu2 %v3107_v58 }
0x186e   :  { %v2492_v3 = vpop.xlane.xlu0 %2491 }
0x186f   :  { %v2500_v6 = vsub.f32 %v2374_v44, %v2492_v3 }
0x1871   :  { %v3225_v33 = vpop.eup %3224  ;;  %v2505_v8 = vmul.f32 1.442695, %v2500_v6 }
0x1872   :  { %v2511_v59 = vsel %vm349_vm9, %v3225_v33, 0.0 }
0x1873   :  { %2512 = vadd.xlane.f32.xlu1 %v2511_v59  ;;  %v3105_v59 = vld [vmem:[%s4213_s5 + $0x60] sm:$0xff] }
0x18c3   :  { %v2498_v60 = vpop.xlane.xlu2 %2497 }
0x18c4   :  { %v2502_v62 = vsub.f32 %v2486_v17, %v2498_v60 }
0x18c6   :  { %v2509_v63 = vmul.f32 1.442695, %v2502_v62 }
0x18c8   :  { %3226 = vpow2.f32 %v2509_v63 }
0x18ce   :  { %v3227_v39 = vpop.eup %3226 }
0x18cf   :  { %v2520_v1 = vsel %vm349_vm9, %v3227_v39, 0.0 }
0x18d0   :  { %2521 = vadd.xlane.f32.xlu1 %v2520_v1 }
0x18d9   :  { %v2495_v4 = vpop.xlane.xlu1 %2494 }
0x18da   :  { %v2501_v5 = vsub.f32 %v2485_v53, %v2495_v4 }
0x18dc   :  { %v2507_v7 = vmul.f32 1.442695, %v2501_v5 }
0x18de   :  { %3228 = vpow2.f32 %v2507_v7 }
0x18df   :  { %3230 = vpow2.f32 %v2505_v8 }
0x18e4   :  { %v3229_v11 = vpop.eup %3228 }
0x18e5   :  { %v2517_v12 = vsel %vm349_vm9, %v3229_v11, 0.0  ;;  %v3231_v15 = vpop.eup %3230 }
0x18e6   :  { %v2513_v13 = vpop.xlane.xlu1 %2512  ;;  %2518 = vadd.xlane.f32.xlu0 %v2517_v12  ;;  %v2514_v18 = vsel %vm349_vm9, %v3231_v15, 0.0 }
0x18e7   :  { %3232 = vrcp.f32 %v2513_v13 }
0x18ed   :  { %v3233_v16 = vpop.eup %3232 }
0x18ee   :  { %v2527_v19 = vmul.f32 %v3233_v16, %v3225_v33  ;;  %2515 = vadd.xlane.f32.xlu0 %v2514_v18  ;;  %v3106_v33 = vld [vmem:[%s4213_s5 + $0x68] sm:$0xff] }
0x18ef   :  { %2770 = vmatpush.msrb.mxu2 %v3106_v33  ;;  %v2837_v33 = vperm.slane %v4072_v9, 5 }
0x18f0   :  { %3093 = vmatmul.msk.f32.vlgmr.msrb.gmra.mxu3 %vm349_vm9, %v2527_v19  ;;  %v2741_v19 = vperm.slane %v4072_v9, 4 }
0x18f1   :  { %2771 = vmatpush.msrb.mxu2 %v3105_v59 }
0x1943   :  { %v2522_v20 = vpop.xlane.xlu1 %2521 }
0x1944   :  { %3234 = vrcp.f32 %v2522_v20 }
0x194a   :  { %v3235_v21 = vpop.eup %3234 }
0x194b   :  { %v2530_v23 = vmul.f32 %v3235_v21, %v3227_v39 }
0x194d   :  { %3100 = vmatmul.msk.f32.vlgmr.msra.gmra.mxu3 %vm349_vm9, %v2530_v23 }
0x1959   :  { %v2519_v51 = vpop.xlane.xlu0 %2518 }
0x195a   :  { %3236 = vrcp.f32 %v2519_v51 }
0x1960   :  { %v3237_v22 = vpop.eup %3236 }
0x1961   :  { %v2529_v2 = vmul.f32 %v3237_v22, %v3229_v11  ;;  %v2516_v57 = vpop.xlane.xlu0 %2515 }
0x1962   :  { %3238 = vrcp.f32 %v2516_v57 }
0x1963   :  { %3099 = vmatmul.msk.f32.vlgmr.msra.gmra.mxu2 %vm349_vm9, %v2529_v2 }
0x1968   :  { %v3239_v26 = vpop.eup %3238 }
0x1969   :  { %v2528_v27 = vmul.f32 %v3239_v26, %v3231_v15  ;;  %v2738_v15 = vperm.slane %v4072_v9, 3  ;;  %v3118_v26 = vld [vmem:[%s4214_s6 + $0xf8] sm:$0xff] }
0x196a   :  { %2820 = vmatpush.msrb.mxu1 %v3118_v26 }
0x196b   :  { %3094 = vmatmul.msk.f32.vlgmr.msra.gmra.mxu0 %vm349_vm9, %v2528_v27  ;;  %v3117_v27 = vld [vmem:[%s4214_s6 + $0xf0] sm:$0xff] }
0x196c   :  { %2821 = vmatpush.msrb.mxu1 %v3117_v27 }
0x1973   :  { %v2554_v29 = vpop.f32.mrf.mxu3 }
0x1974   :  { %3097 = vmatmul.msk.f32.vlgmr.msra.gmra.mxu1 %vm182_vm8, %v2554_v29  ;;  %v3116_v29 = vld [vmem:[%s4214_s6 + $0xe8] sm:$0xff] }
0x1975   :  { %2822 = vmatpush.msrb.mxu1 %v3116_v29 }
0x1977   :  { %2823 = vmatpush.msrb.mxu1 %v3115_v30 }
0x1979   :  { %2824 = vmatpush.msrb.mxu1 %v3114_v31 }
0x19d0   :  { %v2657_v61 = vpop.f32.mrf.mxu3 }
0x19e6   :  { %v2634_v14 = vpop.f32.mrf.mxu2 }
0x19e7   :  { %3103 = vmatmul.msk.f32.vlgmr.msrb.gmra.mxu0 %vm182_vm8, %v2634_v14  ;;  %v3113_v14 = vld [vmem:[%s4214_s6 + $0xd0] sm:$0xff] }
0x19e8   :  { %v2577_v32 = vpop.f32.mrf.mxu0  ;;  %2825 = vmatpush.msrb.mxu1 %v3113_v14 }
0x19e9   :  { %3098 = vmatmul.msk.f32.gmra.mxu1 %vm182_vm8, %v2577_v32  ;;  %v3112_v32 = vld [vmem:[%s4214_s6 + $0xc8] sm:$0xff] }
0x19ea   :  { %2826 = vmatpush.msrb.mxu1 %v3112_v32 }
0x19ef   :  { %3104 = vmatmul.msk.f32.gmra.mxu0 %vm182_vm8, %v2657_v61  ;;  %v3111_v61 = vld [vmem:[%s4214_s6 + $0xc0] sm:$0xff]  ;;  %s3278_s6 = smov [#allocation2]  }
0x19f0   :  { %2827 = vmatpush.msrb.mxu1 %v3111_v61  ;;  %s2846_s30 = sshll.u32 %s3278_s6, 4  ;;  %s2847_s30 = int_to_ptr.vmem [resolvable:$true] %s2846_s30 }
0x19f1   :  { %v2606_v50 = vpop.f32.mrf.mxu1 }
0x19f2   :  { %v2612_v35 = vadd.f32 %v2606_v50, %v2532_v41 }
0x1a64   :  { %v2686_v36 = vpop.f32.mrf.mxu0 }
0x1a65   :  { %v4140_v37 = vadd.f32 %v2686_v36, %v2612_v35 }
0x1a66   :  { %v2609_v40 = vpop.f32.mrf.mxu1 }
0x1a67   :  { %v2694_v38 = vsel %vm36_vm0, %v4140_v37, 0.0  ;;  %v2613_v43 = vadd.f32 %v2609_v40, %v2533_v42 }
0x1a68   :  { %2695 = vadd.xlane.f32.xlu1 %v2694_v38 }
0x1a6c   :  { %v2689_v44 = vpop.f32.mrf.mxu0 }
0x1a6d   :  { %v4145_v45 = vadd.f32 %v2689_v44, %v2613_v43 }
0x1a6f   :  { %v2697_v46 = vsel %vm36_vm0, %v4145_v45, 0.0 }
0x1a70   :  { %2698 = vadd.xlane.f32.xlu2 %v2697_v46 }
0x1adb   :  { %v2696_v25 = vpop.xlane.xlu1 %2695 }
0x1adc   :  { %v2700_v47 = vmul.f32 %v2696_v25, %v3345_v10 }
0x1ade   :  { %v2702_v48 = vsub.f32 %v4140_v37, %v2700_v47 }
0x1ae0   :  { %v2704_v17 = vmul.f32 %v2702_v48, %v2702_v48 }
0x1ae2   :  { %v2706_v49 = vsel %vm36_vm0, %v2704_v17, 0.0 }
0x1ae3   :  { %2707 = vadd.xlane.f32.xlu0 %v2706_v49  ;;  %v2699_v52 = vpop.xlane.xlu2 %2698 }
0x1ae4   :  { %v2701_v55 = vmul.f32 %v2699_v52, %v3345_v10 }
0x1ae6   :  { %v2703_v53 = vsub.f32 %v4145_v45, %v2701_v55 }
0x1ae8   :  { %v2705_v54 = vmul.f32 %v2703_v53, %v2703_v53 }
0x1aea   :  { %v2709_v28 = vsel %vm36_vm0, %v2705_v54, 0.0 }
0x1aeb   :  { %2710 = vadd.xlane.f32.xlu1 %v2709_v28 }
0x1b56   :  { %v2708_v60 = vpop.xlane.xlu0 %2707 }
0x1b57   :  { %v2712_v62 = vmul.f32 %v2708_v60, %v3345_v10 }
0x1b59   :  { %v2714_v63 = vadd.f32 1e-05, %v2712_v62 }
0x1b5b   :  { %3240 = vrsqrt.f32 %v2714_v63  ;;  %vm2722_vm9 = vweird.f32 %v2714_v63 }
0x1b5e   :  { %v2711_v39 = vpop.xlane.xlu1 %2710 }
0x1b5f   :  { %v2713_v1 = vmul.f32 %v2711_v39, %v3345_v10 }
0x1b61   :  { %v3241_v3 = vpop.eup %3240  ;;  %v2715_v4 = vadd.f32 1e-05, %v2713_v1 }
0x1b62   :  { %v2717_v5 = vmul.f32 %v3241_v3, %v2714_v63  ;;  %vm2723_vm8 = vweird.f32 %v3241_v3 }
0x1b63   :  { %3242 = vrsqrt.f32 %v2715_v4  ;;  %vm2724_vm10 = vmor %vm2722_vm9, %vm2723_vm8  ;;  %vm2732_vm12 = vweird.f32 %v2715_v4 }
0x1b64   :  { %v2718_v6 = vmul.f32 %v3241_v3, %v2717_v5 }
0x1b66   :  { %v2719_v7 = vmul.f32 0.5, %v2718_v6 }
0x1b68   :  { %v2720_v8 = vsub.f32 1.5, %v2719_v7 }
0x1b69   :  { %v3243_v11 = vpop.eup %3242 }
0x1b6a   :  { %v2721_v12 = vmul.f32 %v3241_v3, %v2720_v8  ;;  %v2727_v13 = vmul.f32 %v3243_v11, %v2715_v4  ;;  %vm2733_vm11 = vweird.f32 %v3243_v11 }
0x1b6b   :  { %vm2734_vm13 = vmor %vm2732_vm12, %vm2733_vm11 }
0x1b6c   :  { %v2725_v16 = vsel %vm2724_vm10, %v3241_v3, %v2721_v12  ;;  %v2728_v18 = vmul.f32 %v3243_v11, %v2727_v13 }
0x1b6d   :  { %v2736_v10 = vmul.f32 %v2725_v16, %v2702_v48 }
0x1b6e   :  { %v2729_v20 = vmul.f32 0.5, %v2728_v18 }
0x1b6f   :  { %v2739_v21 = vmul.f32 %v2738_v15, %v2736_v10 }
0x1b70   :  { %v2730_v23 = vsub.f32 1.5, %v2729_v20 }
0x1b71   :  { %v2742_v0 = vadd.f32 %v2741_v19, %v2739_v21 }
0x1b72   :  { %v2731_v24 = vmul.f32 %v3243_v11, %v2730_v23 }
0x1b73   :  { %3109 = vmatmul.msk.f32.vlgmr.msrb.gmra.mxu2 %vm36_vm0, %v2742_v0 }
0x1b74   :  { %v2735_v51 = vsel %vm2734_vm13, %v3243_v11, %v2731_v24 }
0x1b75   :  { %v2737_v22 = vmul.f32 %v2735_v51, %v2703_v53 }
0x1b77   :  { %v2740_v2 = vmul.f32 %v2738_v15, %v2737_v22 }
0x1b79   :  { %v2743_v57 = vadd.f32 %v2741_v19, %v2740_v2 }
0x1b7b   :  { %3110 = vmatmul.msk.f32.gmra.mxu2 %vm36_vm0, %v2743_v57 }
0x1bf6   :  { %v2773_v50 = vpop.f32.mrf.mxu2 }
0x1bf7   :  { %v2774_v41 = vadd.f32 %v2773_v50, %v2749_v34 }
0x1bf9   :  { %v2779_v35 = vmul.f32 %v2774_v41, %v2774_v41 }
0x1bfb   :  { %v2781_v36 = vmul.f32 %v2779_v35, %v2774_v41 }
0x1bfd   :  { %v2783_v38 = vmul.f32 0.044715, %v2781_v36 }
0x1bfe   :  { %v2776_v40 = vpop.f32.mrf.mxu2 }
0x1bff   :  { %v2785_v42 = vadd.f32 %v2783_v38, %v2774_v41  ;;  %v2777_v43 = vadd.f32 %v2776_v40, %v2749_v34 }
0x1c01   :  { %v2787_v44 = vmul.f32 0.7978846, %v2785_v42  ;;  %v2780_v46 = vmul.f32 %v2777_v43, %v2777_v43 }
0x1c03   :  { %3244 = vtanh.f32 %v2787_v44  ;;  %v2782_v25 = vmul.f32 %v2780_v46, %v2777_v43 }
0x1c05   :  { %v2784_v47 = vmul.f32 0.044715, %v2782_v25 }
0x1c07   :  { %v2786_v48 = vadd.f32 %v2784_v47, %v2777_v43 }
0x1c09   :  { %v3245_v17 = vpop.eup %3244  ;;  %v2788_v49 = vmul.f32 0.7978846, %v2786_v48 }
0x1c0a   :  { %v2791_v52 = vadd.f32 1.0, %v3245_v17 }
0x1c0b   :  { %3246 = vtanh.f32 %v2788_v49 }
0x1c0c   :  { %v2793_v55 = vmul.f32 0.5, %v2791_v52 }
0x1c0e   :  { %v2795_v53 = vmul.f32 %v2793_v55, %v2774_v41 }
0x1c10   :  { %3119 = vmatmul.msk.f32.vlgmr.msrb.gmra.mxu1 %vm666_vm1, %v2795_v53 }
0x1c11   :  { %v3247_v54 = vpop.eup %3246 }
0x1c12   :  { %v2792_v28 = vadd.f32 1.0, %v3247_v54 }
0x1c14   :  { %v2794_v56 = vmul.f32 0.5, %v2792_v28 }
0x1c16   :  { %v2796_v58 = vmul.f32 %v2794_v56, %v2777_v43 }
0x1c18   :  { %3120 = vmatmul.msk.f32.gmra.mxu1 %vm666_vm1, %v2796_v58 }
0x1c8d   :  { %v2829_v59 = vpop.f32.mrf.mxu1 }
0x1c8e   :  { %v2835_v60 = vadd.f32 %v2829_v59, %v4140_v37 }
0x1c90   :  { %v2838_v62 = vadd.f32 %v2837_v33, %v2835_v60 }
0x1c92   :  { %2840 = vst.msk [vmem:[#allocation2] sm:$0xff] %vm36_vm0, %v2838_v62 }
0x1c95   :  { %v2832_v63 = vpop.f32.mrf.mxu1 }
0x1c96   :  { %v2836_v39 = vadd.f32 %v2832_v63, %v4145_v45 }
0x1c98   :  { %v2839_v1 = vadd.f32 %v2837_v33, %v2836_v39 }
0x1c9a   :  { %2841 = vst.msk [vmem:[#allocation2 + $0x8] sm:$0xff] %vm36_vm0, %v2839_v1 }
0x1c9b   :  { %2854 = dma.vmem_to_hbm [thread:$0]  %s2847_s30, 256, %s2849_s8, [#allocation3], %s3279_s12, %s3279_s12, %s3280_s4  }
0x1c9c   :  { %3273 = dma.done.wait [#allocation3], 256  }
0x1c9d   :  { %3274 = vsyncadd [#allocation3], 4294967040 }
0x1c9e   :  { %2859 = vsyncpa [#allocation3], 1 }

</bundles_post_ra>
